<compile_context>
chip_gen: v7x
topology: tpu7x:2x2x1
jax: 0.10.0
libtpu: 0.0.40
codegen_flags: <defaults>
</compile_context>

<pallas_src>
import jax
import jax.numpy as jnp
from jax.experimental import pallas as pl
from jax.experimental.pallas import tpu as pltpu

# ---------------------------- model configuration ---------------------------
BATCH = 2
WAVE_LEN = 256
CONV_DIMS = (32, 32, 32)
CONV_KERNELS = (4, 2, 2)
CONV_STRIDES = (4, 2, 2)          # kernel == stride -> non-overlapping patches
HIDDEN = 32
NUM_HEADS = 4
HEAD_DIM = HIDDEN // NUM_HEADS
FFN_DIM = 64
NUM_LAYERS = 2
POS_CONV_KERNEL = 4
POS_CONV_GROUPS = 2

MXU_DTYPE = jnp.bfloat16          # matmul operand dtype (f32 accumulation)

# ------------------- packed-parameter layout (static offsets) ----------------
# bf16 matrix slab: all 32-lane weight matrices stacked along rows, 8-aligned.
M_W0 = 0                                              # (K0*1, C0) = (4, 32)
M_W1 = 8                                              # (K1*C0,C1) = (64,32)
M_W2 = M_W1 + CONV_KERNELS[1] * CONV_DIMS[0]          # 72
M_FP = M_W2 + CONV_KERNELS[2] * CONV_DIMS[1]          # 136  (C2, H) = (32,32)
M_POS = M_FP + CONV_DIMS[2]                           # 168  (Kp*H, H) = (128,32)
M_ROWS = M_POS + POS_CONV_KERNEL * HIDDEN             # 296

# f32 vector slab: one padded 128-lane row per small parameter.
VEC_WIDTH = 128
V_GN_G, V_GN_B = 0, 1
V_FP_LN_G, V_FP_LN_B = 2, 3
V_FP_B, V_POS_B = 4, 5
V_ENC_LN_G, V_ENC_LN_B = 6, 7
V_LAYER_BASE, V_PER_LAYER = 8, 8
# per-layer row offsets within a layer's block:
V_QKV_B, V_O_B, V_LN1_G, V_LN1_B, V_FFN_B1, V_FFN_B2, V_LN2_G, V_LN2_B = range(8)
V_ROWS = V_LAYER_BASE + V_PER_LAYER * NUM_LAYERS      # 24


# ------------------------------ fused kernel --------------------------------
def _hubert_kernel(
    wave_ref,        # (1, T0, K0)  f32  – one utterance, pre-patched
    mats_ref,        # (M_ROWS, 32) bf16 – [w0|w1|w2|fp_w|pos_w] row-stacked
    vecs_ref,        # (V_ROWS,128) f32  – biases / LN & GN affine params
    qkv_w_ref,       # (L, H, 3H)   bf16
    o_w_ref,         # (L, H, H)    f32  (sliced per 8-row head, cast after slice)
    ffn_w1_ref,      # (L, H, F)    bf16
    ffn_w2_ref,      # (L, F, H)    bf16
    out_ref,         # (1, S, H)    f32
    conv_ref,        # (T0, C0)     f32  VMEM scratch for strided conv reads
):
    f32 = jnp.float32

    def vrow(r, n=HIDDEN):
        return vecs_ref[r:r + 1, 0:n]                          # (1, n) f32

    def mm(a, w):
        # MXU matmul: bf16 operands, f32 accumulation.
        return jnp.dot(a.astype(MXU_DTYPE), w.astype(MXU_DTYPE),
                       preferred_element_type=f32)

    def layer_norm(x, g, b):
        mu = jnp.mean(x, axis=-1, keepdims=True)
        var = jnp.mean((x - mu) ** 2, axis=-1, keepdims=True)
        return (x - mu) * jax.lax.rsqrt(var + 1e-5) * g + b

    def gelu(x):
        # TODO(synk): HF HuBERT uses exact (erf) GELU; tanh approximation keeps
        # the transcendental on the EUP path and lowers robustly in Mosaic.
        return jax.nn.gelu(x, approximate=True)

    # ---------------- feature extractor: zero-mean / unit-var ----------------
    # TODO(synk): hubert-base's Wav2Vec2FeatureExtractor has do_normalize=False;
    # normalization kept here to match the previous kernel's preprocessing.
    x = wave_ref[0]                                             # (T0, K0)
    mu = jnp.mean(jnp.mean(x, axis=1, keepdims=True), axis=0, keepdims=True)
    d = x - mu
    var = jnp.mean(jnp.mean(d * d, axis=1, keepdims=True), axis=0, keepdims=True)
    x = d * jax.lax.rsqrt(var + 1e-7)

    # ------------------------------ conv encoder -----------------------------
    # conv0: kernel 4 == stride 4, C_in = 1  ->  rows of `x` ARE the patches.
    h = mm(x, mats_ref[M_W0:M_W0 + CONV_KERNELS[0], :])         # (T0, C0)
    # GroupNorm(num_groups == channels): per-channel stats over time, then GELU.
    m = jnp.mean(h, axis=0, keepdims=True)
    v = jnp.mean((h - m) ** 2, axis=0, keepdims=True)
    h = (h - m) * jax.lax.rsqrt(v + 1e-5) * vrow(V_GN_G) + vrow(V_GN_B)
    h = gelu(h)

    # conv1 / conv2: kernel == stride, so y[t] = sum_j h[t*k + j] @ W_j.
    # Stage h in VMEM scratch once; read patches back as strided sublane slices
    # (no selector matmuls, no iota/compare, no in-kernel reshape).
    def fold_conv(h_in, w_row0, kernel, c_in):
        t_in = h_in.shape[0]
        t_out = t_in // kernel
        conv_ref[0:t_in, :] = h_in
        y = None
        for j in range(kernel):
            patch = conv_ref[pl.ds(j, t_out, stride=kernel), 0:c_in]
            term = mm(patch, mats_ref[w_row0 + j * c_in:w_row0 + (j + 1) * c_in, :])
            y = term if y is None else y + term
        return y

    h = gelu(fold_conv(h, M_W1, CONV_KERNELS[1], CONV_DIMS[0]))  # (T0/2, C1)
    h = gelu(fold_conv(h, M_W2, CONV_KERNELS[2], CONV_DIMS[1]))  # (S,    C2)

    # --------------------------- feature projection --------------------------
    h = layer_norm(h, vrow(V_FP_LN_G), vrow(V_FP_LN_B))
    h = mm(h, mats_ref[M_FP:M_FP + CONV_DIMS[2], :]) + vrow(V_FP_B)   # (S, H)

    # ----------------------- positional conv embedding -----------------------
    # grouped Conv1d(H, H, k, pad=k//2, groups=G) + SamePad + GELU:
    # per-offset block-diagonal weight matmul on a rolled (XLU) + boundary-masked
    # copy of h.  y_j[t] = h[t + j - pad]  (zero outside [0, S)).
    seq, hid = h.shape
    pad = POS_CONV_KERNEL // 2
    row_idx = jax.lax.broadcasted_iota(jnp.int32, (seq, 1), 0)   # hoisted once
    pos = None
    for j in range(POS_CONV_KERNEL):
        s = pad - j                                              # static shift
        if s == 0:
            shifted = h
        else:
            shifted = pltpu.roll(h, shift=s % seq, axis=0)
            if s > 0:
                shifted = jnp.where(row_idx >= s, shifted, 0.0)
            else:
                shifted = jnp.where(row_idx < seq + s, shifted, 0.0)
        wj = mats_ref[M_POS + j * hid:M_POS + (j + 1) * hid, :]
        term = mm(shifted, wj)
        pos = term if pos is None else pos + term
    h = h + gelu(pos + vrow(V_POS_B))
    h = layer_norm(h, vrow(V_ENC_LN_G), vrow(V_ENC_LN_B))

    # ------------------------------- transformer ------------------------------
    scale = 1.0 / (HEAD_DIM ** 0.5)
    for l in range(NUM_LAYERS):
        base = V_LAYER_BASE + V_PER_LAYER * l
        # fused QKV projection (one matmul); cast to bf16 once, reuse for slices.
        qkv = (mm(h, qkv_w_ref[l]) + vrow(base + V_QKV_B, 3 * HIDDEN)
               ).astype(MXU_DTYPE)                               # (S, 3H) bf16
        o_w_l = o_w_ref[l]                                       # (H, H) f32
        attn = None
        for hd in range(NUM_HEADS):
            lo, hi = hd * HEAD_DIM, (hd + 1) * HEAD_DIM
            q = qkv[:, lo:hi]
            k = qkv[:, HIDDEN + lo:HIDDEN + hi]
            v = qkv[:, 2 * HIDDEN + lo:2 * HIDDEN + hi]
            s = jax.lax.dot_general(q, k, (((1,), (1,)), ((), ())),
                                    preferred_element_type=f32) * scale  # (S,S)
            s = s - jnp.max(s, axis=-1, keepdims=True)
            p = jnp.exp(s)
            p = p * pl.reciprocal(jnp.sum(p, axis=-1, keepdims=True), approx=True)
            ctx = jnp.dot(p.astype(MXU_DTYPE), v,
                          preferred_element_type=f32)            # (S, Dh)
            # head-row slice of o_w == concat(heads) @ o_w ; bf16 after slicing
            term = jnp.dot(ctx.astype(MXU_DTYPE),
                           o_w_l[lo:hi, :].astype(MXU_DTYPE),
                           preferred_element_type=f32)
            attn = term if attn is None else attn + term
        h = layer_norm(h + attn + vrow(base + V_O_B),
                       vrow(base + V_LN1_G), vrow(base + V_LN1_B))
        f = gelu(mm(h, ffn_w1_ref[l]) + vrow(base + V_FFN_B1, FFN_DIM))
        f = mm(f, ffn_w2_ref[l]) + vrow(base + V_FFN_B2)
        h = layer_norm(h + f, vrow(base + V_LN2_G), vrow(base + V_LN2_B))

    # Only HBM write of the whole model for this utterance.
    out_ref[0] = h.astype(out_ref.dtype)


# ------------------------------- forward wrapper ------------------------------
def lang_hubert_forward(wave, kp):
    """wave: (B, L) float32 -> last_hidden_state (B, S, HIDDEN)."""
    B, L = wave.shape
    k0 = CONV_KERNELS[0]
    T0 = L // CONV_STRIDES[0]
    S = T0 // (CONV_STRIDES[1] * CONV_STRIDES[2])

    # kernel == stride for every conv layer -> im2col is a free reshape.
    wave3 = wave.reshape(B, T0, k0)

    mats, vecs = kp["mats"], kp["vecs"]
    qkv_w, o_w, ffn_w1, ffn_w2 = kp["qkv_w"], kp["o_w"], kp["ffn_w1"], kp["ffn_w2"]

    def bcast(arr):
        zeros = (0,) * arr.ndim
        return pl.BlockSpec(arr.shape, lambda b, z=zeros: z)

    return pl.pallas_call(
        _hubert_kernel,
        grid=(B,),
        out_shape=jax.ShapeDtypeStruct((B, S, HIDDEN), jnp.float32),
        in_specs=[pl.BlockSpec((1, T0, k0), lambda b: (b, 0, 0)),
                  bcast(mats), bcast(vecs), bcast(qkv_w), bcast(o_w),
                  bcast(ffn_w1), bcast(ffn_w2)],
        out_specs=pl.BlockSpec((1, S, HIDDEN), lambda b: (b, 0, 0)),
        scratch_shapes=[pltpu.VMEM((T0, CONV_DIMS[0]), jnp.float32)],
        # TODO(synk): at real HuBERT-base sizes, stream the (L,...) weight stacks
        # per layer and set vmem_limit_bytes explicitly (v7x has 64 MiB VMEM).
        compiler_params=pltpu.CompilerParams(
            dimension_semantics=("parallel",)),
    )(wave3, mats, vecs, qkv_w, o_w, ffn_w1, ffn_w2)


# ----------------------------- parameter handling -----------------------------
def init_params(key):
    """Parameters in the original (PyTorch-like) layout."""
    keys = iter(jax.random.split(key, 64))

    def w(shape, scale=0.05):
        return (scale * jax.random.normal(next(keys), shape)).astype(jnp.float32)

    ones = lambda n: jnp.ones((n,), jnp.float32)
    zeros = lambda n: jnp.zeros((n,), jnp.float32)

    p = {}
    conv_ws, c_in = [], 1
    for c_out, k in zip(CONV_DIMS, CONV_KERNELS):
        conv_ws.append(w((k, c_in, c_out), scale=0.2))
        c_in = c_out
    p["conv_ws"] = conv_ws
    p["gn_g"], p["gn_b"] = ones(CONV_DIMS[0]), zeros(CONV_DIMS[0])
    p["fp_ln_g"], p["fp_ln_b"] = ones(CONV_DIMS[-1]), zeros(CONV_DIMS[-1])
    p["fp_w"], p["fp_b"] = w((CONV_DIMS[-1], HIDDEN)), zeros(HIDDEN)
    cg = HIDDEN // POS_CONV_GROUPS
    p["pos_conv_w"] = w((POS_CONV_GROUPS, POS_CONV_KERNEL, cg, cg), scale=0.1)
    p["pos_conv_b"] = zeros(HIDDEN)
    p["enc_ln_g"], p["enc_ln_b"] = ones(HIDDEN), zeros(HIDDEN)

    layers = []
    for _ in range(NUM_LAYERS):
        layers.append(dict(
            q_w=w((HIDDEN, HIDDEN)), q_b=zeros(HIDDEN),
            k_w=w((HIDDEN, HIDDEN)), k_b=zeros(HIDDEN),
            v_w=w((HIDDEN, HIDDEN)), v_b=zeros(HIDDEN),
            o_w=w((HIDDEN, HIDDEN)), o_b=zeros(HIDDEN),
            ln1_g=ones(HIDDEN), ln1_b=zeros(HIDDEN),
            ffn_w1=w((HIDDEN, FFN_DIM)), ffn_b1=zeros(FFN_DIM),
            ffn_w2=w((FFN_DIM, HIDDEN)), ffn_b2=zeros(HIDDEN),
            ln2_g=ones(HIDDEN), ln2_b=zeros(HIDDEN),
        ))
    p["layers"] = layers
    return p


def _block_diag(blocks):
    n = sum(b.shape[0] for b in blocks)
    m = sum(b.shape[1] for b in blocks)
    out = jnp.zeros((n, m), blocks[0].dtype)
    r = c = 0
    for b in blocks:
        out = out.at[r:r + b.shape[0], c:c + b.shape[1]].set(b)
        r += b.shape[0]
        c += b.shape[1]
    return out


def pack_params(p):
    """Original-layout params -> fused kernel layout (done once, outside jit)."""
    f32 = jnp.float32

    # ---- bf16 matrix slab (row-stacked, 8-aligned offsets) ----
    w0 = p["conv_ws"][0].reshape(-1, CONV_DIMS[0])                 # (4, 32)
    w1 = p["conv_ws"][1].reshape(-1, CONV_DIMS[1])                 # (64, 32)
    w2 = p["conv_ws"][2].reshape(-1, CONV_DIMS[2])                 # (64, 32)
    G, K, _, _ = p["pos_conv_w"].shape
    pos_w = jnp.concatenate(
        [_block_diag([p["pos_conv_w"][g, j] for g in range(G)]) for j in range(K)],
        axis=0)                                                    # (Kp*H, H)
    mats = jnp.zeros((M_ROWS, HIDDEN), f32)
    mats = mats.at[M_W0:M_W0 + w0.shape[0]].set(w0)
    mats = mats.at[M_W1:M_W1 + w1.shape[0]].set(w1)
    mats = mats.at[M_W2:M_W2 + w2.shape[0]].set(w2)
    mats = mats.at[M_FP:M_FP + CONV_DIMS[-1]].set(p["fp_w"])
    mats = mats.at[M_POS:M_POS + pos_w.shape[0]].set(pos_w)
    mats = mats.astype(MXU_DTYPE)

    # ---- f32 vector slab (one padded 128-lane row per small param) ----
    def pad_row(v):
        v = v.astype(f32).reshape(-1)
        return jnp.zeros((VEC_WIDTH,), f32).at[:v.shape[0]].set(v)

    rows = [p["gn_g"], p["gn_b"], p["fp_ln_g"], p["fp_ln_b"], p["fp_b"],
            p["pos_conv_b"], p["enc_ln_g"], p["enc_ln_b"]]
    for lp in p["layers"]:
        rows += [jnp.concatenate([lp["q_b"], lp["k_b"], lp["v_b"]]),
                 lp["o_b"], lp["ln1_g"], lp["ln1_b"],
                 lp["ffn_b1"], lp["ffn_b2"], lp["ln2_g"], lp["ln2_b"]]
    assert len(rows) == V_ROWS
    vecs = jnp.stack([pad_row(v) for v in rows])                   # (V_ROWS, 128)

    # ---- per-layer stacked matmul weights ----
    layers = p["layers"]
    qkv_w = jnp.stack([jnp.concatenate([lp["q_w"], lp["k_w"], lp["v_w"]], axis=1)
                       for lp in layers]).astype(MXU_DTYPE)        # (L, H, 3H)
    o_w = jnp.stack([lp["o_w"] for lp in layers])                  # (L, H, H) f32
    ffn_w1 = jnp.stack([lp["ffn_w1"] for lp in layers]).astype(MXU_DTYPE)
    ffn_w2 = jnp.stack([lp["ffn_w2"] for lp in layers]).astype(MXU_DTYPE)

    return {"mats": mats, "vecs": vecs, "qkv_w": qkv_w, "o_w": o_w,
            "ffn_w1": ffn_w1, "ffn_w2": ffn_w2}


if __name__ == "__main__":
    key = jax.random.PRNGKey(0)
    pkey, xkey = jax.random.split(key)
    params = pack_params(init_params(pkey))
    wave = jax.random.normal(xkey, (BATCH, WAVE_LEN), jnp.float32)

    fwd = jax.jit(lang_hubert_forward)
    feats = fwd(wave, params)
    jax.block_until_ready(feats)

    expected_seq = WAVE_LEN // (CONV_STRIDES[0] * CONV_STRIDES[1] * CONV_STRIDES[2])
    assert feats.shape == (BATCH, expected_seq, HIDDEN), feats.shape
    assert bool(jnp.all(jnp.isfinite(feats)))
    print("KERNEL_OK")
</pallas_src>

<mosaic_0001>
module attributes {stable_mosaic.version = 11 : i64} {
  func.func @_hubert_kernel(%arg0: i32, %arg1: memref<1x64x4xf32, #tpu.memory_space<vmem>>, %arg2: memref<296x32xbf16, #tpu.memory_space<vmem>>, %arg3: memref<24x128xf32, #tpu.memory_space<vmem>>, %arg4: memref<2x32x96xbf16, #tpu.memory_space<vmem>>, %arg5: memref<2x32x32xf32, #tpu.memory_space<vmem>>, %arg6: memref<2x32x64xbf16, #tpu.memory_space<vmem>>, %arg7: memref<2x64x32xbf16, #tpu.memory_space<vmem>>, %arg8: memref<1x16x32xf32, #tpu.memory_space<vmem>>, %arg9: memref<64x32xf32, #tpu.memory_space<vmem>>) attributes {dimension_semantics = [#tpu.dimension_semantics<parallel>], iteration_bounds = array<i64: 2>, scalar_prefetch = 0 : i64, scratch_operands = 1 : i64, tpu.core_type = #tpu.core_type<tc>, window_params = [{transform_indices = @transform_0, window_bounds = array<i64: 1, 64, 4>}, {pipeline_mode = #tpu.pipeline_mode<synchronous>, transform_indices = @transform_1, window_bounds = array<i64: 296, 32>}, {pipeline_mode = #tpu.pipeline_mode<synchronous>, transform_indices = @transform_2, window_bounds = array<i64: 24, 128>}, {pipeline_mode = #tpu.pipeline_mode<synchronous>, transform_indices = @transform_3, window_bounds = array<i64: 2, 32, 96>}, {pipeline_mode = #tpu.pipeline_mode<synchronous>, transform_indices = @transform_4, window_bounds = array<i64: 2, 32, 32>}, {pipeline_mode = #tpu.pipeline_mode<synchronous>, transform_indices = @transform_5, window_bounds = array<i64: 2, 32, 64>}, {pipeline_mode = #tpu.pipeline_mode<synchronous>, transform_indices = @transform_6, window_bounds = array<i64: 2, 64, 32>}, {transform_indices = @transform_7, window_bounds = array<i64: 1, 16, 32>}]} {
    %c0 = arith.constant 0 : index
    %c0_0 = arith.constant 0 : index
    %c0_1 = arith.constant 0 : index
    %0 = vector.load %arg1[%c0, %c0_0, %c0_1] : memref<1x64x4xf32, #tpu.memory_space<vmem>>, vector<1x64x4xf32>
    %1 = vector.shape_cast %0 : vector<1x64x4xf32> to vector<64x4xf32>
    %cst = arith.constant dense<0.000000e+00> : vector<64xf32>
    %2 = vector.multi_reduction <add>, %1, %cst [1] : vector<64x4xf32> to vector<64xf32>
    %3 = vector.shape_cast %2 : vector<64xf32> to vector<64x1xf32>
    %cst_2 = arith.constant 4.000000e+00 : f32
    %4 = vector.broadcast %cst_2 : f32 to vector<64x1xf32>
    %5 = arith.divf %3, %4 : vector<64x1xf32>
    %cst_3 = arith.constant dense<0.000000e+00> : vector<1xf32>
    %6 = vector.multi_reduction <add>, %5, %cst_3 [0] : vector<64x1xf32> to vector<1xf32>
    %7 = vector.shape_cast %6 : vector<1xf32> to vector<1x1xf32>
    %cst_4 = arith.constant 6.400000e+01 : f32
    %8 = vector.broadcast %cst_4 : f32 to vector<1x1xf32>
    %9 = arith.divf %7, %8 : vector<1x1xf32>
    %10 = vector.broadcast %9 : vector<1x1xf32> to vector<64x4xf32>
    %11 = arith.subf %1, %10 : vector<64x4xf32>
    %12 = arith.mulf %11, %11 : vector<64x4xf32>
    %cst_5 = arith.constant dense<0.000000e+00> : vector<64xf32>
    %13 = vector.multi_reduction <add>, %12, %cst_5 [1] : vector<64x4xf32> to vector<64xf32>
    %14 = vector.shape_cast %13 : vector<64xf32> to vector<64x1xf32>
    %cst_6 = arith.constant 4.000000e+00 : f32
    %15 = vector.broadcast %cst_6 : f32 to vector<64x1xf32>
    %16 = arith.divf %14, %15 : vector<64x1xf32>
    %cst_7 = arith.constant dense<0.000000e+00> : vector<1xf32>
    %17 = vector.multi_reduction <add>, %16, %cst_7 [0] : vector<64x1xf32> to vector<1xf32>
    %18 = vector.shape_cast %17 : vector<1xf32> to vector<1x1xf32>
    %cst_8 = arith.constant 6.400000e+01 : f32
    %19 = vector.broadcast %cst_8 : f32 to vector<1x1xf32>
    %20 = arith.divf %18, %19 : vector<1x1xf32>
    %cst_9 = arith.constant 1.000000e-07 : f32
    %21 = vector.broadcast %cst_9 : f32 to vector<1x1xf32>
    %22 = arith.addf %20, %21 : vector<1x1xf32>
    %23 = math.rsqrt %22 : vector<1x1xf32>
    %24 = vector.broadcast %23 : vector<1x1xf32> to vector<64x4xf32>
    %25 = arith.mulf %11, %24 : vector<64x4xf32>
    %c0_10 = arith.constant 0 : index
    %c0_11 = arith.constant 0 : index
    %26 = vector.load %arg2[%c0_10, %c0_11] : memref<296x32xbf16, #tpu.memory_space<vmem>>, vector<4x32xbf16>
    %27 = arith.truncf %25 : vector<64x4xf32> to vector<64x4xbf16>
    %cst_12 = arith.constant dense<0.000000e+00> : vector<64x32xf32>
    %28 = tpu.matmul %27, %26, %cst_12 {dimension_numbers = #tpu.dot_dimension_numbers<[1], [0], [0], [1], [0, 0, 1, 1], [], []>} : vector<64x4xbf16>, vector<4x32xbf16>, vector<64x32xf32> -> vector<64x32xf32>
    %cst_13 = arith.constant dense<0.000000e+00> : vector<32xf32>
    %29 = vector.multi_reduction <add>, %28, %cst_13 [0] : vector<64x32xf32> to vector<32xf32>
    %30 = vector.shape_cast %29 : vector<32xf32> to vector<1x32xf32>
    %cst_14 = arith.constant 6.400000e+01 : f32
    %31 = vector.broadcast %cst_14 : f32 to vector<1x32xf32>
    %32 = arith.divf %30, %31 : vector<1x32xf32>
    %33 = vector.broadcast %32 : vector<1x32xf32> to vector<64x32xf32>
    %34 = arith.subf %28, %33 : vector<64x32xf32>
    %35 = arith.mulf %34, %34 : vector<64x32xf32>
    %cst_15 = arith.constant dense<0.000000e+00> : vector<32xf32>
    %36 = vector.multi_reduction <add>, %35, %cst_15 [0] : vector<64x32xf32> to vector<32xf32>
    %37 = vector.shape_cast %36 : vector<32xf32> to vector<1x32xf32>
    %cst_16 = arith.constant 6.400000e+01 : f32
    %38 = vector.broadcast %cst_16 : f32 to vector<1x32xf32>
    %39 = arith.divf %37, %38 : vector<1x32xf32>
    %40 = vector.broadcast %32 : vector<1x32xf32> to vector<64x32xf32>
    %41 = arith.subf %28, %40 : vector<64x32xf32>
    %cst_17 = arith.constant 9.99999974E-6 : f32
    %42 = vector.broadcast %cst_17 : f32 to vector<1x32xf32>
    %43 = arith.addf %39, %42 : vector<1x32xf32>
    %44 = math.rsqrt %43 : vector<1x32xf32>
    %45 = vector.broadcast %44 : vector<1x32xf32> to vector<64x32xf32>
    %46 = arith.mulf %41, %45 : vector<64x32xf32>
    %c0_18 = arith.constant 0 : index
    %c0_19 = arith.constant 0 : index
    %47 = vector.load %arg3[%c0_18, %c0_19] : memref<24x128xf32, #tpu.memory_space<vmem>>, vector<1x32xf32>
    %48 = vector.broadcast %47 : vector<1x32xf32> to vector<64x32xf32>
    %49 = arith.mulf %46, %48 : vector<64x32xf32>
    %c1 = arith.constant 1 : index
    %c0_20 = arith.constant 0 : index
    %50 = vector.load %arg3[%c1, %c0_20] : memref<24x128xf32, #tpu.memory_space<vmem>>, vector<1x32xf32>
    %51 = vector.broadcast %50 : vector<1x32xf32> to vector<64x32xf32>
    %52 = arith.addf %49, %51 : vector<64x32xf32>
    %53 = arith.mulf %52, %52 : vector<64x32xf32>
    %54 = arith.mulf %52, %53 : vector<64x32xf32>
    %cst_21 = arith.constant 4.471500e-02 : f32
    %55 = vector.broadcast %cst_21 : f32 to vector<64x32xf32>
    %56 = arith.mulf %55, %54 : vector<64x32xf32>
    %57 = arith.addf %52, %56 : vector<64x32xf32>
    %cst_22 = arith.constant 0.797884583 : f32
    %58 = vector.broadcast %cst_22 : f32 to vector<64x32xf32>
    %59 = arith.mulf %58, %57 : vector<64x32xf32>
    %60 = math.tanh %59 : vector<64x32xf32>
    %cst_23 = arith.constant 1.000000e+00 : f32
    %61 = vector.broadcast %cst_23 : f32 to vector<64x32xf32>
    %62 = arith.addf %61, %60 : vector<64x32xf32>
    %cst_24 = arith.constant 5.000000e-01 : f32
    %63 = vector.broadcast %cst_24 : f32 to vector<64x32xf32>
    %64 = arith.mulf %63, %62 : vector<64x32xf32>
    %65 = arith.mulf %52, %64 : vector<64x32xf32>
    %c0_25 = arith.constant 0 : index
    %c0_26 = arith.constant 0 : index
    %66 = vector.load %arg9[%c0_25, %c0_26] : memref<64x32xf32, #tpu.memory_space<vmem>>, vector<64x32xf32>
    tpu.vector_store %arg9[%c0_25, %c0_26], %65 {strides = array<i32>} : memref<64x32xf32, #tpu.memory_space<vmem>>, vector<64x32xf32>,
    %c0_27 = arith.constant 0 : index
    %c0_28 = arith.constant 0 : index
    %67 = tpu.strided_load %arg9[%c0_27, %c0_28] {strides = array<i32: 2, 1>} : memref<64x32xf32, #tpu.memory_space<vmem>>, vector<32x32xf32>
    %c8 = arith.constant 8 : index
    %c0_29 = arith.constant 0 : index
    %68 = vector.load %arg2[%c8, %c0_29] : memref<296x32xbf16, #tpu.memory_space<vmem>>, vector<32x32xbf16>
    %69 = arith.truncf %67 : vector<32x32xf32> to vector<32x32xbf16>
    %cst_30 = arith.constant dense<0.000000e+00> : vector<32x32xf32>
    %70 = tpu.matmul %69, %68, %cst_30 {dimension_numbers = #tpu.dot_dimension_numbers<[1], [0], [0], [1], [0, 0, 1, 1], [], []>} : vector<32x32xbf16>, vector<32x32xbf16>, vector<32x32xf32> -> vector<32x32xf32>
    %c1_31 = arith.constant 1 : index
    %c0_32 = arith.constant 0 : index
    %71 = tpu.strided_load %arg9[%c1_31, %c0_32] {strides = array<i32: 2, 1>} : memref<64x32xf32, #tpu.memory_space<vmem>>, vector<32x32xf32>
    %c40 = arith.constant 40 : index
    %c0_33 = arith.constant 0 : index
    %72 = vector.load %arg2[%c40, %c0_33] : memref<296x32xbf16, #tpu.memory_space<vmem>>, vector<32x32xbf16>
    %73 = arith.truncf %71 : vector<32x32xf32> to vector<32x32xbf16>
    %cst_34 = arith.constant dense<0.000000e+00> : vector<32x32xf32>
    %74 = tpu.matmul %73, %72, %cst_34 {dimension_numbers = #tpu.dot_dimension_numbers<[1], [0], [0], [1], [0, 0, 1, 1], [], []>} : vector<32x32xbf16>, vector<32x32xbf16>, vector<32x32xf32> -> vector<32x32xf32>
    %75 = arith.addf %70, %74 : vector<32x32xf32>
    %76 = arith.mulf %75, %75 : vector<32x32xf32>
    %77 = arith.mulf %75, %76 : vector<32x32xf32>
    %cst_35 = arith.constant 4.471500e-02 : f32
    %78 = vector.broadcast %cst_35 : f32 to vector<32x32xf32>
    %79 = arith.mulf %78, %77 : vector<32x32xf32>
    %80 = arith.addf %75, %79 : vector<32x32xf32>
    %cst_36 = arith.constant 0.797884583 : f32
    %81 = vector.broadcast %cst_36 : f32 to vector<32x32xf32>
    %82 = arith.mulf %81, %80 : vector<32x32xf32>
    %83 = math.tanh %82 : vector<32x32xf32>
    %cst_37 = arith.constant 1.000000e+00 : f32
    %84 = vector.broadcast %cst_37 : f32 to vector<32x32xf32>
    %85 = arith.addf %84, %83 : vector<32x32xf32>
    %cst_38 = arith.constant 5.000000e-01 : f32
    %86 = vector.broadcast %cst_38 : f32 to vector<32x32xf32>
    %87 = arith.mulf %86, %85 : vector<32x32xf32>
    %88 = arith.mulf %75, %87 : vector<32x32xf32>
    %c0_39 = arith.constant 0 : index
    %c0_40 = arith.constant 0 : index
    %89 = vector.load %arg9[%c0_39, %c0_40] : memref<64x32xf32, #tpu.memory_space<vmem>>, vector<32x32xf32>
    tpu.vector_store %arg9[%c0_39, %c0_40], %88 {strides = array<i32>} : memref<64x32xf32, #tpu.memory_space<vmem>>, vector<32x32xf32>,
    %c0_41 = arith.constant 0 : index
    %c0_42 = arith.constant 0 : index
    %90 = tpu.strided_load %arg9[%c0_41, %c0_42] {strides = array<i32: 2, 1>} : memref<64x32xf32, #tpu.memory_space<vmem>>, vector<16x32xf32>
    %c72 = arith.constant 72 : index
    %c0_43 = arith.constant 0 : index
    %91 = vector.load %arg2[%c72, %c0_43] : memref<296x32xbf16, #tpu.memory_space<vmem>>, vector<32x32xbf16>
    %92 = arith.truncf %90 : vector<16x32xf32> to vector<16x32xbf16>
    %cst_44 = arith.constant dense<0.000000e+00> : vector<16x32xf32>
    %93 = tpu.matmul %92, %91, %cst_44 {dimension_numbers = #tpu.dot_dimension_numbers<[1], [0], [0], [1], [0, 0, 1, 1], [], []>} : vector<16x32xbf16>, vector<32x32xbf16>, vector<16x32xf32> -> vector<16x32xf32>
    %c1_45 = arith.constant 1 : index
    %c0_46 = arith.constant 0 : index
    %94 = tpu.strided_load %arg9[%c1_45, %c0_46] {strides = array<i32: 2, 1>} : memref<64x32xf32, #tpu.memory_space<vmem>>, vector<16x32xf32>
    %c104 = arith.constant 104 : index
    %c0_47 = arith.constant 0 : index
    %95 = vector.load %arg2[%c104, %c0_47] : memref<296x32xbf16, #tpu.memory_space<vmem>>, vector<32x32xbf16>
    %96 = arith.truncf %94 : vector<16x32xf32> to vector<16x32xbf16>
    %cst_48 = arith.constant dense<0.000000e+00> : vector<16x32xf32>
    %97 = tpu.matmul %96, %95, %cst_48 {dimension_numbers = #tpu.dot_dimension_numbers<[1], [0], [0], [1], [0, 0, 1, 1], [], []>} : vector<16x32xbf16>, vector<32x32xbf16>, vector<16x32xf32> -> vector<16x32xf32>
    %98 = arith.addf %93, %97 : vector<16x32xf32>
    %99 = arith.mulf %98, %98 : vector<16x32xf32>
    %100 = arith.mulf %98, %99 : vector<16x32xf32>
    %cst_49 = arith.constant 4.471500e-02 : f32
    %101 = vector.broadcast %cst_49 : f32 to vector<16x32xf32>
    %102 = arith.mulf %101, %100 : vector<16x32xf32>
    %103 = arith.addf %98, %102 : vector<16x32xf32>
    %cst_50 = arith.constant 0.797884583 : f32
    %104 = vector.broadcast %cst_50 : f32 to vector<16x32xf32>
    %105 = arith.mulf %104, %103 : vector<16x32xf32>
    %106 = math.tanh %105 : vector<16x32xf32>
    %cst_51 = arith.constant 1.000000e+00 : f32
    %107 = vector.broadcast %cst_51 : f32 to vector<16x32xf32>
    %108 = arith.addf %107, %106 : vector<16x32xf32>
    %cst_52 = arith.constant 5.000000e-01 : f32
    %109 = vector.broadcast %cst_52 : f32 to vector<16x32xf32>
    %110 = arith.mulf %109, %108 : vector<16x32xf32>
    %111 = arith.mulf %98, %110 : vector<16x32xf32>
    %c2 = arith.constant 2 : index
    %c0_53 = arith.constant 0 : index
    %112 = vector.load %arg3[%c2, %c0_53] : memref<24x128xf32, #tpu.memory_space<vmem>>, vector<1x32xf32>
    %c3 = arith.constant 3 : index
    %c0_54 = arith.constant 0 : index
    %113 = vector.load %arg3[%c3, %c0_54] : memref<24x128xf32, #tpu.memory_space<vmem>>, vector<1x32xf32>
    %cst_55 = arith.constant dense<0.000000e+00> : vector<16xf32>
    %114 = vector.multi_reduction <add>, %111, %cst_55 [1] : vector<16x32xf32> to vector<16xf32>
    %115 = vector.shape_cast %114 : vector<16xf32> to vector<16x1xf32>
    %cst_56 = arith.constant 3.200000e+01 : f32
    %116 = vector.broadcast %cst_56 : f32 to vector<16x1xf32>
    %117 = arith.divf %115, %116 : vector<16x1xf32>
    %118 = vector.broadcast %117 : vector<16x1xf32> to vector<16x32xf32>
    %119 = arith.subf %111, %118 : vector<16x32xf32>
    %120 = arith.mulf %119, %119 : vector<16x32xf32>
    %cst_57 = arith.constant dense<0.000000e+00> : vector<16xf32>
    %121 = vector.multi_reduction <add>, %120, %cst_57 [1] : vector<16x32xf32> to vector<16xf32>
    %122 = vector.shape_cast %121 : vector<16xf32> to vector<16x1xf32>
    %cst_58 = arith.constant 3.200000e+01 : f32
    %123 = vector.broadcast %cst_58 : f32 to vector<16x1xf32>
    %124 = arith.divf %122, %123 : vector<16x1xf32>
    %125 = vector.broadcast %117 : vector<16x1xf32> to vector<16x32xf32>
    %126 = arith.subf %111, %125 : vector<16x32xf32>
    %cst_59 = arith.constant 9.99999974E-6 : f32
    %127 = vector.broadcast %cst_59 : f32 to vector<16x1xf32>
    %128 = arith.addf %124, %127 : vector<16x1xf32>
    %129 = math.rsqrt %128 : vector<16x1xf32>
    %130 = vector.broadcast %129 : vector<16x1xf32> to vector<16x32xf32>
    %131 = arith.mulf %126, %130 : vector<16x32xf32>
    %132 = vector.broadcast %112 : vector<1x32xf32> to vector<16x32xf32>
    %133 = arith.mulf %131, %132 : vector<16x32xf32>
    %134 = vector.broadcast %113 : vector<1x32xf32> to vector<16x32xf32>
    %135 = arith.addf %133, %134 : vector<16x32xf32>
    %c136 = arith.constant 136 : index
    %c0_60 = arith.constant 0 : index
    %136 = vector.load %arg2[%c136, %c0_60] : memref<296x32xbf16, #tpu.memory_space<vmem>>, vector<32x32xbf16>
    %137 = arith.truncf %135 : vector<16x32xf32> to vector<16x32xbf16>
    %cst_61 = arith.constant dense<0.000000e+00> : vector<16x32xf32>
    %138 = tpu.matmul %137, %136, %cst_61 {dimension_numbers = #tpu.dot_dimension_numbers<[1], [0], [0], [1], [0, 0, 1, 1], [], []>} : vector<16x32xbf16>, vector<32x32xbf16>, vector<16x32xf32> -> vector<16x32xf32>
    %c4 = arith.constant 4 : index
    %c0_62 = arith.constant 0 : index
    %139 = vector.load %arg3[%c4, %c0_62] : memref<24x128xf32, #tpu.memory_space<vmem>>, vector<1x32xf32>
    %140 = vector.broadcast %139 : vector<1x32xf32> to vector<16x32xf32>
    %141 = arith.addf %138, %140 : vector<16x32xf32>
    %142 = tpu.iota {dimensions = array<i32: 0>} : vector<16x1xi32>
    %c2_i32 = arith.constant 2 : i32
    %143 = tpu.dynamic_rotate %141 by %c2_i32 dim 0 : vector<16x32xf32>, i32 -> vector<16x32xf32>
    %c2_i32_63 = arith.constant 2 : i32
    %144 = vector.broadcast %c2_i32_63 : i32 to vector<16x1xi32>
    %145 = arith.cmpi sge, %142, %144 : vector<16x1xi32>
    %cst_64 = arith.constant 0.000000e+00 : f32
    %146 = vector.shape_cast %145 : vector<16x1xi1> to vector<16x1xi1>
    %147 = vector.broadcast %146 : vector<16x1xi1> to vector<16x32xi1>
    %148 = vector.broadcast %cst_64 : f32 to vector<16x32xf32>
    %149 = arith.select %147, %143, %148 : vector<16x32xi1>, vector<16x32xf32>
    %c168 = arith.constant 168 : index
    %c0_65 = arith.constant 0 : index
    %150 = vector.load %arg2[%c168, %c0_65] : memref<296x32xbf16, #tpu.memory_space<vmem>>, vector<32x32xbf16>
    %151 = arith.truncf %149 : vector<16x32xf32> to vector<16x32xbf16>
    %cst_66 = arith.constant dense<0.000000e+00> : vector<16x32xf32>
    %152 = tpu.matmul %151, %150, %cst_66 {dimension_numbers = #tpu.dot_dimension_numbers<[1], [0], [0], [1], [0, 0, 1, 1], [], []>} : vector<16x32xbf16>, vector<32x32xbf16>, vector<16x32xf32> -> vector<16x32xf32>
    %c1_i32 = arith.constant 1 : i32
    %153 = tpu.dynamic_rotate %141 by %c1_i32 dim 0 : vector<16x32xf32>, i32 -> vector<16x32xf32>
    %c1_i32_67 = arith.constant 1 : i32
    %154 = vector.broadcast %c1_i32_67 : i32 to vector<16x1xi32>
    %155 = arith.cmpi sge, %142, %154 : vector<16x1xi32>
    %cst_68 = arith.constant 0.000000e+00 : f32
    %156 = vector.shape_cast %155 : vector<16x1xi1> to vector<16x1xi1>
    %157 = vector.broadcast %156 : vector<16x1xi1> to vector<16x32xi1>
    %158 = vector.broadcast %cst_68 : f32 to vector<16x32xf32>
    %159 = arith.select %157, %153, %158 : vector<16x32xi1>, vector<16x32xf32>
    %c200 = arith.constant 200 : index
    %c0_69 = arith.constant 0 : index
    %160 = vector.load %arg2[%c200, %c0_69] : memref<296x32xbf16, #tpu.memory_space<vmem>>, vector<32x32xbf16>
    %161 = arith.truncf %159 : vector<16x32xf32> to vector<16x32xbf16>
    %cst_70 = arith.constant dense<0.000000e+00> : vector<16x32xf32>
    %162 = tpu.matmul %161, %160, %cst_70 {dimension_numbers = #tpu.dot_dimension_numbers<[1], [0], [0], [1], [0, 0, 1, 1], [], []>} : vector<16x32xbf16>, vector<32x32xbf16>, vector<16x32xf32> -> vector<16x32xf32>
    %163 = arith.addf %152, %162 : vector<16x32xf32>
    %c232 = arith.constant 232 : index
    %c0_71 = arith.constant 0 : index
    %164 = vector.load %arg2[%c232, %c0_71] : memref<296x32xbf16, #tpu.memory_space<vmem>>, vector<32x32xbf16>
    %165 = arith.truncf %141 : vector<16x32xf32> to vector<16x32xbf16>
    %cst_72 = arith.constant dense<0.000000e+00> : vector<16x32xf32>
    %166 = tpu.matmul %165, %164, %cst_72 {dimension_numbers = #tpu.dot_dimension_numbers<[1], [0], [0], [1], [0, 0, 1, 1], [], []>} : vector<16x32xbf16>, vector<32x32xbf16>, vector<16x32xf32> -> vector<16x32xf32>
    %167 = arith.addf %163, %166 : vector<16x32xf32>
    %c15_i32 = arith.constant 15 : i32
    %168 = tpu.dynamic_rotate %141 by %c15_i32 dim 0 : vector<16x32xf32>, i32 -> vector<16x32xf32>
    %c15_i32_73 = arith.constant 15 : i32
    %169 = vector.broadcast %c15_i32_73 : i32 to vector<16x1xi32>
    %170 = arith.cmpi slt, %142, %169 : vector<16x1xi32>
    %cst_74 = arith.constant 0.000000e+00 : f32
    %171 = vector.shape_cast %170 : vector<16x1xi1> to vector<16x1xi1>
    %172 = vector.broadcast %171 : vector<16x1xi1> to vector<16x32xi1>
    %173 = vector.broadcast %cst_74 : f32 to vector<16x32xf32>
    %174 = arith.select %172, %168, %173 : vector<16x32xi1>, vector<16x32xf32>
    %c264 = arith.constant 264 : index
    %c0_75 = arith.constant 0 : index
    %175 = vector.load %arg2[%c264, %c0_75] : memref<296x32xbf16, #tpu.memory_space<vmem>>, vector<32x32xbf16>
    %176 = arith.truncf %174 : vector<16x32xf32> to vector<16x32xbf16>
    %cst_76 = arith.constant dense<0.000000e+00> : vector<16x32xf32>
    %177 = tpu.matmul %176, %175, %cst_76 {dimension_numbers = #tpu.dot_dimension_numbers<[1], [0], [0], [1], [0, 0, 1, 1], [], []>} : vector<16x32xbf16>, vector<32x32xbf16>, vector<16x32xf32> -> vector<16x32xf32>
    %178 = arith.addf %167, %177 : vector<16x32xf32>
    %c5 = arith.constant 5 : index
    %c0_77 = arith.constant 0 : index
    %179 = vector.load %arg3[%c5, %c0_77] : memref<24x128xf32, #tpu.memory_space<vmem>>, vector<1x32xf32>
    %180 = vector.broadcast %179 : vector<1x32xf32> to vector<16x32xf32>
    %181 = arith.addf %178, %180 : vector<16x32xf32>
    %182 = arith.mulf %181, %181 : vector<16x32xf32>
    %183 = arith.mulf %181, %182 : vector<16x32xf32>
    %cst_78 = arith.constant 4.471500e-02 : f32
    %184 = vector.broadcast %cst_78 : f32 to vector<16x32xf32>
    %185 = arith.mulf %184, %183 : vector<16x32xf32>
    %186 = arith.addf %181, %185 : vector<16x32xf32>
    %cst_79 = arith.constant 0.797884583 : f32
    %187 = vector.broadcast %cst_79 : f32 to vector<16x32xf32>
    %188 = arith.mulf %187, %186 : vector<16x32xf32>
    %189 = math.tanh %188 : vector<16x32xf32>
    %cst_80 = arith.constant 1.000000e+00 : f32
    %190 = vector.broadcast %cst_80 : f32 to vector<16x32xf32>
    %191 = arith.addf %190, %189 : vector<16x32xf32>
    %cst_81 = arith.constant 5.000000e-01 : f32
    %192 = vector.broadcast %cst_81 : f32 to vector<16x32xf32>
    %193 = arith.mulf %192, %191 : vector<16x32xf32>
    %194 = arith.mulf %181, %193 : vector<16x32xf32>
    %195 = arith.addf %141, %194 : vector<16x32xf32>
    %c6 = arith.constant 6 : index
    %c0_82 = arith.constant 0 : index
    %196 = vector.load %arg3[%c6, %c0_82] : memref<24x128xf32, #tpu.memory_space<vmem>>, vector<1x32xf32>
    %c7 = arith.constant 7 : index
    %c0_83 = arith.constant 0 : index
    %197 = vector.load %arg3[%c7, %c0_83] : memref<24x128xf32, #tpu.memory_space<vmem>>, vector<1x32xf32>
    %cst_84 = arith.constant dense<0.000000e+00> : vector<16xf32>
    %198 = vector.multi_reduction <add>, %195, %cst_84 [1] : vector<16x32xf32> to vector<16xf32>
    %199 = vector.shape_cast %198 : vector<16xf32> to vector<16x1xf32>
    %cst_85 = arith.constant 3.200000e+01 : f32
    %200 = vector.broadcast %cst_85 : f32 to vector<16x1xf32>
    %201 = arith.divf %199, %200 : vector<16x1xf32>
    %202 = vector.broadcast %201 : vector<16x1xf32> to vector<16x32xf32>
    %203 = arith.subf %195, %202 : vector<16x32xf32>
    %204 = arith.mulf %203, %203 : vector<16x32xf32>
    %cst_86 = arith.constant dense<0.000000e+00> : vector<16xf32>
    %205 = vector.multi_reduction <add>, %204, %cst_86 [1] : vector<16x32xf32> to vector<16xf32>
    %206 = vector.shape_cast %205 : vector<16xf32> to vector<16x1xf32>
    %cst_87 = arith.constant 3.200000e+01 : f32
    %207 = vector.broadcast %cst_87 : f32 to vector<16x1xf32>
    %208 = arith.divf %206, %207 : vector<16x1xf32>
    %209 = vector.broadcast %201 : vector<16x1xf32> to vector<16x32xf32>
    %210 = arith.subf %195, %209 : vector<16x32xf32>
    %cst_88 = arith.constant 9.99999974E-6 : f32
    %211 = vector.broadcast %cst_88 : f32 to vector<16x1xf32>
    %212 = arith.addf %208, %211 : vector<16x1xf32>
    %213 = math.rsqrt %212 : vector<16x1xf32>
    %214 = vector.broadcast %213 : vector<16x1xf32> to vector<16x32xf32>
    %215 = arith.mulf %210, %214 : vector<16x32xf32>
    %216 = vector.broadcast %196 : vector<1x32xf32> to vector<16x32xf32>
    %217 = arith.mulf %215, %216 : vector<16x32xf32>
    %218 = vector.broadcast %197 : vector<1x32xf32> to vector<16x32xf32>
    %219 = arith.addf %217, %218 : vector<16x32xf32>
    %c0_89 = arith.constant 0 : index
    %c0_90 = arith.constant 0 : index
    %c0_91 = arith.constant 0 : index
    %220 = vector.load %arg4[%c0_89, %c0_90, %c0_91] : memref<2x32x96xbf16, #tpu.memory_space<vmem>>, vector<1x32x96xbf16>
    %221 = vector.shape_cast %220 : vector<1x32x96xbf16> to vector<32x96xbf16>
    %222 = arith.truncf %219 : vector<16x32xf32> to vector<16x32xbf16>
    %cst_92 = arith.constant dense<0.000000e+00> : vector<16x96xf32>
    %223 = tpu.matmul %222, %221, %cst_92 {dimension_numbers = #tpu.dot_dimension_numbers<[1], [0], [0], [1], [0, 0, 1, 1], [], []>} : vector<16x32xbf16>, vector<32x96xbf16>, vector<16x96xf32> -> vector<16x96xf32>
    %c8_93 = arith.constant 8 : index
    %c0_94 = arith.constant 0 : index
    %224 = vector.load %arg3[%c8_93, %c0_94] : memref<24x128xf32, #tpu.memory_space<vmem>>, vector<1x96xf32>
    %225 = vector.broadcast %224 : vector<1x96xf32> to vector<16x96xf32>
    %226 = arith.addf %223, %225 : vector<16x96xf32>
    %227 = arith.truncf %226 : vector<16x96xf32> to vector<16x96xbf16>
    %c0_95 = arith.constant 0 : index
    %c0_96 = arith.constant 0 : index
    %c0_97 = arith.constant 0 : index
    %228 = vector.load %arg5[%c0_95, %c0_96, %c0_97] : memref<2x32x32xf32, #tpu.memory_space<vmem>>, vector<1x32x32xf32>
    %229 = vector.shape_cast %228 : vector<1x32x32xf32> to vector<32x32xf32>
    %230 = vector.extract_strided_slice %227 {offsets = [0, 0], sizes = [16, 8], strides = [1, 1]} : vector<16x96xbf16> to vector<16x8xbf16>
    %231 = vector.extract_strided_slice %227 {offsets = [0, 32], sizes = [16, 8], strides = [1, 1]} : vector<16x96xbf16> to vector<16x8xbf16>
    %232 = vector.extract_strided_slice %227 {offsets = [0, 64], sizes = [16, 8], strides = [1, 1]} : vector<16x96xbf16> to vector<16x8xbf16>
    %cst_98 = arith.constant dense<0.000000e+00> : vector<16x16xf32>
    %233 = tpu.matmul %230, %231, %cst_98 {dimension_numbers = #tpu.dot_dimension_numbers<[1], [1], [0], [0], [0, 0, 1, 0], [], []>} : vector<16x8xbf16>, vector<16x8xbf16>, vector<16x16xf32> -> vector<16x16xf32>
    %cst_99 = arith.constant 0.353553385 : f32
    %234 = vector.broadcast %cst_99 : f32 to vector<16x16xf32>
    %235 = arith.mulf %233, %234 : vector<16x16xf32>
    %cst_100 = arith.constant dense<0xFF800000> : vector<16xf32>
    %236 = vector.multi_reduction <maximumf>, %235, %cst_100 [1] : vector<16x16xf32> to vector<16xf32>
    %237 = vector.shape_cast %236 : vector<16xf32> to vector<16x1xf32>
    %238 = vector.broadcast %237 : vector<16x1xf32> to vector<16x16xf32>
    %239 = arith.subf %235, %238 : vector<16x16xf32>
    %240 = math.exp %239 : vector<16x16xf32>
    %cst_101 = arith.constant dense<0.000000e+00> : vector<16xf32>
    %241 = vector.multi_reduction <add>, %240, %cst_101 [1] : vector<16x16xf32> to vector<16xf32>
    %242 = vector.shape_cast %241 : vector<16xf32> to vector<16x1xf32>
    %243 = tpu.reciprocal %242 {approx = true} : vector<16x1xf32> -> vector<16x1xf32>
    %244 = vector.broadcast %243 : vector<16x1xf32> to vector<16x16xf32>
    %245 = arith.mulf %240, %244 : vector<16x16xf32>
    %246 = arith.truncf %245 : vector<16x16xf32> to vector<16x16xbf16>
    %cst_102 = arith.constant dense<0.000000e+00> : vector<16x8xf32>
    %247 = tpu.matmul %246, %232, %cst_102 {dimension_numbers = #tpu.dot_dimension_numbers<[1], [0], [0], [1], [0, 0, 1, 1], [], []>} : vector<16x16xbf16>, vector<16x8xbf16>, vector<16x8xf32> -> vector<16x8xf32>
    %248 = arith.truncf %247 : vector<16x8xf32> to vector<16x8xbf16>
    %249 = vector.extract_strided_slice %229 {offsets = [0, 0], sizes = [8, 32], strides = [1, 1]} : vector<32x32xf32> to vector<8x32xf32>
    %250 = arith.truncf %249 : vector<8x32xf32> to vector<8x32xbf16>
    %cst_103 = arith.constant dense<0.000000e+00> : vector<16x32xf32>
    %251 = tpu.matmul %248, %250, %cst_103 {dimension_numbers = #tpu.dot_dimension_numbers<[1], [0], [0], [1], [0, 0, 1, 1], [], []>} : vector<16x8xbf16>, vector<8x32xbf16>, vector<16x32xf32> -> vector<16x32xf32>
    %252 = vector.extract_strided_slice %227 {offsets = [0, 8], sizes = [16, 8], strides = [1, 1]} : vector<16x96xbf16> to vector<16x8xbf16>
    %253 = vector.extract_strided_slice %227 {offsets = [0, 40], sizes = [16, 8], strides = [1, 1]} : vector<16x96xbf16> to vector<16x8xbf16>
    %254 = vector.extract_strided_slice %227 {offsets = [0, 72], sizes = [16, 8], strides = [1, 1]} : vector<16x96xbf16> to vector<16x8xbf16>
    %cst_104 = arith.constant dense<0.000000e+00> : vector<16x16xf32>
    %255 = tpu.matmul %252, %253, %cst_104 {dimension_numbers = #tpu.dot_dimension_numbers<[1], [1], [0], [0], [0, 0, 1, 0], [], []>} : vector<16x8xbf16>, vector<16x8xbf16>, vector<16x16xf32> -> vector<16x16xf32>
    %cst_105 = arith.constant 0.353553385 : f32
    %256 = vector.broadcast %cst_105 : f32 to vector<16x16xf32>
    %257 = arith.mulf %255, %256 : vector<16x16xf32>
    %cst_106 = arith.constant dense<0xFF800000> : vector<16xf32>
    %258 = vector.multi_reduction <maximumf>, %257, %cst_106 [1] : vector<16x16xf32> to vector<16xf32>
    %259 = vector.shape_cast %258 : vector<16xf32> to vector<16x1xf32>
    %260 = vector.broadcast %259 : vector<16x1xf32> to vector<16x16xf32>
    %261 = arith.subf %257, %260 : vector<16x16xf32>
    %262 = math.exp %261 : vector<16x16xf32>
    %cst_107 = arith.constant dense<0.000000e+00> : vector<16xf32>
    %263 = vector.multi_reduction <add>, %262, %cst_107 [1] : vector<16x16xf32> to vector<16xf32>
    %264 = vector.shape_cast %263 : vector<16xf32> to vector<16x1xf32>
    %265 = tpu.reciprocal %264 {approx = true} : vector<16x1xf32> -> vector<16x1xf32>
    %266 = vector.broadcast %265 : vector<16x1xf32> to vector<16x16xf32>
    %267 = arith.mulf %262, %266 : vector<16x16xf32>
    %268 = arith.truncf %267 : vector<16x16xf32> to vector<16x16xbf16>
    %cst_108 = arith.constant dense<0.000000e+00> : vector<16x8xf32>
    %269 = tpu.matmul %268, %254, %cst_108 {dimension_numbers = #tpu.dot_dimension_numbers<[1], [0], [0], [1], [0, 0, 1, 1], [], []>} : vector<16x16xbf16>, vector<16x8xbf16>, vector<16x8xf32> -> vector<16x8xf32>
    %270 = arith.truncf %269 : vector<16x8xf32> to vector<16x8xbf16>
    %271 = vector.extract_strided_slice %229 {offsets = [8, 0], sizes = [8, 32], strides = [1, 1]} : vector<32x32xf32> to vector<8x32xf32>
    %272 = arith.truncf %271 : vector<8x32xf32> to vector<8x32xbf16>
    %cst_109 = arith.constant dense<0.000000e+00> : vector<16x32xf32>
    %273 = tpu.matmul %270, %272, %cst_109 {dimension_numbers = #tpu.dot_dimension_numbers<[1], [0], [0], [1], [0, 0, 1, 1], [], []>} : vector<16x8xbf16>, vector<8x32xbf16>, vector<16x32xf32> -> vector<16x32xf32>
    %274 = arith.addf %251, %273 : vector<16x32xf32>
    %275 = vector.extract_strided_slice %227 {offsets = [0, 16], sizes = [16, 8], strides = [1, 1]} : vector<16x96xbf16> to vector<16x8xbf16>
    %276 = vector.extract_strided_slice %227 {offsets = [0, 48], sizes = [16, 8], strides = [1, 1]} : vector<16x96xbf16> to vector<16x8xbf16>
    %277 = vector.extract_strided_slice %227 {offsets = [0, 80], sizes = [16, 8], strides = [1, 1]} : vector<16x96xbf16> to vector<16x8xbf16>
    %cst_110 = arith.constant dense<0.000000e+00> : vector<16x16xf32>
    %278 = tpu.matmul %275, %276, %cst_110 {dimension_numbers = #tpu.dot_dimension_numbers<[1], [1], [0], [0], [0, 0, 1, 0], [], []>} : vector<16x8xbf16>, vector<16x8xbf16>, vector<16x16xf32> -> vector<16x16xf32>
    %cst_111 = arith.constant 0.353553385 : f32
    %279 = vector.broadcast %cst_111 : f32 to vector<16x16xf32>
    %280 = arith.mulf %278, %279 : vector<16x16xf32>
    %cst_112 = arith.constant dense<0xFF800000> : vector<16xf32>
    %281 = vector.multi_reduction <maximumf>, %280, %cst_112 [1] : vector<16x16xf32> to vector<16xf32>
    %282 = vector.shape_cast %281 : vector<16xf32> to vector<16x1xf32>
    %283 = vector.broadcast %282 : vector<16x1xf32> to vector<16x16xf32>
    %284 = arith.subf %280, %283 : vector<16x16xf32>
    %285 = math.exp %284 : vector<16x16xf32>
    %cst_113 = arith.constant dense<0.000000e+00> : vector<16xf32>
    %286 = vector.multi_reduction <add>, %285, %cst_113 [1] : vector<16x16xf32> to vector<16xf32>
    %287 = vector.shape_cast %286 : vector<16xf32> to vector<16x1xf32>
    %288 = tpu.reciprocal %287 {approx = true} : vector<16x1xf32> -> vector<16x1xf32>
    %289 = vector.broadcast %288 : vector<16x1xf32> to vector<16x16xf32>
    %290 = arith.mulf %285, %289 : vector<16x16xf32>
    %291 = arith.truncf %290 : vector<16x16xf32> to vector<16x16xbf16>
    %cst_114 = arith.constant dense<0.000000e+00> : vector<16x8xf32>
    %292 = tpu.matmul %291, %277, %cst_114 {dimension_numbers = #tpu.dot_dimension_numbers<[1], [0], [0], [1], [0, 0, 1, 1], [], []>} : vector<16x16xbf16>, vector<16x8xbf16>, vector<16x8xf32> -> vector<16x8xf32>
    %293 = arith.truncf %292 : vector<16x8xf32> to vector<16x8xbf16>
    %294 = vector.extract_strided_slice %229 {offsets = [16, 0], sizes = [8, 32], strides = [1, 1]} : vector<32x32xf32> to vector<8x32xf32>
    %295 = arith.truncf %294 : vector<8x32xf32> to vector<8x32xbf16>
    %cst_115 = arith.constant dense<0.000000e+00> : vector<16x32xf32>
    %296 = tpu.matmul %293, %295, %cst_115 {dimension_numbers = #tpu.dot_dimension_numbers<[1], [0], [0], [1], [0, 0, 1, 1], [], []>} : vector<16x8xbf16>, vector<8x32xbf16>, vector<16x32xf32> -> vector<16x32xf32>
    %297 = arith.addf %274, %296 : vector<16x32xf32>
    %298 = vector.extract_strided_slice %227 {offsets = [0, 24], sizes = [16, 8], strides = [1, 1]} : vector<16x96xbf16> to vector<16x8xbf16>
    %299 = vector.extract_strided_slice %227 {offsets = [0, 56], sizes = [16, 8], strides = [1, 1]} : vector<16x96xbf16> to vector<16x8xbf16>
    %300 = vector.extract_strided_slice %227 {offsets = [0, 88], sizes = [16, 8], strides = [1, 1]} : vector<16x96xbf16> to vector<16x8xbf16>
    %cst_116 = arith.constant dense<0.000000e+00> : vector<16x16xf32>
    %301 = tpu.matmul %298, %299, %cst_116 {dimension_numbers = #tpu.dot_dimension_numbers<[1], [1], [0], [0], [0, 0, 1, 0], [], []>} : vector<16x8xbf16>, vector<16x8xbf16>, vector<16x16xf32> -> vector<16x16xf32>
    %cst_117 = arith.constant 0.353553385 : f32
    %302 = vector.broadcast %cst_117 : f32 to vector<16x16xf32>
    %303 = arith.mulf %301, %302 : vector<16x16xf32>
    %cst_118 = arith.constant dense<0xFF800000> : vector<16xf32>
    %304 = vector.multi_reduction <maximumf>, %303, %cst_118 [1] : vector<16x16xf32> to vector<16xf32>
    %305 = vector.shape_cast %304 : vector<16xf32> to vector<16x1xf32>
    %306 = vector.broadcast %305 : vector<16x1xf32> to vector<16x16xf32>
    %307 = arith.subf %303, %306 : vector<16x16xf32>
    %308 = math.exp %307 : vector<16x16xf32>
    %cst_119 = arith.constant dense<0.000000e+00> : vector<16xf32>
    %309 = vector.multi_reduction <add>, %308, %cst_119 [1] : vector<16x16xf32> to vector<16xf32>
    %310 = vector.shape_cast %309 : vector<16xf32> to vector<16x1xf32>
    %311 = tpu.reciprocal %310 {approx = true} : vector<16x1xf32> -> vector<16x1xf32>
    %312 = vector.broadcast %311 : vector<16x1xf32> to vector<16x16xf32>
    %313 = arith.mulf %308, %312 : vector<16x16xf32>
    %314 = arith.truncf %313 : vector<16x16xf32> to vector<16x16xbf16>
    %cst_120 = arith.constant dense<0.000000e+00> : vector<16x8xf32>
    %315 = tpu.matmul %314, %300, %cst_120 {dimension_numbers = #tpu.dot_dimension_numbers<[1], [0], [0], [1], [0, 0, 1, 1], [], []>} : vector<16x16xbf16>, vector<16x8xbf16>, vector<16x8xf32> -> vector<16x8xf32>
    %316 = arith.truncf %315 : vector<16x8xf32> to vector<16x8xbf16>
    %317 = vector.extract_strided_slice %229 {offsets = [24, 0], sizes = [8, 32], strides = [1, 1]} : vector<32x32xf32> to vector<8x32xf32>
    %318 = arith.truncf %317 : vector<8x32xf32> to vector<8x32xbf16>
    %cst_121 = arith.constant dense<0.000000e+00> : vector<16x32xf32>
    %319 = tpu.matmul %316, %318, %cst_121 {dimension_numbers = #tpu.dot_dimension_numbers<[1], [0], [0], [1], [0, 0, 1, 1], [], []>} : vector<16x8xbf16>, vector<8x32xbf16>, vector<16x32xf32> -> vector<16x32xf32>
    %320 = arith.addf %297, %319 : vector<16x32xf32>
    %321 = arith.addf %219, %320 : vector<16x32xf32>
    %c9 = arith.constant 9 : index
    %c0_122 = arith.constant 0 : index
    %322 = vector.load %arg3[%c9, %c0_122] : memref<24x128xf32, #tpu.memory_space<vmem>>, vector<1x32xf32>
    %323 = vector.broadcast %322 : vector<1x32xf32> to vector<16x32xf32>
    %324 = arith.addf %321, %323 : vector<16x32xf32>
    %c10 = arith.constant 10 : index
    %c0_123 = arith.constant 0 : index
    %325 = vector.load %arg3[%c10, %c0_123] : memref<24x128xf32, #tpu.memory_space<vmem>>, vector<1x32xf32>
    %c11 = arith.constant 11 : index
    %c0_124 = arith.constant 0 : index
    %326 = vector.load %arg3[%c11, %c0_124] : memref<24x128xf32, #tpu.memory_space<vmem>>, vector<1x32xf32>
    %cst_125 = arith.constant dense<0.000000e+00> : vector<16xf32>
    %327 = vector.multi_reduction <add>, %324, %cst_125 [1] : vector<16x32xf32> to vector<16xf32>
    %328 = vector.shape_cast %327 : vector<16xf32> to vector<16x1xf32>
    %cst_126 = arith.constant 3.200000e+01 : f32
    %329 = vector.broadcast %cst_126 : f32 to vector<16x1xf32>
    %330 = arith.divf %328, %329 : vector<16x1xf32>
    %331 = vector.broadcast %330 : vector<16x1xf32> to vector<16x32xf32>
    %332 = arith.subf %324, %331 : vector<16x32xf32>
    %333 = arith.mulf %332, %332 : vector<16x32xf32>
    %cst_127 = arith.constant dense<0.000000e+00> : vector<16xf32>
    %334 = vector.multi_reduction <add>, %333, %cst_127 [1] : vector<16x32xf32> to vector<16xf32>
    %335 = vector.shape_cast %334 : vector<16xf32> to vector<16x1xf32>
    %cst_128 = arith.constant 3.200000e+01 : f32
    %336 = vector.broadcast %cst_128 : f32 to vector<16x1xf32>
    %337 = arith.divf %335, %336 : vector<16x1xf32>
    %338 = vector.broadcast %330 : vector<16x1xf32> to vector<16x32xf32>
    %339 = arith.subf %324, %338 : vector<16x32xf32>
    %cst_129 = arith.constant 9.99999974E-6 : f32
    %340 = vector.broadcast %cst_129 : f32 to vector<16x1xf32>
    %341 = arith.addf %337, %340 : vector<16x1xf32>
    %342 = math.rsqrt %341 : vector<16x1xf32>
    %343 = vector.broadcast %342 : vector<16x1xf32> to vector<16x32xf32>
    %344 = arith.mulf %339, %343 : vector<16x32xf32>
    %345 = vector.broadcast %325 : vector<1x32xf32> to vector<16x32xf32>
    %346 = arith.mulf %344, %345 : vector<16x32xf32>
    %347 = vector.broadcast %326 : vector<1x32xf32> to vector<16x32xf32>
    %348 = arith.addf %346, %347 : vector<16x32xf32>
    %c0_130 = arith.constant 0 : index
    %c0_131 = arith.constant 0 : index
    %c0_132 = arith.constant 0 : index
    %349 = vector.load %arg6[%c0_130, %c0_131, %c0_132] : memref<2x32x64xbf16, #tpu.memory_space<vmem>>, vector<1x32x64xbf16>
    %350 = vector.shape_cast %349 : vector<1x32x64xbf16> to vector<32x64xbf16>
    %351 = arith.truncf %348 : vector<16x32xf32> to vector<16x32xbf16>
    %cst_133 = arith.constant dense<0.000000e+00> : vector<16x64xf32>
    %352 = tpu.matmul %351, %350, %cst_133 {dimension_numbers = #tpu.dot_dimension_numbers<[1], [0], [0], [1], [0, 0, 1, 1], [], []>} : vector<16x32xbf16>, vector<32x64xbf16>, vector<16x64xf32> -> vector<16x64xf32>
    %c12 = arith.constant 12 : index
    %c0_134 = arith.constant 0 : index
    %353 = vector.load %arg3[%c12, %c0_134] : memref<24x128xf32, #tpu.memory_space<vmem>>, vector<1x64xf32>
    %354 = vector.broadcast %353 : vector<1x64xf32> to vector<16x64xf32>
    %355 = arith.addf %352, %354 : vector<16x64xf32>
    %356 = arith.mulf %355, %355 : vector<16x64xf32>
    %357 = arith.mulf %355, %356 : vector<16x64xf32>
    %cst_135 = arith.constant 4.471500e-02 : f32
    %358 = vector.broadcast %cst_135 : f32 to vector<16x64xf32>
    %359 = arith.mulf %358, %357 : vector<16x64xf32>
    %360 = arith.addf %355, %359 : vector<16x64xf32>
    %cst_136 = arith.constant 0.797884583 : f32
    %361 = vector.broadcast %cst_136 : f32 to vector<16x64xf32>
    %362 = arith.mulf %361, %360 : vector<16x64xf32>
    %363 = math.tanh %362 : vector<16x64xf32>
    %cst_137 = arith.constant 1.000000e+00 : f32
    %364 = vector.broadcast %cst_137 : f32 to vector<16x64xf32>
    %365 = arith.addf %364, %363 : vector<16x64xf32>
    %cst_138 = arith.constant 5.000000e-01 : f32
    %366 = vector.broadcast %cst_138 : f32 to vector<16x64xf32>
    %367 = arith.mulf %366, %365 : vector<16x64xf32>
    %368 = arith.mulf %355, %367 : vector<16x64xf32>
    %c0_139 = arith.constant 0 : index
    %c0_140 = arith.constant 0 : index
    %c0_141 = arith.constant 0 : index
    %369 = vector.load %arg7[%c0_139, %c0_140, %c0_141] : memref<2x64x32xbf16, #tpu.memory_space<vmem>>, vector<1x64x32xbf16>
    %370 = vector.shape_cast %369 : vector<1x64x32xbf16> to vector<64x32xbf16>
    %371 = arith.truncf %368 : vector<16x64xf32> to vector<16x64xbf16>
    %cst_142 = arith.constant dense<0.000000e+00> : vector<16x32xf32>
    %372 = tpu.matmul %371, %370, %cst_142 {dimension_numbers = #tpu.dot_dimension_numbers<[1], [0], [0], [1], [0, 0, 1, 1], [], []>} : vector<16x64xbf16>, vector<64x32xbf16>, vector<16x32xf32> -> vector<16x32xf32>
    %c13 = arith.constant 13 : index
    %c0_143 = arith.constant 0 : index
    %373 = vector.load %arg3[%c13, %c0_143] : memref<24x128xf32, #tpu.memory_space<vmem>>, vector<1x32xf32>
    %374 = vector.broadcast %373 : vector<1x32xf32> to vector<16x32xf32>
    %375 = arith.addf %372, %374 : vector<16x32xf32>
    %376 = arith.addf %348, %375 : vector<16x32xf32>
    %c14 = arith.constant 14 : index
    %c0_144 = arith.constant 0 : index
    %377 = vector.load %arg3[%c14, %c0_144] : memref<24x128xf32, #tpu.memory_space<vmem>>, vector<1x32xf32>
    %c15 = arith.constant 15 : index
    %c0_145 = arith.constant 0 : index
    %378 = vector.load %arg3[%c15, %c0_145] : memref<24x128xf32, #tpu.memory_space<vmem>>, vector<1x32xf32>
    %cst_146 = arith.constant dense<0.000000e+00> : vector<16xf32>
    %379 = vector.multi_reduction <add>, %376, %cst_146 [1] : vector<16x32xf32> to vector<16xf32>
    %380 = vector.shape_cast %379 : vector<16xf32> to vector<16x1xf32>
    %cst_147 = arith.constant 3.200000e+01 : f32
    %381 = vector.broadcast %cst_147 : f32 to vector<16x1xf32>
    %382 = arith.divf %380, %381 : vector<16x1xf32>
    %383 = vector.broadcast %382 : vector<16x1xf32> to vector<16x32xf32>
    %384 = arith.subf %376, %383 : vector<16x32xf32>
    %385 = arith.mulf %384, %384 : vector<16x32xf32>
    %cst_148 = arith.constant dense<0.000000e+00> : vector<16xf32>
    %386 = vector.multi_reduction <add>, %385, %cst_148 [1] : vector<16x32xf32> to vector<16xf32>
    %387 = vector.shape_cast %386 : vector<16xf32> to vector<16x1xf32>
    %cst_149 = arith.constant 3.200000e+01 : f32
    %388 = vector.broadcast %cst_149 : f32 to vector<16x1xf32>
    %389 = arith.divf %387, %388 : vector<16x1xf32>
    %390 = vector.broadcast %382 : vector<16x1xf32> to vector<16x32xf32>
    %391 = arith.subf %376, %390 : vector<16x32xf32>
    %cst_150 = arith.constant 9.99999974E-6 : f32
    %392 = vector.broadcast %cst_150 : f32 to vector<16x1xf32>
    %393 = arith.addf %389, %392 : vector<16x1xf32>
    %394 = math.rsqrt %393 : vector<16x1xf32>
    %395 = vector.broadcast %394 : vector<16x1xf32> to vector<16x32xf32>
    %396 = arith.mulf %391, %395 : vector<16x32xf32>
    %397 = vector.broadcast %377 : vector<1x32xf32> to vector<16x32xf32>
    %398 = arith.mulf %396, %397 : vector<16x32xf32>
    %399 = vector.broadcast %378 : vector<1x32xf32> to vector<16x32xf32>
    %400 = arith.addf %398, %399 : vector<16x32xf32>
    %c1_151 = arith.constant 1 : index
    %c0_152 = arith.constant 0 : index
    %c0_153 = arith.constant 0 : index
    %401 = vector.load %arg4[%c1_151, %c0_152, %c0_153] : memref<2x32x96xbf16, #tpu.memory_space<vmem>>, vector<1x32x96xbf16>
    %402 = vector.shape_cast %401 : vector<1x32x96xbf16> to vector<32x96xbf16>
    %403 = arith.truncf %400 : vector<16x32xf32> to vector<16x32xbf16>
    %cst_154 = arith.constant dense<0.000000e+00> : vector<16x96xf32>
    %404 = tpu.matmul %403, %402, %cst_154 {dimension_numbers = #tpu.dot_dimension_numbers<[1], [0], [0], [1], [0, 0, 1, 1], [], []>} : vector<16x32xbf16>, vector<32x96xbf16>, vector<16x96xf32> -> vector<16x96xf32>
    %c16 = arith.constant 16 : index
    %c0_155 = arith.constant 0 : index
    %405 = vector.load %arg3[%c16, %c0_155] : memref<24x128xf32, #tpu.memory_space<vmem>>, vector<1x96xf32>
    %406 = vector.broadcast %405 : vector<1x96xf32> to vector<16x96xf32>
    %407 = arith.addf %404, %406 : vector<16x96xf32>
    %408 = arith.truncf %407 : vector<16x96xf32> to vector<16x96xbf16>
    %c1_156 = arith.constant 1 : index
    %c0_157 = arith.constant 0 : index
    %c0_158 = arith.constant 0 : index
    %409 = vector.load %arg5[%c1_156, %c0_157, %c0_158] : memref<2x32x32xf32, #tpu.memory_space<vmem>>, vector<1x32x32xf32>
    %410 = vector.shape_cast %409 : vector<1x32x32xf32> to vector<32x32xf32>
    %411 = vector.extract_strided_slice %408 {offsets = [0, 0], sizes = [16, 8], strides = [1, 1]} : vector<16x96xbf16> to vector<16x8xbf16>
    %412 = vector.extract_strided_slice %408 {offsets = [0, 32], sizes = [16, 8], strides = [1, 1]} : vector<16x96xbf16> to vector<16x8xbf16>
    %413 = vector.extract_strided_slice %408 {offsets = [0, 64], sizes = [16, 8], strides = [1, 1]} : vector<16x96xbf16> to vector<16x8xbf16>
    %cst_159 = arith.constant dense<0.000000e+00> : vector<16x16xf32>
    %414 = tpu.matmul %411, %412, %cst_159 {dimension_numbers = #tpu.dot_dimension_numbers<[1], [1], [0], [0], [0, 0, 1, 0], [], []>} : vector<16x8xbf16>, vector<16x8xbf16>, vector<16x16xf32> -> vector<16x16xf32>
    %cst_160 = arith.constant 0.353553385 : f32
    %415 = vector.broadcast %cst_160 : f32 to vector<16x16xf32>
    %416 = arith.mulf %414, %415 : vector<16x16xf32>
    %cst_161 = arith.constant dense<0xFF800000> : vector<16xf32>
    %417 = vector.multi_reduction <maximumf>, %416, %cst_161 [1] : vector<16x16xf32> to vector<16xf32>
    %418 = vector.shape_cast %417 : vector<16xf32> to vector<16x1xf32>
    %419 = vector.broadcast %418 : vector<16x1xf32> to vector<16x16xf32>
    %420 = arith.subf %416, %419 : vector<16x16xf32>
    %421 = math.exp %420 : vector<16x16xf32>
    %cst_162 = arith.constant dense<0.000000e+00> : vector<16xf32>
    %422 = vector.multi_reduction <add>, %421, %cst_162 [1] : vector<16x16xf32> to vector<16xf32>
    %423 = vector.shape_cast %422 : vector<16xf32> to vector<16x1xf32>
    %424 = tpu.reciprocal %423 {approx = true} : vector<16x1xf32> -> vector<16x1xf32>
    %425 = vector.broadcast %424 : vector<16x1xf32> to vector<16x16xf32>
    %426 = arith.mulf %421, %425 : vector<16x16xf32>
    %427 = arith.truncf %426 : vector<16x16xf32> to vector<16x16xbf16>
    %cst_163 = arith.constant dense<0.000000e+00> : vector<16x8xf32>
    %428 = tpu.matmul %427, %413, %cst_163 {dimension_numbers = #tpu.dot_dimension_numbers<[1], [0], [0], [1], [0, 0, 1, 1], [], []>} : vector<16x16xbf16>, vector<16x8xbf16>, vector<16x8xf32> -> vector<16x8xf32>
    %429 = arith.truncf %428 : vector<16x8xf32> to vector<16x8xbf16>
    %430 = vector.extract_strided_slice %410 {offsets = [0, 0], sizes = [8, 32], strides = [1, 1]} : vector<32x32xf32> to vector<8x32xf32>
    %431 = arith.truncf %430 : vector<8x32xf32> to vector<8x32xbf16>
    %cst_164 = arith.constant dense<0.000000e+00> : vector<16x32xf32>
    %432 = tpu.matmul %429, %431, %cst_164 {dimension_numbers = #tpu.dot_dimension_numbers<[1], [0], [0], [1], [0, 0, 1, 1], [], []>} : vector<16x8xbf16>, vector<8x32xbf16>, vector<16x32xf32> -> vector<16x32xf32>
    %433 = vector.extract_strided_slice %408 {offsets = [0, 8], sizes = [16, 8], strides = [1, 1]} : vector<16x96xbf16> to vector<16x8xbf16>
    %434 = vector.extract_strided_slice %408 {offsets = [0, 40], sizes = [16, 8], strides = [1, 1]} : vector<16x96xbf16> to vector<16x8xbf16>
    %435 = vector.extract_strided_slice %408 {offsets = [0, 72], sizes = [16, 8], strides = [1, 1]} : vector<16x96xbf16> to vector<16x8xbf16>
    %cst_165 = arith.constant dense<0.000000e+00> : vector<16x16xf32>
    %436 = tpu.matmul %433, %434, %cst_165 {dimension_numbers = #tpu.dot_dimension_numbers<[1], [1], [0], [0], [0, 0, 1, 0], [], []>} : vector<16x8xbf16>, vector<16x8xbf16>, vector<16x16xf32> -> vector<16x16xf32>
    %cst_166 = arith.constant 0.353553385 : f32
    %437 = vector.broadcast %cst_166 : f32 to vector<16x16xf32>
    %438 = arith.mulf %436, %437 : vector<16x16xf32>
    %cst_167 = arith.constant dense<0xFF800000> : vector<16xf32>
    %439 = vector.multi_reduction <maximumf>, %438, %cst_167 [1] : vector<16x16xf32> to vector<16xf32>
    %440 = vector.shape_cast %439 : vector<16xf32> to vector<16x1xf32>
    %441 = vector.broadcast %440 : vector<16x1xf32> to vector<16x16xf32>
    %442 = arith.subf %438, %441 : vector<16x16xf32>
    %443 = math.exp %442 : vector<16x16xf32>
    %cst_168 = arith.constant dense<0.000000e+00> : vector<16xf32>
    %444 = vector.multi_reduction <add>, %443, %cst_168 [1] : vector<16x16xf32> to vector<16xf32>
    %445 = vector.shape_cast %444 : vector<16xf32> to vector<16x1xf32>
    %446 = tpu.reciprocal %445 {approx = true} : vector<16x1xf32> -> vector<16x1xf32>
    %447 = vector.broadcast %446 : vector<16x1xf32> to vector<16x16xf32>
    %448 = arith.mulf %443, %447 : vector<16x16xf32>
    %449 = arith.truncf %448 : vector<16x16xf32> to vector<16x16xbf16>
    %cst_169 = arith.constant dense<0.000000e+00> : vector<16x8xf32>
    %450 = tpu.matmul %449, %435, %cst_169 {dimension_numbers = #tpu.dot_dimension_numbers<[1], [0], [0], [1], [0, 0, 1, 1], [], []>} : vector<16x16xbf16>, vector<16x8xbf16>, vector<16x8xf32> -> vector<16x8xf32>
    %451 = arith.truncf %450 : vector<16x8xf32> to vector<16x8xbf16>
    %452 = vector.extract_strided_slice %410 {offsets = [8, 0], sizes = [8, 32], strides = [1, 1]} : vector<32x32xf32> to vector<8x32xf32>
    %453 = arith.truncf %452 : vector<8x32xf32> to vector<8x32xbf16>
    %cst_170 = arith.constant dense<0.000000e+00> : vector<16x32xf32>
    %454 = tpu.matmul %451, %453, %cst_170 {dimension_numbers = #tpu.dot_dimension_numbers<[1], [0], [0], [1], [0, 0, 1, 1], [], []>} : vector<16x8xbf16>, vector<8x32xbf16>, vector<16x32xf32> -> vector<16x32xf32>
    %455 = arith.addf %432, %454 : vector<16x32xf32>
    %456 = vector.extract_strided_slice %408 {offsets = [0, 16], sizes = [16, 8], strides = [1, 1]} : vector<16x96xbf16> to vector<16x8xbf16>
    %457 = vector.extract_strided_slice %408 {offsets = [0, 48], sizes = [16, 8], strides = [1, 1]} : vector<16x96xbf16> to vector<16x8xbf16>
    %458 = vector.extract_strided_slice %408 {offsets = [0, 80], sizes = [16, 8], strides = [1, 1]} : vector<16x96xbf16> to vector<16x8xbf16>
    %cst_171 = arith.constant dense<0.000000e+00> : vector<16x16xf32>
    %459 = tpu.matmul %456, %457, %cst_171 {dimension_numbers = #tpu.dot_dimension_numbers<[1], [1], [0], [0], [0, 0, 1, 0], [], []>} : vector<16x8xbf16>, vector<16x8xbf16>, vector<16x16xf32> -> vector<16x16xf32>
    %cst_172 = arith.constant 0.353553385 : f32
    %460 = vector.broadcast %cst_172 : f32 to vector<16x16xf32>
    %461 = arith.mulf %459, %460 : vector<16x16xf32>
    %cst_173 = arith.constant dense<0xFF800000> : vector<16xf32>
    %462 = vector.multi_reduction <maximumf>, %461, %cst_173 [1] : vector<16x16xf32> to vector<16xf32>
    %463 = vector.shape_cast %462 : vector<16xf32> to vector<16x1xf32>
    %464 = vector.broadcast %463 : vector<16x1xf32> to vector<16x16xf32>
    %465 = arith.subf %461, %464 : vector<16x16xf32>
    %466 = math.exp %465 : vector<16x16xf32>
    %cst_174 = arith.constant dense<0.000000e+00> : vector<16xf32>
    %467 = vector.multi_reduction <add>, %466, %cst_174 [1] : vector<16x16xf32> to vector<16xf32>
    %468 = vector.shape_cast %467 : vector<16xf32> to vector<16x1xf32>
    %469 = tpu.reciprocal %468 {approx = true} : vector<16x1xf32> -> vector<16x1xf32>
    %470 = vector.broadcast %469 : vector<16x1xf32> to vector<16x16xf32>
    %471 = arith.mulf %466, %470 : vector<16x16xf32>
    %472 = arith.truncf %471 : vector<16x16xf32> to vector<16x16xbf16>
    %cst_175 = arith.constant dense<0.000000e+00> : vector<16x8xf32>
    %473 = tpu.matmul %472, %458, %cst_175 {dimension_numbers = #tpu.dot_dimension_numbers<[1], [0], [0], [1], [0, 0, 1, 1], [], []>} : vector<16x16xbf16>, vector<16x8xbf16>, vector<16x8xf32> -> vector<16x8xf32>
    %474 = arith.truncf %473 : vector<16x8xf32> to vector<16x8xbf16>
    %475 = vector.extract_strided_slice %410 {offsets = [16, 0], sizes = [8, 32], strides = [1, 1]} : vector<32x32xf32> to vector<8x32xf32>
    %476 = arith.truncf %475 : vector<8x32xf32> to vector<8x32xbf16>
    %cst_176 = arith.constant dense<0.000000e+00> : vector<16x32xf32>
    %477 = tpu.matmul %474, %476, %cst_176 {dimension_numbers = #tpu.dot_dimension_numbers<[1], [0], [0], [1], [0, 0, 1, 1], [], []>} : vector<16x8xbf16>, vector<8x32xbf16>, vector<16x32xf32> -> vector<16x32xf32>
    %478 = arith.addf %455, %477 : vector<16x32xf32>
    %479 = vector.extract_strided_slice %408 {offsets = [0, 24], sizes = [16, 8], strides = [1, 1]} : vector<16x96xbf16> to vector<16x8xbf16>
    %480 = vector.extract_strided_slice %408 {offsets = [0, 56], sizes = [16, 8], strides = [1, 1]} : vector<16x96xbf16> to vector<16x8xbf16>
    %481 = vector.extract_strided_slice %408 {offsets = [0, 88], sizes = [16, 8], strides = [1, 1]} : vector<16x96xbf16> to vector<16x8xbf16>
    %cst_177 = arith.constant dense<0.000000e+00> : vector<16x16xf32>
    %482 = tpu.matmul %479, %480, %cst_177 {dimension_numbers = #tpu.dot_dimension_numbers<[1], [1], [0], [0], [0, 0, 1, 0], [], []>} : vector<16x8xbf16>, vector<16x8xbf16>, vector<16x16xf32> -> vector<16x16xf32>
    %cst_178 = arith.constant 0.353553385 : f32
    %483 = vector.broadcast %cst_178 : f32 to vector<16x16xf32>
    %484 = arith.mulf %482, %483 : vector<16x16xf32>
    %cst_179 = arith.constant dense<0xFF800000> : vector<16xf32>
    %485 = vector.multi_reduction <maximumf>, %484, %cst_179 [1] : vector<16x16xf32> to vector<16xf32>
    %486 = vector.shape_cast %485 : vector<16xf32> to vector<16x1xf32>
    %487 = vector.broadcast %486 : vector<16x1xf32> to vector<16x16xf32>
    %488 = arith.subf %484, %487 : vector<16x16xf32>
    %489 = math.exp %488 : vector<16x16xf32>
    %cst_180 = arith.constant dense<0.000000e+00> : vector<16xf32>
    %490 = vector.multi_reduction <add>, %489, %cst_180 [1] : vector<16x16xf32> to vector<16xf32>
    %491 = vector.shape_cast %490 : vector<16xf32> to vector<16x1xf32>
    %492 = tpu.reciprocal %491 {approx = true} : vector<16x1xf32> -> vector<16x1xf32>
    %493 = vector.broadcast %492 : vector<16x1xf32> to vector<16x16xf32>
    %494 = arith.mulf %489, %493 : vector<16x16xf32>
    %495 = arith.truncf %494 : vector<16x16xf32> to vector<16x16xbf16>
    %cst_181 = arith.constant dense<0.000000e+00> : vector<16x8xf32>
    %496 = tpu.matmul %495, %481, %cst_181 {dimension_numbers = #tpu.dot_dimension_numbers<[1], [0], [0], [1], [0, 0, 1, 1], [], []>} : vector<16x16xbf16>, vector<16x8xbf16>, vector<16x8xf32> -> vector<16x8xf32>
    %497 = arith.truncf %496 : vector<16x8xf32> to vector<16x8xbf16>
    %498 = vector.extract_strided_slice %410 {offsets = [24, 0], sizes = [8, 32], strides = [1, 1]} : vector<32x32xf32> to vector<8x32xf32>
    %499 = arith.truncf %498 : vector<8x32xf32> to vector<8x32xbf16>
    %cst_182 = arith.constant dense<0.000000e+00> : vector<16x32xf32>
    %500 = tpu.matmul %497, %499, %cst_182 {dimension_numbers = #tpu.dot_dimension_numbers<[1], [0], [0], [1], [0, 0, 1, 1], [], []>} : vector<16x8xbf16>, vector<8x32xbf16>, vector<16x32xf32> -> vector<16x32xf32>
    %501 = arith.addf %478, %500 : vector<16x32xf32>
    %502 = arith.addf %400, %501 : vector<16x32xf32>
    %c17 = arith.constant 17 : index
    %c0_183 = arith.constant 0 : index
    %503 = vector.load %arg3[%c17, %c0_183] : memref<24x128xf32, #tpu.memory_space<vmem>>, vector<1x32xf32>
    %504 = vector.broadcast %503 : vector<1x32xf32> to vector<16x32xf32>
    %505 = arith.addf %502, %504 : vector<16x32xf32>
    %c18 = arith.constant 18 : index
    %c0_184 = arith.constant 0 : index
    %506 = vector.load %arg3[%c18, %c0_184] : memref<24x128xf32, #tpu.memory_space<vmem>>, vector<1x32xf32>
    %c19 = arith.constant 19 : index
    %c0_185 = arith.constant 0 : index
    %507 = vector.load %arg3[%c19, %c0_185] : memref<24x128xf32, #tpu.memory_space<vmem>>, vector<1x32xf32>
    %cst_186 = arith.constant dense<0.000000e+00> : vector<16xf32>
    %508 = vector.multi_reduction <add>, %505, %cst_186 [1] : vector<16x32xf32> to vector<16xf32>
    %509 = vector.shape_cast %508 : vector<16xf32> to vector<16x1xf32>
    %cst_187 = arith.constant 3.200000e+01 : f32
    %510 = vector.broadcast %cst_187 : f32 to vector<16x1xf32>
    %511 = arith.divf %509, %510 : vector<16x1xf32>
    %512 = vector.broadcast %511 : vector<16x1xf32> to vector<16x32xf32>
    %513 = arith.subf %505, %512 : vector<16x32xf32>
    %514 = arith.mulf %513, %513 : vector<16x32xf32>
    %cst_188 = arith.constant dense<0.000000e+00> : vector<16xf32>
    %515 = vector.multi_reduction <add>, %514, %cst_188 [1] : vector<16x32xf32> to vector<16xf32>
    %516 = vector.shape_cast %515 : vector<16xf32> to vector<16x1xf32>
    %cst_189 = arith.constant 3.200000e+01 : f32
    %517 = vector.broadcast %cst_189 : f32 to vector<16x1xf32>
    %518 = arith.divf %516, %517 : vector<16x1xf32>
    %519 = vector.broadcast %511 : vector<16x1xf32> to vector<16x32xf32>
    %520 = arith.subf %505, %519 : vector<16x32xf32>
    %cst_190 = arith.constant 9.99999974E-6 : f32
    %521 = vector.broadcast %cst_190 : f32 to vector<16x1xf32>
    %522 = arith.addf %518, %521 : vector<16x1xf32>
    %523 = math.rsqrt %522 : vector<16x1xf32>
    %524 = vector.broadcast %523 : vector<16x1xf32> to vector<16x32xf32>
    %525 = arith.mulf %520, %524 : vector<16x32xf32>
    %526 = vector.broadcast %506 : vector<1x32xf32> to vector<16x32xf32>
    %527 = arith.mulf %525, %526 : vector<16x32xf32>
    %528 = vector.broadcast %507 : vector<1x32xf32> to vector<16x32xf32>
    %529 = arith.addf %527, %528 : vector<16x32xf32>
    %c1_191 = arith.constant 1 : index
    %c0_192 = arith.constant 0 : index
    %c0_193 = arith.constant 0 : index
    %530 = vector.load %arg6[%c1_191, %c0_192, %c0_193] : memref<2x32x64xbf16, #tpu.memory_space<vmem>>, vector<1x32x64xbf16>
    %531 = vector.shape_cast %530 : vector<1x32x64xbf16> to vector<32x64xbf16>
    %532 = arith.truncf %529 : vector<16x32xf32> to vector<16x32xbf16>
    %cst_194 = arith.constant dense<0.000000e+00> : vector<16x64xf32>
    %533 = tpu.matmul %532, %531, %cst_194 {dimension_numbers = #tpu.dot_dimension_numbers<[1], [0], [0], [1], [0, 0, 1, 1], [], []>} : vector<16x32xbf16>, vector<32x64xbf16>, vector<16x64xf32> -> vector<16x64xf32>
    %c20 = arith.constant 20 : index
    %c0_195 = arith.constant 0 : index
    %534 = vector.load %arg3[%c20, %c0_195] : memref<24x128xf32, #tpu.memory_space<vmem>>, vector<1x64xf32>
    %535 = vector.broadcast %534 : vector<1x64xf32> to vector<16x64xf32>
    %536 = arith.addf %533, %535 : vector<16x64xf32>
    %537 = arith.mulf %536, %536 : vector<16x64xf32>
    %538 = arith.mulf %536, %537 : vector<16x64xf32>
    %cst_196 = arith.constant 4.471500e-02 : f32
    %539 = vector.broadcast %cst_196 : f32 to vector<16x64xf32>
    %540 = arith.mulf %539, %538 : vector<16x64xf32>
    %541 = arith.addf %536, %540 : vector<16x64xf32>
    %cst_197 = arith.constant 0.797884583 : f32
    %542 = vector.broadcast %cst_197 : f32 to vector<16x64xf32>
    %543 = arith.mulf %542, %541 : vector<16x64xf32>
    %544 = math.tanh %543 : vector<16x64xf32>
    %cst_198 = arith.constant 1.000000e+00 : f32
    %545 = vector.broadcast %cst_198 : f32 to vector<16x64xf32>
    %546 = arith.addf %545, %544 : vector<16x64xf32>
    %cst_199 = arith.constant 5.000000e-01 : f32
    %547 = vector.broadcast %cst_199 : f32 to vector<16x64xf32>
    %548 = arith.mulf %547, %546 : vector<16x64xf32>
    %549 = arith.mulf %536, %548 : vector<16x64xf32>
    %c1_200 = arith.constant 1 : index
    %c0_201 = arith.constant 0 : index
    %c0_202 = arith.constant 0 : index
    %550 = vector.load %arg7[%c1_200, %c0_201, %c0_202] : memref<2x64x32xbf16, #tpu.memory_space<vmem>>, vector<1x64x32xbf16>
    %551 = vector.shape_cast %550 : vector<1x64x32xbf16> to vector<64x32xbf16>
    %552 = arith.truncf %549 : vector<16x64xf32> to vector<16x64xbf16>
    %cst_203 = arith.constant dense<0.000000e+00> : vector<16x32xf32>
    %553 = tpu.matmul %552, %551, %cst_203 {dimension_numbers = #tpu.dot_dimension_numbers<[1], [0], [0], [1], [0, 0, 1, 1], [], []>} : vector<16x64xbf16>, vector<64x32xbf16>, vector<16x32xf32> -> vector<16x32xf32>
    %c21 = arith.constant 21 : index
    %c0_204 = arith.constant 0 : index
    %554 = vector.load %arg3[%c21, %c0_204] : memref<24x128xf32, #tpu.memory_space<vmem>>, vector<1x32xf32>
    %555 = vector.broadcast %554 : vector<1x32xf32> to vector<16x32xf32>
    %556 = arith.addf %553, %555 : vector<16x32xf32>
    %557 = arith.addf %529, %556 : vector<16x32xf32>
    %c22 = arith.constant 22 : index
    %c0_205 = arith.constant 0 : index
    %558 = vector.load %arg3[%c22, %c0_205] : memref<24x128xf32, #tpu.memory_space<vmem>>, vector<1x32xf32>
    %c23 = arith.constant 23 : index
    %c0_206 = arith.constant 0 : index
    %559 = vector.load %arg3[%c23, %c0_206] : memref<24x128xf32, #tpu.memory_space<vmem>>, vector<1x32xf32>
    %cst_207 = arith.constant dense<0.000000e+00> : vector<16xf32>
    %560 = vector.multi_reduction <add>, %557, %cst_207 [1] : vector<16x32xf32> to vector<16xf32>
    %561 = vector.shape_cast %560 : vector<16xf32> to vector<16x1xf32>
    %cst_208 = arith.constant 3.200000e+01 : f32
    %562 = vector.broadcast %cst_208 : f32 to vector<16x1xf32>
    %563 = arith.divf %561, %562 : vector<16x1xf32>
    %564 = vector.broadcast %563 : vector<16x1xf32> to vector<16x32xf32>
    %565 = arith.subf %557, %564 : vector<16x32xf32>
    %566 = arith.mulf %565, %565 : vector<16x32xf32>
    %cst_209 = arith.constant dense<0.000000e+00> : vector<16xf32>
    %567 = vector.multi_reduction <add>, %566, %cst_209 [1] : vector<16x32xf32> to vector<16xf32>
    %568 = vector.shape_cast %567 : vector<16xf32> to vector<16x1xf32>
    %cst_210 = arith.constant 3.200000e+01 : f32
    %569 = vector.broadcast %cst_210 : f32 to vector<16x1xf32>
    %570 = arith.divf %568, %569 : vector<16x1xf32>
    %571 = vector.broadcast %563 : vector<16x1xf32> to vector<16x32xf32>
    %572 = arith.subf %557, %571 : vector<16x32xf32>
    %cst_211 = arith.constant 9.99999974E-6 : f32
    %573 = vector.broadcast %cst_211 : f32 to vector<16x1xf32>
    %574 = arith.addf %570, %573 : vector<16x1xf32>
    %575 = math.rsqrt %574 : vector<16x1xf32>
    %576 = vector.broadcast %575 : vector<16x1xf32> to vector<16x32xf32>
    %577 = arith.mulf %572, %576 : vector<16x32xf32>
    %578 = vector.broadcast %558 : vector<1x32xf32> to vector<16x32xf32>
    %579 = arith.mulf %577, %578 : vector<16x32xf32>
    %580 = vector.broadcast %559 : vector<1x32xf32> to vector<16x32xf32>
    %581 = arith.addf %579, %580 : vector<16x32xf32>
    %c0_212 = arith.constant 0 : index
    %c0_213 = arith.constant 0 : index
    %c0_214 = arith.constant 0 : index
    %582 = vector.load %arg8[%c0_212, %c0_213, %c0_214] : memref<1x16x32xf32, #tpu.memory_space<vmem>>, vector<1x16x32xf32>
    %583 = vector.shape_cast %582 : vector<1x16x32xf32> to vector<16x32xf32>
    %584 = vector.shape_cast %581 : vector<16x32xf32> to vector<1x16x32xf32>
    tpu.vector_store %arg8[%c0_212, %c0_213, %c0_214], %584 {strides = array<i32>} : memref<1x16x32xf32, #tpu.memory_space<vmem>>, vector<1x16x32xf32>,
    return
  }
  func.func @transform_0(%arg0: i32) -> (i32, i32, i32) {
    %c0_i32 = arith.constant 0 : i32
    %c0_i32_0 = arith.constant 0 : i32
    %c0_i32_1 = arith.constant 0 : i32
    return %arg0, %c0_i32, %c0_i32_0 : i32, i32, i32
  }
  func.func @transform_1(%arg0: i32) -> (i32, i32) {
    %c0_i32 = arith.constant 0 : i32
    %c0_i32_0 = arith.constant 0 : i32
    %c0_i32_1 = arith.constant 0 : i32
    return %c0_i32, %c0_i32_0 : i32, i32
  }
  func.func @transform_2(%arg0: i32) -> (i32, i32) {
    %c0_i32 = arith.constant 0 : i32
    %c0_i32_0 = arith.constant 0 : i32
    %c0_i32_1 = arith.constant 0 : i32
    return %c0_i32, %c0_i32_0 : i32, i32
  }
  func.func @transform_3(%arg0: i32) -> (i32, i32, i32) {
    %c0_i32 = arith.constant 0 : i32
    %c0_i32_0 = arith.constant 0 : i32
    %c0_i32_1 = arith.constant 0 : i32
    %c0_i32_2 = arith.constant 0 : i32
    return %c0_i32, %c0_i32_0, %c0_i32_1 : i32, i32, i32
  }
  func.func @transform_4(%arg0: i32) -> (i32, i32, i32) {
    %c0_i32 = arith.constant 0 : i32
    %c0_i32_0 = arith.constant 0 : i32
    %c0_i32_1 = arith.constant 0 : i32
    %c0_i32_2 = arith.constant 0 : i32
    return %c0_i32, %c0_i32_0, %c0_i32_1 : i32, i32, i32
  }
  func.func @transform_5(%arg0: i32) -> (i32, i32, i32) {
    %c0_i32 = arith.constant 0 : i32
    %c0_i32_0 = arith.constant 0 : i32
    %c0_i32_1 = arith.constant 0 : i32
    %c0_i32_2 = arith.constant 0 : i32
    return %c0_i32, %c0_i32_0, %c0_i32_1 : i32, i32, i32
  }
  func.func @transform_6(%arg0: i32) -> (i32, i32, i32) {
    %c0_i32 = arith.constant 0 : i32
    %c0_i32_0 = arith.constant 0 : i32
    %c0_i32_1 = arith.constant 0 : i32
    %c0_i32_2 = arith.constant 0 : i32
    return %c0_i32, %c0_i32_0, %c0_i32_1 : i32, i32, i32
  }
  func.func @transform_7(%arg0: i32) -> (i32, i32, i32) {
    %c0_i32 = arith.constant 0 : i32
    %c0_i32_0 = arith.constant 0 : i32
    %c0_i32_1 = arith.constant 0 : i32
    return %arg0, %c0_i32, %c0_i32_0 : i32, i32, i32
  }
}

</mosaic_0001>

<bundles_post_ra>
// kernel: lang_hubert_forward.1
= control target key start
LH: loop header
LB: loop body
LE: loop exit
PB: predicated region body
PF: predicated region fallthrough
CT: control target
= control target key end

     0   :  { %12 = vsyncpa [#allocation4], 0  ;;  %s5260_s0 = inlined_call_operand.vmem [shape: f32[2,64,4], index: 0, kind: input, shape index: {}]   ;;  %s5261_s1 = inlined_call_operand.vmem [shape: bf16[296,32], index: 1, kind: input, shape index: {}]   ;;  %s5262_s2 = inlined_call_operand.vmem [shape: f32[24,128], index: 2, kind: input, shape index: {}]   ;;  %s5263_s3 = inlined_call_operand.vmem [shape: bf16[2,32,96], index: 3, kind: input, shape index: {}]   ;;  %s5264_s4 = inlined_call_operand.vmem [shape: f32[2,32,32], index: 4, kind: input, shape index: {}]   ;;  %s5265_s5 = inlined_call_operand.vmem [shape: bf16[2,32,64], index: 5, kind: input, shape index: {}]   ;;  %s5266_s6 = inlined_call_operand.vmem [shape: bf16[2,64,32], index: 6, kind: input, shape index: {}]   ;;  %s5267_s7 = inlined_call_operand.hbm [shape: f32[2,16,32], index: 7, kind: output, shape index: {}]  }
   0x1   :  { %14 = vsyncpa [#allocation4 + $0x1], 0  ;;  %s4475_s24 = smov 0   ;;  %s4477_s25 = smov 0  }
   0x2   :  { %s4479_s26 = smov 0   ;;  %s4481_s27 = smov 0  }
   0x3 LB: > { %s4496_s28 = sadd.s32 4294967295, %s4417_s27   ;;  %s3603_s29 = sadd.s32 4294967294, %s4417_s27   ;;  %s4417_s27 = sphi %s4481_s27, %s5281_s27   ;;  %s4413_s26 = sphi %s4479_s26, %s5280_s26   ;;  %s4409_s25 = sphi %s4477_s25, %s5279_s25   ;;  %s4405_s24 = sphi %s4475_s24, %s5278_s24  }
   0x4   : > { %s4500_s30 = sadd.s32 1, %s4417_s27   ;;  %s179_s8 = sadd.s32 1, %s4413_s26 }
   0x5   : > { %s176_s9 = ssub.s32 %s4417_s27, %s4500_s30  ;;  %p189_p0 = scmp.ne.s32.totalorder %s4413_s26, %s4409_s25 }
   0x6   : > { %p177_p1 = scmp.eq.s32.totalorder %s176_s9, 0  ;;  %p190_p2 = scmp.eq.s32.totalorder %s4496_s28, 1 }
   0x7   : > { %p195_p3 = scmp.ne.s32.totalorder %s4409_s25, %s4405_s24  ;;  %p196_p4 = scmp.eq.s32.totalorder %s3603_s29, 1 }
   0x8   : > { %s4511_s10 = scalar_select %p177_p1, %s4413_s26, %s179_s8  }
   0x9   : > { %p4513_p5 = por %p190_p2, %p189_p0  ;;  %p4517_p6 = por %p196_p4, %p195_p3 }
   0xa   : > { %p3606_p7 = scmp.ge.s32.totalorder %s4417_s27, 1  ;;  %p240_p8 = scmp.lt.s32.totalorder %s4417_s27, 3 }
   0xc   : > { %p241_p9 = pnand %p3606_p7, %p240_p8 }
   0xd   : > { %p272_p10 = scmp.lt.s32.totalorder (!%p241_p9), %s4496_s28, 1  ;;  %vm286_vm0 = vcmask (!%p241_p9), 31744   ;;  %vm424_vm1 = vcmask (!%p241_p9), 1041408   ;;  %vm493_vm2 = vcmask (!%p241_p9), 261120   ;;  %vm4420_vm3 = vmmov (!%p241_p9), 0   ;;  %s4421_s22 = smov (!%p241_p9), 88  }
   0xe   : > { %244 = sbr.rel (%p241_p9) target bundleno = 9799 (0x2647), region = 48  ;;  %s4422_s23 = smov (!%p241_p9), 96   ;;  %vm1553_vm10 = vcmask (!%p241_p9), 64512   ;;  %vm1603_vm11 = vcmask (!%p241_p9), 130048   ;;  %vm1804_vm12 = vcmask (!%p241_p9), 1043456   ;;  %vm2415_vm13 = vcmask (!%p241_p9), 523264  }
   0xf   : > { %s4423_s29 = smov (!%p241_p9), 120   ;;  %s4424_s8 = smov (!%p241_p9), 64  }
  0x10   : > { %s4425_s9 = smov (!%p241_p9), 80   ;;  %s5269_s19 = smov (!%p241_p9), 48  }
  0x11   : > { %s5270_s20 = smov (!%p241_p9), 104   ;;  %s5271_s21 = smov (!%p241_p9), 72  }
  0x12   : > { %s3739_s18 = sshll.u32 (!%p241_p9), %s4496_s28, 8 }
  0x15   : > { %s273_s13 = scalar_select %p272_p10, %s4496_s28, 1 }
  0x17   : > { %s3738_s14 = sshll.u32 %s273_s13, 6  ;;  %s4426_s13 = smov 112  }
  0x18   : > { %s276_s17 = scalar_lea.vmem %s5260_s0, %s3738_s14  ;;  %s4427_s14 = smov 56  }
  0x19   : > { %v278_v0 = vld [vmem:[%s276_s17] sm:$0xff]  ;;  %v280_v1 = vld [vmem:[%s276_s17 + $0x10] sm:$0xff]  ;;  %v279_v2 = vld [vmem:[%s276_s17 + $0x8] sm:$0xff] }
  0x1a   : > { %v287_v3 = vsel %vm286_vm0, %v278_v0, 0.0  ;;  %v293_v4 = vsel %vm286_vm0, %v280_v1, 0.0  ;;  %v281_v5 = vld [vmem:[%s276_s17 + $0x18] sm:$0xff]  ;;  %v282_v6 = vld [vmem:[%s276_s17 + $0x20] sm:$0xff]  ;;  %v283_v7 = vld [vmem:[%s276_s17 + $0x28] sm:$0xff]  ;;  %v290_v8 = vsel %vm286_vm0, %v279_v2, 0.0 }
  0x1b   : > { %288 = vadd.xlane.f32.xlu0 %v287_v3  ;;  %294 = vadd.xlane.f32.xlu1 %v293_v4  ;;  %v296_v9 = vsel %vm286_vm0, %v281_v5, 0.0  ;;  %v299_v10 = vsel %vm286_vm0, %v282_v6, 0.0  ;;  %v302_v11 = vsel %vm286_vm0, %v283_v7, 0.0  ;;  %v284_v12 = vld [vmem:[%s276_s17 + $0x30] sm:$0xff]  ;;  %v285_v13 = vld [vmem:[%s276_s17 + $0x38] sm:$0xff]  ;;  %s5268_s17 = smov 40  }
  0x1c   : > { %v305_v14 = vsel %vm286_vm0, %v284_v12, 0.0  ;;  %v308_v15 = vsel %vm286_vm0, %v285_v13, 0.0 }
  0x1f   : > { %291 = vadd.xlane.f32.xlu0 %v290_v8  ;;  %297 = vadd.xlane.f32.xlu1 %v296_v9 }
  0x23   : > { %300 = vadd.xlane.f32.xlu0 %v299_v10  ;;  %303 = vadd.xlane.f32.xlu1 %v302_v11 }
  0x27   : > { %306 = vadd.xlane.f32.xlu0 %v305_v14  ;;  %309 = vadd.xlane.f32.xlu1 %v308_v15 }
  0xa8   : > { %v289_v16 = vpop.xlane.xlu0 %288  ;;  %v295_v17 = vpop.xlane.xlu1 %294 }
  0xa9   : > { %v312_v20 = vmul.f32 0.25, %v289_v16  ;;  %v314_v22 = vmul.f32 0.25, %v295_v17 }
  0xac   : > { %v292_v18 = vpop.xlane.xlu0 %291  ;;  %v298_v19 = vpop.xlane.xlu1 %297 }
  0xad   : > { %v313_v21 = vmul.f32 0.25, %v292_v18  ;;  %v315_v24 = vmul.f32 0.25, %v298_v19 }
  0xaf   : > { %v320_v23 = vadd.f32 %v313_v21, %v312_v20 }
  0xb0   : > { %v301_v25 = vpop.xlane.xlu0 %300  ;;  %v304_v26 = vpop.xlane.xlu1 %303 }
  0xb1   : > { %v321_v27 = vadd.f32 %v320_v23, %v314_v22  ;;  %v316_v28 = vmul.f32 0.25, %v301_v25  ;;  %v317_v30 = vmul.f32 0.25, %v304_v26 }
  0xb3   : > { %v322_v29 = vadd.f32 %v321_v27, %v315_v24 }
  0xb4   : > { %v307_v31 = vpop.xlane.xlu0 %306  ;;  %v310_v32 = vpop.xlane.xlu1 %309 }
  0xb5   : > { %v323_v33 = vadd.f32 %v322_v29, %v316_v28  ;;  %v318_v34 = vmul.f32 0.25, %v307_v31  ;;  %v319_v36 = vmul.f32 0.25, %v310_v32 }
  0xb7   : > { %v324_v35 = vadd.f32 %v323_v33, %v317_v30 }
  0xb9   : > { %v325_v37 = vadd.f32 %v324_v35, %v318_v34 }
  0xbb   : > { %v326_v38 = vadd.f32 %v325_v37, %v319_v36 }
  0xbd   : > { %v327_v39 = vrot.slane %v326_v38, 4 }
  0xbf   : > { %v328_v40 = vadd.f32 %v327_v39, %v326_v38 }
  0xc1   : > { %v329_v41 = vrot.slane %v328_v40, 2 }
  0xc3   : > { %v330_v42 = vadd.f32 %v329_v41, %v328_v40 }
  0xc5   : > { %v331_v43 = vrot.slane %v330_v42, 1 }
  0xc7   : > { %v332_v44 = vadd.f32 %v331_v43, %v330_v42 }
  0xc9   : > { %v334_v45 = vmul.f32 0.015625, %v332_v44 }
  0xcb   : > { %v4536_v46 = vsub.f32 %v279_v2, %v334_v45  ;;  %v4538_v47 = vsub.f32 %v278_v0, %v334_v45  ;;  %v4540_v48 = vsub.f32 %v281_v5, %v334_v45  ;;  %v4542_v49 = vsub.f32 %v280_v1, %v334_v45 }
  0xcc   : > { %v4548_v52 = vsub.f32 %v283_v7, %v334_v45  ;;  %v4550_v53 = vsub.f32 %v282_v6, %v334_v45  ;;  %v4558_v58 = vsub.f32 %v285_v13, %v334_v45  ;;  %v4560_v59 = vsub.f32 %v284_v12, %v334_v45  ;;  %v407_v6 = vld [vmem:[%s5261_s1] sm:$0x3] }
  0xcd   : > { %v344_v50 = vmul.f32 %v4536_v46, %v4536_v46  ;;  %v343_v51 = vmul.f32 %v4538_v47, %v4538_v47  ;;  %v346_v56 = vmul.f32 %v4540_v48, %v4540_v48  ;;  %v345_v57 = vmul.f32 %v4542_v49, %v4542_v49  ;;  %4134 = vmatprep.subr.msk.bf16.mxu0 %vm424_vm1, %v407_v6 }
  0xce   : > { %v348_v62 = vmul.f32 %v4548_v52, %v4548_v52  ;;  %v347_v63 = vmul.f32 %v4550_v53, %v4550_v53  ;;  %v350_v2 = vmul.f32 %v4558_v58, %v4558_v58  ;;  %v349_v3 = vmul.f32 %v4560_v59, %v4560_v59 }
  0xcf   : > { %v354_v54 = vsel %vm286_vm0, %v344_v50, 0.0  ;;  %v351_v55 = vsel %vm286_vm0, %v343_v51, 0.0  ;;  %v360_v60 = vsel %vm286_vm0, %v346_v56, 0.0  ;;  %v357_v61 = vsel %vm286_vm0, %v345_v57, 0.0 }
  0xd0   : > { %355 = vadd.xlane.f32.xlu1 %v354_v54  ;;  %352 = vadd.xlane.f32.xlu0 %v351_v55  ;;  %v366_v0 = vsel %vm286_vm0, %v348_v62, 0.0  ;;  %v363_v1 = vsel %vm286_vm0, %v347_v63, 0.0  ;;  %v372_v4 = vsel %vm286_vm0, %v350_v2, 0.0  ;;  %v369_v5 = vsel %vm286_vm0, %v349_v3, 0.0  ;;  %v4192_v55 = vld [vmem:[%s5261_s1 + $0xc] sm:$0xff]  }
  0xd1   : > { %v426_v7 = vsel %vm424_vm1, %v407_v6, 0 }
  0xd2   : > { %3845 = vmatpush3.bf16.msra.mxu0 %v426_v7 }
  0xd4   : > { %361 = vadd.xlane.f32.xlu1 %v360_v60  ;;  %358 = vadd.xlane.f32.xlu0 %v357_v61 }
  0xd8   : > { %367 = vadd.xlane.f32.xlu1 %v366_v0  ;;  %364 = vadd.xlane.f32.xlu0 %v363_v1 }
  0xdc   : > { %373 = vadd.xlane.f32.xlu1 %v372_v4  ;;  %370 = vadd.xlane.f32.xlu0 %v369_v5 }
 0x15d   : > { %v356_v8 = vpop.xlane.xlu1 %355  ;;  %v353_v9 = vpop.xlane.xlu0 %352 }
 0x15e   : > { %v376_v10 = vmul.f32 0.25, %v356_v8  ;;  %v375_v11 = vmul.f32 0.25, %v353_v9 }
 0x160   : > { %v383_v14 = vadd.f32 %v376_v10, %v375_v11 }
 0x161   : > { %v362_v12 = vpop.xlane.xlu1 %361  ;;  %v359_v13 = vpop.xlane.xlu0 %358 }
 0x162   : > { %v377_v15 = vmul.f32 0.25, %v359_v13  ;;  %v378_v16 = vmul.f32 0.25, %v362_v12 }
 0x164   : > { %v384_v17 = vadd.f32 %v383_v14, %v377_v15 }
 0x165   : > { %v368_v18 = vpop.xlane.xlu1 %367  ;;  %v365_v19 = vpop.xlane.xlu0 %364 }
 0x166   : > { %v385_v20 = vadd.f32 %v384_v17, %v378_v16  ;;  %v379_v21 = vmul.f32 0.25, %v365_v19  ;;  %v380_v22 = vmul.f32 0.25, %v368_v18 }
 0x168   : > { %v386_v23 = vadd.f32 %v385_v20, %v379_v21 }
 0x169   : > { %v374_v24 = vpop.xlane.xlu1 %373  ;;  %v371_v25 = vpop.xlane.xlu0 %370 }
 0x16a   : > { %v387_v26 = vadd.f32 %v386_v23, %v380_v22  ;;  %v381_v27 = vmul.f32 0.25, %v371_v25  ;;  %v382_v28 = vmul.f32 0.25, %v374_v24 }
 0x16c   : > { %v388_v29 = vadd.f32 %v387_v26, %v381_v27 }
 0x16e   : > { %v389_v30 = vadd.f32 %v388_v29, %v382_v28 }
 0x170   : > { %v390_v31 = vrot.slane %v389_v30, 4 }
 0x172   : > { %v391_v32 = vadd.f32 %v390_v31, %v389_v30 }
 0x174   : > { %v392_v33 = vrot.slane %v391_v32, 2 }
 0x176   : > { %v393_v34 = vadd.f32 %v392_v33, %v391_v32 }
 0x178   : > { %v394_v35 = vrot.slane %v393_v34, 1 }
 0x17a   : > { %v395_v36 = vadd.f32 %v394_v35, %v393_v34 }
 0x17c   : > { %v396_v37 = vmul.f32 0.015625, %v395_v36 }
 0x17e   : > { %v397_v38 = vadd.f32 1e-07, %v396_v37 }
 0x180   : > { %4223 = vrsqrt.f32 %v397_v38 }
 0x18a   : > { %v4224_v39 = vpop.eup %4223 }
 0x18b   : > { %v399_v40 = vmul.f32 %v4224_v39, %v4538_v47  ;;  %v400_v41 = vmul.f32 %v4224_v39, %v4536_v46  ;;  %v401_v42 = vmul.f32 %v4224_v39, %v4542_v49  ;;  %v402_v43 = vmul.f32 %v4224_v39, %v4540_v48  ;;  %v4189_v48 = vld [vmem:[%s5261_s1 + $0x14] sm:$0xff]  }
 0x18c   : > { %v403_v44 = vmul.f32 %v4224_v39, %v4550_v53  ;;  %v404_v45 = vmul.f32 %v4224_v39, %v4548_v52  ;;  %v405_v47 = vmul.f32 %v4224_v39, %v4560_v59  ;;  %v406_v46 = vmul.f32 %v4224_v39, %v4558_v58  ;;  %v4190_v52 = vld [vmem:[%s5261_s1 + $0x4] sm:$0xff]   ;;  %v4191_v53 = vld [vmem:[%s5261_s1 + $0x1c] sm:$0xff]   ;;  %3854 = vmatprep.subr.bf16.mxu0 %v4189_v48 }
 0x18d   : > { %v408_v50 = vpack.c.bf16 %v400_v41, %v399_v40  ;;  %v409_v51 = vpack.c.bf16 %v402_v43, %v401_v42  ;;  %3862 = vmatprep.subr.bf16.mxu1 %v4190_v52 }
 0x18e   : > { %v410_v54 = vpack.c.bf16 %v404_v45, %v403_v44  ;;  %v411_v49 = vpack.c.bf16 %v406_v46, %v405_v47  ;;  %3863 = vmatpush3.bf16.msra.mxu1 %v4190_v52 }
 0x18f   : > { %3846 = vmatprep.mubr.msk.bf16.mxu0 %vm286_vm0, %v408_v50  ;;  %3864 = vmatprep.subr.bf16.mxu1 %v4192_v55 }
 0x190   : > { %3847 = vmatmul.mubr.msk.bf16.vlgmr.msra.gmra.mrb[0].mxu0 %vm286_vm0, %v409_v51 }
 0x191   : > { %3850 = vmatprep.mubr.msk.bf16.mxu0 %vm286_vm0, %v410_v54  ;;  %3855 = vmatpush3.bf16.msra.mxu0 %v4189_v48 }
 0x192   : > { %3856 = vmatprep.subr.bf16.mxu0 %v4191_v53  ;;  %3865 = vmatpush3.bf16.msra.mxu1 %v4192_v55 }
 0x195   : > { %3857 = vmatpush3.bf16.msra.mxu0 %v4191_v53 }
 0x198   : > { %3851 = vmatmul.mubr.msk.bf16.gmra.mrb[4].mxu0 %vm286_vm0, %v411_v49 }
 0x263   : > { %v3848_v56 = vpop.f32.mrb[0].mxu0 }
 0x264   : > { %v462_v57 = vpop.f32.mrb[1].mxu0  ;;  %v497_v63 = vsel %vm493_vm2, %v3848_v56, 0.0 }
 0x265   : > { %v3849_v58 = vpop.f32.mrb[2].mxu0  ;;  %v494_v60 = vsel %vm493_vm2, %v462_v57, 0.0 }
 0x266   : > { %v465_v59 = vpop.f32.mrb[3].mxu0  ;;  %v499_v1 = vsel %vm493_vm2, %v3849_v58, 0.0 }
 0x267   : > { %v495_v61 = vsel %vm493_vm2, %v465_v59, 0.0 }
 0x268   : > { %v496_v62 = vadd.f32 %v495_v61, %v494_v60 }
 0x26a   : > { %v498_v0 = vadd.f32 %v497_v63, %v496_v62  ;;  %v3614_v62 = vld [vmem:[%s5262_s2] ss:$0 sm:$0xff] }
 0x26b   : > { %v3852_v2 = vpop.f32.mrb[4].mxu0 }
 0x26c   : > { %v478_v3 = vpop.f32.mrb[5].mxu0  ;;  %v500_v4 = vadd.f32 %v499_v1, %v498_v0  ;;  %v505_v11 = vsel %vm493_vm2, %v3852_v2, 0.0 }
 0x26d   : > { %v501_v5 = vsel %vm493_vm2, %v478_v3, 0.0  ;;  %v3853_v6 = vpop.f32.mrb[6].mxu0 }
 0x26e   : > { %v502_v7 = vadd.f32 %v501_v5, %v500_v4  ;;  %v481_v8 = vpop.f32.mrb[7].mxu0  ;;  %v507_v13 = vsel %vm493_vm2, %v3853_v6, 0.0 }
 0x26f   : > { %v503_v9 = vsel %vm493_vm2, %v481_v8, 0.0 }
 0x270   : > { %v504_v10 = vadd.f32 %v503_v9, %v502_v7  ;;  %v3615_v7 = vld [vmem:[%s5262_s2 + $0x1] ss:$0 sm:$0xff] }
 0x272   : > { %v506_v12 = vadd.f32 %v505_v11, %v504_v10 }
 0x274   : > { %v508_v14 = vadd.f32 %v507_v13, %v506_v12 }
 0x276   : > { %v509_v15 = vrot.slane %v508_v14, 4 }
 0x278   : > { %v510_v16 = vadd.f32 %v509_v15, %v508_v14 }
 0x27a   : > { %v511_v17 = vrot.slane %v510_v16, 2 }
 0x27c   : > { %v512_v18 = vadd.f32 %v511_v17, %v510_v16 }
 0x27e   : > { %v513_v19 = vrot.slane %v512_v18, 1 }
 0x280   : > { %v514_v20 = vadd.f32 %v513_v19, %v512_v18 }
 0x282   : > { %v515_v21 = vmul.f32 0.015625, %v514_v20 }
 0x284   : > { %v516_v22 = vsub.f32 %v462_v57, %v515_v21  ;;  %v517_v23 = vsub.f32 %v465_v59, %v515_v21  ;;  %v518_v24 = vsub.f32 %v3848_v56, %v515_v21  ;;  %v519_v25 = vsub.f32 %v3849_v58, %v515_v21 }
 0x285   : > { %v520_v26 = vsub.f32 %v478_v3, %v515_v21  ;;  %v521_v27 = vsub.f32 %v481_v8, %v515_v21  ;;  %v522_v28 = vsub.f32 %v3852_v2, %v515_v21  ;;  %v523_v29 = vsub.f32 %v3853_v6, %v515_v21 }
 0x286   : > { %v524_v30 = vmul.f32 %v516_v22, %v516_v22  ;;  %v525_v31 = vmul.f32 %v517_v23, %v517_v23  ;;  %v526_v32 = vmul.f32 %v518_v24, %v518_v24  ;;  %v527_v33 = vmul.f32 %v519_v25, %v519_v25 }
 0x287   : > { %v528_v37 = vmul.f32 %v520_v26, %v520_v26  ;;  %v529_v40 = vmul.f32 %v521_v27, %v521_v27  ;;  %v530_v43 = vmul.f32 %v522_v28, %v522_v28  ;;  %v531_v50 = vmul.f32 %v523_v29, %v523_v29 }
 0x288   : > { %v532_v34 = vsel %vm493_vm2, %v524_v30, 0.0  ;;  %v533_v35 = vsel %vm493_vm2, %v525_v31, 0.0  ;;  %v535_v38 = vsel %vm493_vm2, %v526_v32, 0.0  ;;  %v537_v41 = vsel %vm493_vm2, %v527_v33, 0.0 }
 0x289   : > { %v534_v36 = vadd.f32 %v533_v35, %v532_v34  ;;  %v539_v44 = vsel %vm493_vm2, %v528_v37, 0.0  ;;  %v541_v51 = vsel %vm493_vm2, %v529_v40, 0.0  ;;  %v543_v47 = vsel %vm493_vm2, %v530_v43, 0.0 }
 0x28a   : > { %v545_v49 = vsel %vm493_vm2, %v531_v50, 0.0 }
 0x28b   : > { %v536_v39 = vadd.f32 %v535_v38, %v534_v36 }
 0x28d   : > { %v538_v42 = vadd.f32 %v537_v41, %v536_v39 }
 0x28f   : > { %v540_v45 = vadd.f32 %v539_v44, %v538_v42 }
 0x291   : > { %v542_v54 = vadd.f32 %v541_v51, %v540_v45 }
 0x293   : > { %v544_v46 = vadd.f32 %v543_v47, %v542_v54 }
 0x295   : > { %v546_v48 = vadd.f32 %v545_v49, %v544_v46 }
 0x297   : > { %v547_v52 = vrot.slane %v546_v48, 4 }
 0x299   : > { %v548_v53 = vadd.f32 %v547_v52, %v546_v48 }
 0x29b   : > { %v549_v55 = vrot.slane %v548_v53, 2 }
 0x29d   : > { %v550_v56 = vadd.f32 %v549_v55, %v548_v53 }
 0x29f   : > { %v551_v57 = vrot.slane %v550_v56, 1 }
 0x2a1   : > { %v552_v58 = vadd.f32 %v551_v57, %v550_v56 }
 0x2a3   : > { %v553_v59 = vmul.f32 0.015625, %v552_v58 }
 0x2a5   : > { %v554_v60 = vadd.f32 1e-05, %v553_v59 }
 0x2a7   : > { %4225 = vrsqrt.f32 %v554_v60 }
 0x2b1   : > { %v4226_v61 = vpop.eup %4225 }
 0x2b2   : > { %v556_v63 = vmul.f32 %v4226_v61, %v516_v22  ;;  %v557_v0 = vmul.f32 %v4226_v61, %v517_v23  ;;  %v558_v1 = vmul.f32 %v4226_v61, %v518_v24  ;;  %v559_v2 = vmul.f32 %v4226_v61, %v519_v25 }
 0x2b3   : > { %v560_v3 = vmul.f32 %v4226_v61, %v520_v26  ;;  %v561_v4 = vmul.f32 %v4226_v61, %v521_v27  ;;  %v562_v5 = vmul.f32 %v4226_v61, %v522_v28  ;;  %v563_v6 = vmul.f32 %v4226_v61, %v523_v29 }
 0x2b4   : > { %v569_v8 = vmul.f32 %v3614_v62, %v556_v63  ;;  %v570_v9 = vmul.f32 %v3614_v62, %v557_v0  ;;  %v571_v10 = vmul.f32 %v3614_v62, %v558_v1  ;;  %v572_v11 = vmul.f32 %v3614_v62, %v559_v2 }
 0x2b5   : > { %v573_v12 = vmul.f32 %v3614_v62, %v560_v3  ;;  %v574_v13 = vmul.f32 %v3614_v62, %v561_v4  ;;  %v575_v14 = vmul.f32 %v3614_v62, %v562_v5  ;;  %v576_v15 = vmul.f32 %v3614_v62, %v563_v6 }
 0x2b6   : > { %v4625_v16 = vadd.f32 %v3615_v7, %v569_v8  ;;  %v4627_v17 = vadd.f32 %v3615_v7, %v570_v9  ;;  %v4629_v18 = vadd.f32 %v3615_v7, %v571_v10  ;;  %v4631_v19 = vadd.f32 %v3615_v7, %v572_v11 }
 0x2b7   : > { %v4633_v20 = vadd.f32 %v3615_v7, %v573_v12  ;;  %v4635_v21 = vadd.f32 %v3615_v7, %v574_v13  ;;  %v4637_v22 = vadd.f32 %v3615_v7, %v575_v14  ;;  %v4639_v23 = vadd.f32 %v3615_v7, %v576_v15 }
 0x2b8   : > { %v590_v24 = vmul.f32 %v4625_v16, %v4625_v16  ;;  %v591_v25 = vmul.f32 %v4627_v17, %v4627_v17  ;;  %v592_v26 = vmul.f32 %v4629_v18, %v4629_v18  ;;  %v593_v27 = vmul.f32 %v4631_v19, %v4631_v19 }
 0x2b9   : > { %v594_v28 = vmul.f32 %v4633_v20, %v4633_v20  ;;  %v595_v29 = vmul.f32 %v4635_v21, %v4635_v21  ;;  %v596_v30 = vmul.f32 %v4637_v22, %v4637_v22  ;;  %v597_v31 = vmul.f32 %v4639_v23, %v4639_v23 }
 0x2ba   : > { %v598_v32 = vmul.f32 %v590_v24, %v4625_v16  ;;  %v599_v33 = vmul.f32 %v591_v25, %v4627_v17  ;;  %v600_v34 = vmul.f32 %v592_v26, %v4629_v18  ;;  %v601_v35 = vmul.f32 %v593_v27, %v4631_v19 }
 0x2bb   : > { %v602_v36 = vmul.f32 %v594_v28, %v4633_v20  ;;  %v603_v37 = vmul.f32 %v595_v29, %v4635_v21  ;;  %v604_v38 = vmul.f32 %v596_v30, %v4637_v22  ;;  %v605_v39 = vmul.f32 %v597_v31, %v4639_v23 }
 0x2bc   : > { %v606_v40 = vmul.f32 0.044715, %v598_v32  ;;  %v607_v41 = vmul.f32 0.044715, %v599_v33  ;;  %v608_v42 = vmul.f32 0.044715, %v600_v34 }
 0x2bd   : > { %v609_v43 = vmul.f32 0.044715, %v601_v35  ;;  %v610_v44 = vmul.f32 0.044715, %v602_v36  ;;  %v611_v45 = vmul.f32 0.044715, %v603_v37 }
 0x2be   : > { %v612_v50 = vmul.f32 0.044715, %v604_v38  ;;  %v613_v51 = vmul.f32 0.044715, %v605_v39  ;;  %v614_v54 = vadd.f32 %v606_v40, %v4625_v16  ;;  %v615_v47 = vadd.f32 %v607_v41, %v4627_v17 }
 0x2bf   : > { %v616_v46 = vadd.f32 %v608_v42, %v4629_v18  ;;  %v617_v49 = vadd.f32 %v609_v43, %v4631_v19  ;;  %v618_v48 = vadd.f32 %v610_v44, %v4633_v20  ;;  %v619_v52 = vadd.f32 %v611_v45, %v4635_v21  ;;  %v4193_v44 = vld [vmem:[%s5261_s1 + $0x34] sm:$0xff]  }
 0x2c0   : > { %v620_v53 = vadd.f32 %v612_v50, %v4637_v22  ;;  %v622_v55 = vmul.f32 0.7978846, %v614_v54  ;;  %v623_v56 = vmul.f32 0.7978846, %v615_v47  ;;  %v621_v57 = vadd.f32 %v613_v51, %v4639_v23  ;;  %v4194_v50 = vld [vmem:[%s5261_s1 + $0x3c] sm:$0xff]  }
 0x2c1   : > { %v624_v58 = vmul.f32 0.7978846, %v616_v46  ;;  %v625_v59 = vmul.f32 0.7978846, %v617_v49  ;;  %v626_v60 = vmul.f32 0.7978846, %v618_v48 }
 0x2c2   : > { %4227 = vtanh.f32 %v622_v55  ;;  %v627_v61 = vmul.f32 0.7978846, %v619_v52  ;;  %v628_v62 = vmul.f32 0.7978846, %v620_v53  ;;  %v629_v63 = vmul.f32 0.7978846, %v621_v57 }
 0x2c3   : > { %4229 = vtanh.f32 %v623_v56  ;;  %v4419_v45 = vmov 0.0  }
 0x2c4   : > { %4231 = vtanh.f32 %v624_v58  ;;  %3870 = vmatprep.subr.bf16.mxu0 %v4419_v45  ;;  %3886 = vmatprep.subr.bf16.mxu1 %v4419_v45 }
 0x2c5   : > { %4233 = vtanh.f32 %v625_v59 }
 0x2c6   : > { %4235 = vtanh.f32 %v626_v60 }
 0x2c7   : > { %4237 = vtanh.f32 %v627_v61 }
 0x2c8   : > { %4239 = vtanh.f32 %v628_v62 }
 0x2c9   : > { %4241 = vtanh.f32 %v629_v63 }
 0x2cc   : > { %v4228_v0 = vpop.eup %4227 }
 0x2cd   : > { %v4230_v1 = vpop.eup %4229  ;;  %v638_v2 = vadd.f32 1.0, %v4228_v0 }
 0x2ce   : > { %v4232_v3 = vpop.eup %4231  ;;  %v639_v4 = vadd.f32 1.0, %v4230_v1 }
 0x2cf   : > { %v4234_v5 = vpop.eup %4233  ;;  %v640_v6 = vadd.f32 1.0, %v4232_v3  ;;  %v646_v7 = vmul.f32 0.5, %v638_v2 }
 0x2d0   : > { %v4236_v8 = vpop.eup %4235  ;;  %v641_v9 = vadd.f32 1.0, %v4234_v5  ;;  %v647_v10 = vmul.f32 0.5, %v639_v4 }
 0x2d1   : > { %v4238_v11 = vpop.eup %4237  ;;  %v642_v12 = vadd.f32 1.0, %v4236_v8  ;;  %v648_v13 = vmul.f32 0.5, %v640_v6  ;;  %v654_v14 = vmul.f32 %v646_v7, %v4625_v16 }
 0x2d2   : > { %v4240_v15 = vpop.eup %4239  ;;  %v643_v24 = vadd.f32 1.0, %v4238_v11  ;;  %v649_v25 = vmul.f32 0.5, %v641_v9  ;;  %v655_v26 = vmul.f32 %v647_v10, %v4627_v17 }
 0x2d3   : > { %v4242_v27 = vpop.eup %4241  ;;  %v644_v28 = vadd.f32 1.0, %v4240_v15  ;;  %v650_v29 = vmul.f32 0.5, %v642_v12  ;;  %v656_v30 = vmul.f32 %v648_v13, %v4629_v18  ;;  %662 = vst.msk [vmem:[#allocation2] sm:$0xff] %vm493_vm2, %v654_v14 }
 0x2d4   : > { %v645_v31 = vadd.f32 1.0, %v4242_v27  ;;  %v651_v32 = vmul.f32 0.5, %v643_v24  ;;  %v657_v33 = vmul.f32 %v649_v25, %v4631_v19  ;;  %663 = vst.msk [vmem:[#allocation2 + $0x8] sm:$0xff] %vm493_vm2, %v655_v26 }
 0x2d5   : > { %v652_v34 = vmul.f32 0.5, %v644_v28  ;;  %v658_v16 = vmul.f32 %v650_v29, %v4633_v20  ;;  %664 = vst.msk [vmem:[#allocation2 + $0x10] sm:$0xff] %vm493_vm2, %v656_v30 }
 0x2d6   : > { %v653_v35 = vmul.f32 0.5, %v645_v31  ;;  %v659_v17 = vmul.f32 %v651_v32, %v4635_v21  ;;  %665 = vst.msk [vmem:[#allocation2 + $0x18] sm:$0xff] %vm493_vm2, %v657_v33 }
 0x2d7   : > { %v660_v18 = vmul.f32 %v652_v34, %v4637_v22  ;;  %666 = vst.msk [vmem:[#allocation2 + $0x20] sm:$0xff] %vm493_vm2, %v658_v16 }
 0x2d8   : > { %v661_v36 = vmul.f32 %v653_v35, %v4639_v23  ;;  %667 = vst.msk [vmem:[#allocation2 + $0x28] sm:$0xff] %vm493_vm2, %v659_v17 }
 0x2d9   : > { %668 = vst.msk [vmem:[#allocation2 + $0x30] sm:$0xff] %vm493_vm2, %v660_v18 }
 0x2da   : > { %669 = vst.msk [vmem:[#allocation2 + $0x38] sm:$0xff] %vm493_vm2, %v661_v36 }
 0x2db   : > { %v684_v19 = vld [vmem:[#allocation2 + $0x1] ss:$2 sm:$0xff]  ;;  %v670_v20 = vld [vmem:[#allocation2] ss:$2 sm:$0xff] }
 0x2dd   : > { %v686_v37 = vld [vmem:[#allocation2 + $0x11] ss:$2 sm:$0xff]  ;;  %v672_v38 = vld [vmem:[#allocation2 + $0x10] ss:$2 sm:$0xff] }
 0x2de   : > { %v695_v39 = vpack.c.bf16 %v686_v37, %v684_v19  ;;  %v681_v21 = vpack.c.bf16 %v672_v38, %v670_v20  ;;  %v4195_v20 = vld [vmem:[%s5261_s1 + $0x24] sm:$0xff]   ;;  %v4196_v38 = vld [vmem:[%s5261_s1 + $0x2c] sm:$0xff]  }
 0x2df   : > { %v688_v40 = vld [vmem:[#allocation2 + $0x21] ss:$2 sm:$0xff]  ;;  %v674_v41 = vld [vmem:[#allocation2 + $0x20] ss:$2 sm:$0xff] }
 0x2e0   : > { %3858 = vmatprep.mubr.msk.bf16.mxu0 %vm493_vm2, %v695_v39  ;;  %3866 = vmatprep.mubr.msk.bf16.mxu1 %vm493_vm2, %v681_v21 }
 0x2e1   : > { %v690_v22 = vld [vmem:[#allocation2 + $0x31] ss:$2 sm:$0xff]  ;;  %v676_v23 = vld [vmem:[#allocation2 + $0x30] ss:$2 sm:$0xff] }
 0x2e2   : > { %v696_v42 = vpack.c.bf16 %v690_v22, %v688_v40  ;;  %v682_v43 = vpack.c.bf16 %v676_v23, %v674_v41 }
 0x2e4   : > { %3859 = vmatmul.mubr.msk.bf16.vlgmr.msra.gmra.mrb[8].mxu0 %vm493_vm2, %v696_v42  ;;  %3867 = vmatmul.mubr.msk.bf16.vlgmr.msra.gmra.mrb[0].mxu1 %vm493_vm2, %v682_v43 }
 0x2e5   : > { %3874 = vmatprep.mubr.msk.bf16.mxu0 %vm4420_vm3, %v4419_v45  ;;  %3871 = vmatpush3.bf16.msra.mxu0 %v4193_v44 }
 0x2e6   : > { %3872 = vmatprep.subr.bf16.mxu0 %v4419_v45  ;;  %3890 = vmatprep.mubr.msk.bf16.mxu1 %vm4420_vm3, %v4419_v45 }
 0x2e9   : > { %3873 = vmatpush3.bf16.msra.mxu0 %v4194_v50 }
 0x2ea   : > { %3878 = vmatprep.subr.bf16.mxu0 %v4419_v45 }
 0x3b7   : > { %v3860_v51 = vpop.f32.mrb[8].mxu0  ;;  %v3868_v54 = vpop.f32.mrb[0].mxu1 }
 0x3b8   : > { %v825_v47 = vadd.f32 %v3868_v54, %v3860_v51  ;;  %v749_v46 = vpop.f32.mrb[9].mxu0  ;;  %v816_v49 = vpop.f32.mrb[1].mxu1 }
 0x3b9   : > { %v817_v48 = vadd.f32 %v816_v49, %v749_v46  ;;  %v3861_v52 = vpop.f32.mrb[10].mxu0  ;;  %v3869_v53 = vpop.f32.mrb[2].mxu1 }
 0x3ba   : > { %v833_v55 = vmul.f32 %v825_v47, %v825_v47  ;;  %v828_v56 = vadd.f32 %v3869_v53, %v3861_v52  ;;  %v752_v57 = vpop.f32.mrb[11].mxu0  ;;  %v819_v58 = vpop.f32.mrb[3].mxu1 }
 0x3bb   : > { %v831_v59 = vmul.f32 %v817_v48, %v817_v48  ;;  %v820_v60 = vadd.f32 %v819_v58, %v752_v57 }
 0x3bc   : > { %v837_v61 = vmul.f32 %v833_v55, %v825_v47  ;;  %v834_v62 = vmul.f32 %v828_v56, %v828_v56 }
 0x3bd   : > { %v835_v63 = vmul.f32 %v831_v59, %v817_v48  ;;  %v832_v0 = vmul.f32 %v820_v60, %v820_v60 }
 0x3be   : > { %v841_v1 = vmul.f32 0.044715, %v837_v61  ;;  %v838_v2 = vmul.f32 %v834_v62, %v828_v56 }
 0x3bf   : > { %v839_v3 = vmul.f32 0.044715, %v835_v63  ;;  %v836_v4 = vmul.f32 %v832_v0, %v820_v60 }
 0x3c0   : > { %v845_v5 = vadd.f32 %v841_v1, %v825_v47  ;;  %v842_v6 = vmul.f32 0.044715, %v838_v2 }
 0x3c1   : > { %v843_v7 = vadd.f32 %v839_v3, %v817_v48  ;;  %v840_v8 = vmul.f32 0.044715, %v836_v4 }
 0x3c2   : > { %v849_v9 = vmul.f32 0.7978846, %v845_v5  ;;  %v846_v10 = vadd.f32 %v842_v6, %v828_v56 }
 0x3c3   : > { %v847_v11 = vmul.f32 0.7978846, %v843_v7  ;;  %v844_v12 = vadd.f32 %v840_v8, %v820_v60 }
 0x3c4   : > { %4243 = vtanh.f32 %v849_v9  ;;  %v850_v13 = vmul.f32 0.7978846, %v846_v10  ;;  %v4197_v10 = vld [vmem:[%s5261_s1 + $0x44] sm:$0xff]  }
 0x3c5   : > { %4245 = vtanh.f32 %v847_v11  ;;  %v848_v14 = vmul.f32 0.7978846, %v844_v12  ;;  %3887 = vmatpush3.bf16.msra.mxu1 %v4197_v10  ;;  %v4198_v11 = vld [vmem:[%s5261_s1 + $0x4c] sm:$0xff]  }
 0x3c6   : > { %4247 = vtanh.f32 %v850_v13  ;;  %3888 = vmatprep.subr.bf16.mxu1 %v4419_v45 }
 0x3c7   : > { %4249 = vtanh.f32 %v848_v14 }
 0x3c9   : > { %3889 = vmatpush3.bf16.msra.mxu1 %v4198_v11 }
 0x3ca   : > { %3894 = vmatprep.subr.bf16.mxu1 %v4419_v45 }
 0x3ce   : > { %v4244_v15 = vpop.eup %4243 }
 0x3cf   : > { %v4246_v24 = vpop.eup %4245  ;;  %v857_v25 = vadd.f32 1.0, %v4244_v15 }
 0x3d0   : > { %v4248_v26 = vpop.eup %4247  ;;  %v855_v27 = vadd.f32 1.0, %v4246_v24 }
 0x3d1   : > { %v4250_v28 = vpop.eup %4249  ;;  %v861_v29 = vmul.f32 0.5, %v857_v25  ;;  %v858_v30 = vadd.f32 1.0, %v4248_v26 }
 0x3d2   : > { %v859_v31 = vmul.f32 0.5, %v855_v27  ;;  %v856_v32 = vadd.f32 1.0, %v4250_v28  ;;  %v3630_v27 = vld [vmem:[%s5262_s2 + $0x2] ss:$0 sm:$0xff] }
 0x3d3   : > { %v865_v33 = vmul.f32 %v861_v29, %v825_v47  ;;  %v862_v34 = vmul.f32 0.5, %v858_v30 }
 0x3d4   : > { %v863_v16 = vmul.f32 %v859_v31, %v817_v48  ;;  %v860_v35 = vmul.f32 0.5, %v856_v32  ;;  %v3631_v32 = vld [vmem:[%s5262_s2 + $0x3] ss:$0 sm:$0xff] }
 0x3d5   : > { %869 = vst.msk [vmem:[#allocation2 + $0x10] sm:$0xff] %vm493_vm2, %v865_v33  ;;  %v866_v17 = vmul.f32 %v862_v34, %v828_v56 }
 0x3d6   : > { %867 = vst.msk [vmem:[#allocation2] sm:$0xff] %vm493_vm2, %v863_v16  ;;  %v864_v18 = vmul.f32 %v860_v35, %v820_v60 }
 0x3d7   : > { %870 = vst.msk [vmem:[#allocation2 + $0x18] sm:$0xff] %vm493_vm2, %v866_v17  ;;  %v4199_v17 = vld [vmem:[%s5261_s1 + $0x64] sm:$0xff]  }
 0x3d8   : > { %868 = vst.msk [vmem:[#allocation2 + $0x8] sm:$0xff] %vm493_vm2, %v864_v18  ;;  %v4200_v18 = vld [vmem:[%s5261_s1 + $0x54] sm:$0xff]  }
 0x3de   : > { %v879_v36 = vld [vmem:[#allocation2 + $0x11] ss:$2 sm:$0xff]  ;;  %v872_v21 = vld [vmem:[#allocation2 + $0x10] ss:$2 sm:$0xff] }
 0x3df   : > { %v878_v19 = vld [vmem:[#allocation2 + $0x1] ss:$2 sm:$0xff]  ;;  %v871_v39 = vld [vmem:[#allocation2] ss:$2 sm:$0xff] }
 0x3e0   : > { %v884_v37 = vpack.c.bf16 %v879_v36, %v878_v19  ;;  %v877_v40 = vpack.c.bf16 %v872_v21, %v871_v39  ;;  %v4201_v36 = vld [vmem:[%s5261_s1 + $0x6c] sm:$0xff]   ;;  %v4202_v19 = vld [vmem:[%s5261_s1 + $0x5c] sm:$0xff]  }
 0x3e2   : > { %3875 = vmatmul.mubr.msk.bf16.vlgmr.msra.gmra.mrb[12].mxu0 %vm493_vm2, %v884_v37  ;;  %v3632_v37 = vld [vmem:[%s5262_s2 + $0x4] ss:$0 sm:$0xff] }
 0x3e3   : > { %3879 = vmatpush3.bf16.msra.mxu0 %v4195_v20  ;;  %3882 = vmatprep.mubr.msk.bf16.mxu0 %vm4420_vm3, %v4419_v45  ;;  %v1122_v20 = vlaneseq }
 0x3e4   : > { %3880 = vmatprep.subr.bf16.mxu0 %v4419_v45 }
 0x3e5   : > { %v1123_v39 = vshrl.u32 %v1122_v20, 7 }
 0x3e7   : > { %3881 = vmatpush3.bf16.msra.mxu0 %v4196_v38  ;;  %vm1145_vm4 = vcmp.lt.s32.totalorder %v1123_v39, 1  ;;  %vm1148_vm5 = vcmp.ge.s32.totalorder %v1123_v39, 1  ;;  %vm1127_vm6 = vcmp.lt.s32.totalorder %v1123_v39, 2  ;;  %vm1130_vm7 = vcmp.ge.s32.totalorder %v1123_v39, 2 }
 0x3e8   : > { %3902 = vmatprep.subr.bf16.mxu0 %v4419_v45  ;;  %vm1338_vm8 = vcmp.lt.s32.totalorder %v1123_v39, 7 }
 0x3ee   : > { %3883 = vmatmul.mubr.msk.bf16.vlgmr.msra.gmra.mrb[12].mxu0 %vm493_vm2, %v877_v40 }
 0x3ef   : > { %3906 = vmatprep.mubr.msk.bf16.mxu0 %vm4420_vm3, %v4419_v45  ;;  %3903 = vmatpush3.bf16.msra.mxu0 %v4200_v18 }
 0x3f0   : > { %3904 = vmatprep.subr.bf16.mxu0 %v4419_v45 }
 0x3f3   : > { %3905 = vmatpush3.bf16.msra.mxu0 %v4202_v19 }
 0x3f4   : > { %3918 = vmatprep.subr.bf16.mxu0 %v4419_v45 }
 0x4c1   : > { %v990_v41 = vpop.f32.mrb[12].mxu0 }
 0x4c2   : > { %v997_v22 = vmul.f32 %v990_v41, %v990_v41  ;;  %v3884_v23 = vpop.f32.mrb[13].mxu0 }
 0x4c3   : > { %v993_v42 = vpop.f32.mrb[14].mxu0 }
 0x4c4   : > { %v999_v43 = vmul.f32 %v997_v22, %v990_v41  ;;  %v998_v44 = vmul.f32 %v993_v42, %v993_v42  ;;  %v3885_v50 = vpop.f32.mrb[15].mxu0 }
 0x4c6   : > { %v1001_v51 = vmul.f32 0.044715, %v999_v43  ;;  %v1000_v54 = vmul.f32 %v998_v44, %v993_v42 }
 0x4c8   : > { %v1003_v47 = vadd.f32 %v1001_v51, %v990_v41  ;;  %v1002_v46 = vmul.f32 0.044715, %v1000_v54  ;;  %v1124_v54 = vadd.s32 8, %v1123_v39 }
 0x4ca   : > { %v1005_v49 = vmul.f32 0.7978846, %v1003_v47  ;;  %v1004_v48 = vadd.f32 %v1002_v46, %v993_v42  ;;  %vm1342_vm9 = vcmp.lt.s32.totalorder %v1124_v54, 15 }
 0x4cc   : > { %4251 = vtanh.f32 %v1005_v49  ;;  %v1006_v52 = vmul.f32 0.7978846, %v1004_v48 }
 0x4ce   : > { %4253 = vtanh.f32 %v1006_v52 }
 0x4d6   : > { %v4252_v53 = vpop.eup %4251 }
 0x4d7   : > { %v1009_v55 = vadd.f32 1.0, %v4252_v53 }
 0x4d8   : > { %v4254_v56 = vpop.eup %4253 }
 0x4d9   : > { %v1011_v57 = vmul.f32 0.5, %v1009_v55  ;;  %v1010_v58 = vadd.f32 1.0, %v4254_v56  ;;  %v4203_v55 = vld [vmem:[%s5261_s1 + $0x74] sm:$0xff]   ;;  %v4204_v56 = vld [vmem:[%s5261_s1 + $0x84] sm:$0xff]  }
 0x4db   : > { %v1013_v59 = vmul.f32 %v1011_v57, %v990_v41  ;;  %v1012_v60 = vmul.f32 0.5, %v1010_v58 }
 0x4dd   : > { %v1017_v61 = vsel %vm493_vm2, %v1013_v59, 0.0  ;;  %v1014_v62 = vmul.f32 %v1012_v60, %v993_v42 }
 0x4de   : > { %1018 = vadd.xlane.f32.xlu0 %v1017_v61  ;;  %v4205_v61 = vld [vmem:[%s5261_s1 + $0x7c] sm:$0xff]  }
 0x4df   : > { %v1020_v63 = vsel %vm493_vm2, %v1014_v62, 0.0 }
 0x4e0   : > { %1021 = vadd.xlane.f32.xlu1 %v1020_v63 }
 0x56b   : > { %v1019_v0 = vpop.xlane.xlu0 %1018 }
 0x56c   : > { %v1024_v1 = vmul.f32 0.03125, %v1019_v0 }
 0x56d   : > { %v1022_v2 = vpop.xlane.xlu1 %1021 }
 0x56e   : > { %v1026_v3 = vsub.f32 %v1013_v59, %v1024_v1  ;;  %v1025_v4 = vmul.f32 0.03125, %v1022_v2 }
 0x570   : > { %v1027_v5 = vsub.f32 %v1014_v62, %v1025_v4  ;;  %v1028_v6 = vmul.f32 %v1026_v3, %v1026_v3  ;;  %v4206_v62 = vld [vmem:[%s5261_s1 + $0x8c] sm:$0xff]  }
 0x572   : > { %v1030_v7 = vsel %vm493_vm2, %v1028_v6, 0.0  ;;  %v1029_v8 = vmul.f32 %v1027_v5, %v1027_v5 }
 0x573   : > { %1031 = vadd.xlane.f32.xlu0 %v1030_v7 }
 0x574   : > { %v1033_v9 = vsel %vm493_vm2, %v1029_v8, 0.0 }
 0x575   : > { %1034 = vadd.xlane.f32.xlu1 %v1033_v9 }
 0x600   : > { %v1032_v12 = vpop.xlane.xlu0 %1031 }
 0x601   : > { %v1036_v13 = vmul.f32 0.03125, %v1032_v12 }
 0x602   : > { %v1035_v14 = vpop.xlane.xlu1 %1034 }
 0x603   : > { %v1038_v15 = vadd.f32 1e-05, %v1036_v13  ;;  %v1037_v24 = vmul.f32 0.03125, %v1035_v14 }
 0x605   : > { %4255 = vrsqrt.f32 %v1038_v15  ;;  %v1039_v25 = vadd.f32 1e-05, %v1037_v24 }
 0x607   : > { %4257 = vrsqrt.f32 %v1039_v25 }
 0x60f   : > { %v4256_v26 = vpop.eup %4255 }
 0x610   : > { %v1042_v28 = vmul.f32 %v4256_v26, %v1026_v3  ;;  %v3648_v26 = vld [vmem:[%s5262_s2 + $0x5] ss:$0 sm:$0xff] }
 0x611   : > { %v4258_v29 = vpop.eup %4257 }
 0x612   : > { %v1048_v30 = vmul.f32 %v3630_v27, %v1042_v28  ;;  %v1043_v31 = vmul.f32 %v4258_v29, %v1027_v5 }
 0x614   : > { %v1049_v33 = vmul.f32 %v3630_v27, %v1043_v31  ;;  %v1054_v34 = vadd.f32 %v3631_v32, %v1048_v30 }
 0x616   : > { %v1055_v16 = vadd.f32 %v3631_v32, %v1049_v33 }
 0x618   : > { %v1060_v35 = vpack.c.bf16 %v1055_v16, %v1054_v34 }
 0x61a   : > { %3891 = vmatmul.mubr.msk.bf16.vlgmr.msra.gmra.mrb[4].mxu1 %vm493_vm2, %v1060_v35 }
 0x61b   : > { %3898 = vmatprep.mubr.msk.bf16.mxu1 %vm4420_vm3, %v4419_v45  ;;  %3895 = vmatpush3.bf16.msra.mxu1 %v4199_v17 }
 0x61c   : > { %3896 = vmatprep.subr.bf16.mxu1 %v4419_v45 }
 0x61f   : > { %3897 = vmatpush3.bf16.msra.mxu1 %v4201_v36 }
 0x620   : > { %3910 = vmatprep.subr.bf16.mxu1 %v4419_v45 }
 0x6ed   : > { %v1115_v38 = vpop.f32.mrb[4].mxu1 }
 0x6ee   : > { %v4765_v21 = vadd.f32 %v3632_v37, %v1115_v38  ;;  %v3892_v40 = vpop.f32.mrb[5].mxu1 }
 0x6ef   : > { %v1118_v41 = vpop.f32.mrb[6].mxu1 }
 0x6f0   : > { %v4767_v22 = vadd.f32 %v3632_v37, %v1118_v41  ;;  %v3893_v23 = vpop.f32.mrb[7].mxu1  ;;  %v1125_v42 = vrot.slane %v4765_v21, 6  ;;  %v1143_v43 = vrot.slane %v4765_v21, 7  ;;  %v1336_v57 = vrot.slane %v4765_v21, 1 }
 0x6f2   : > { %v1126_v44 = vrot.slane %v4767_v22, 6  ;;  %v1144_v50 = vrot.slane %v4767_v22, 7  ;;  %v1337_v51 = vrot.slane %v4767_v22, 1  ;;  %v1277_v1 = vpack.c.bf16 %v4767_v22, %v4765_v21 }
 0x6f4   : > { %v1146_v47 = vsel %vm1145_vm4, %v1143_v43, %v1144_v50  ;;  %v1147_v46 = vsel %vm1145_vm4, %v1144_v50, %v1143_v43  ;;  %v1128_v49 = vsel %vm1127_vm6, %v1125_v42, %v1126_v44  ;;  %v1129_v48 = vsel %vm1127_vm6, %v1126_v44, %v1125_v42 }
 0x6f5   : > { %v1154_v52 = vsel %vm1148_vm5, %v1147_v46, 0.0  ;;  %v1136_v53 = vsel %vm1130_vm7, %v1129_v48, 0.0  ;;  %v1340_v60 = vsel %vm1338_vm8, %v1337_v51, %v1336_v57  ;;  %v1339_v63 = vsel %vm1338_vm8, %v1336_v57, %v1337_v51 }
 0x6f6   : > { %v1160_v58 = vpack.c.bf16 %v1146_v47, %v1154_v52  ;;  %v1142_v59 = vpack.c.bf16 %v1128_v49, %v1136_v53  ;;  %v1348_v0 = vsel %vm1342_vm9, %v1340_v60, 0.0 }
 0x6f7   : > { %v1353_v2 = vpack.c.bf16 %v1348_v0, %v1339_v63 }
 0x6f8   : > { %3899 = vmatmul.mubr.msk.bf16.vlgmr.msra.gmra.mrb[8].mxu1 %vm493_vm2, %v1160_v58  ;;  %3907 = vmatmul.mubr.msk.bf16.vlgmr.msra.gmra.mrb[16].mxu0 %vm493_vm2, %v1142_v59 }
 0x6f9   : > { %3911 = vmatpush3.bf16.msra.mxu1 %v4203_v55  ;;  %3919 = vmatpush3.bf16.msra.mxu0 %v4204_v56 }
 0x6fa   : > { %3912 = vmatprep.subr.bf16.mxu1 %v4419_v45  ;;  %3920 = vmatprep.subr.bf16.mxu0 %v4419_v45 }
 0x6fb   : > { %3914 = vmatprep.mubr.msk.bf16.mxu1 %vm4420_vm3, %v4419_v45  ;;  %3922 = vmatprep.mubr.msk.bf16.mxu0 %vm4420_vm3, %v4419_v45 }
 0x6fd   : > { %3913 = vmatpush3.bf16.msra.mxu1 %v4205_v61  ;;  %3921 = vmatpush3.bf16.msra.mxu0 %v4206_v62  ;;  %v4208_v62 = vld [vmem:[%s5263_s3 + $0x8] sm:$0xff]  }
 0x6fe   : > { %3926 = vmatprep.subr.bf16.mxu1 %v4419_v45  ;;  %3934 = vmatprep.subr.bf16.mxu0 %v4419_v45 }
 0x700   : > { %3915 = vmatmul.mubr.msk.bf16.vlgmr.msra.gmra.mrb[12].mxu1 %vm493_vm2, %v1277_v1  ;;  %3923 = vmatmul.mubr.msk.bf16.vlgmr.msra.gmra.mrb[20].mxu0 %vm493_vm2, %v1353_v2 }
 0x701   : > { %3930 = vmatprep.mubr.msk.bf16.mxu1 %vm4420_vm3, %v4419_v45  ;;  %3936 = vmatprep.mubr.msk.bf16.mxu0 %vm4420_vm3, %v4419_v45 }
 0x7cb   : > { %v1210_v3 = vpop.f32.mrb[8].mxu1  ;;  %v1266_v4 = vpop.f32.mrb[16].mxu0 }
 0x7cc   : > { %v1267_v5 = vadd.f32 %v1266_v4, %v1210_v3  ;;  %v3900_v6 = vpop.f32.mrb[9].mxu1  ;;  %v3908_v7 = vpop.f32.mrb[17].mxu0 }
 0x7cd   : > { %v1213_v8 = vpop.f32.mrb[10].mxu1  ;;  %v1269_v9 = vpop.f32.mrb[18].mxu0  ;;  %v3649_v6 = vld [vmem:[%s5262_s2 + $0x6] ss:$0 sm:$0xff] }
 0x7ce   : > { %v1270_v10 = vadd.f32 %v1269_v9, %v1213_v8  ;;  %v3901_v11 = vpop.f32.mrb[11].mxu1  ;;  %v3909_v12 = vpop.f32.mrb[19].mxu0 }
 0x7cf   : > { %v3650_v11 = vld [vmem:[%s5262_s2 + $0x7] ss:$0 sm:$0xff] }
 0x7d3   : > { %v1327_v13 = vpop.f32.mrb[12].mxu1  ;;  %v1403_v14 = vpop.f32.mrb[20].mxu0 }
 0x7d4   : > { %v1334_v15 = vadd.f32 %v1327_v13, %v1267_v5  ;;  %v3916_v24 = vpop.f32.mrb[13].mxu1  ;;  %v3924_v25 = vpop.f32.mrb[21].mxu0 }
 0x7d5   : > { %v1330_v27 = vpop.f32.mrb[14].mxu1  ;;  %v1406_v28 = vpop.f32.mrb[22].mxu0  ;;  %v3651_v24 = vld [vmem:[%s5262_s2 + $0x8] ss:$0 sm:$0xff] }
 0x7d6   : > { %v1410_v29 = vadd.f32 %v1403_v14, %v1334_v15  ;;  %v1335_v30 = vadd.f32 %v1330_v27, %v1270_v10  ;;  %v3917_v31 = vpop.f32.mrb[15].mxu1  ;;  %v3925_v32 = vpop.f32.mrb[23].mxu0 }
 0x7d8   : > { %v1417_v33 = vadd.f32 %v3648_v26, %v1410_v29  ;;  %v1411_v34 = vadd.f32 %v1406_v28, %v1335_v30 }
 0x7da   : > { %v1419_v16 = vmul.f32 %v1417_v33, %v1417_v33  ;;  %v1418_v35 = vadd.f32 %v3648_v26, %v1411_v34 }
 0x7dc   : > { %v1421_v17 = vmul.f32 %v1419_v16, %v1417_v33  ;;  %v1420_v18 = vmul.f32 %v1418_v35, %v1418_v35 }
 0x7de   : > { %v1423_v36 = vmul.f32 0.044715, %v1421_v17  ;;  %v1422_v19 = vmul.f32 %v1420_v18, %v1418_v35 }
 0x7e0   : > { %v1425_v20 = vadd.f32 %v1423_v36, %v1417_v33  ;;  %v1424_v37 = vmul.f32 0.044715, %v1422_v19 }
 0x7e2   : > { %v1426_v38 = vadd.f32 %v1424_v37, %v1418_v35  ;;  %v1427_v39 = vmul.f32 0.7978846, %v1425_v20 }
 0x7e4   : > { %4259 = vtanh.f32 %v1427_v39  ;;  %v1428_v40 = vmul.f32 0.7978846, %v1426_v38 }
 0x7e6   : > { %4261 = vtanh.f32 %v1428_v40 }
 0x7ee   : > { %v4260_v41 = vpop.eup %4259 }
 0x7ef   : > { %v1431_v23 = vadd.f32 1.0, %v4260_v41 }
 0x7f0   : > { %v4262_v42 = vpop.eup %4261 }
 0x7f1   : > { %v1433_v43 = vmul.f32 0.5, %v1431_v23  ;;  %v1432_v44 = vadd.f32 1.0, %v4262_v42 }
 0x7f3   : > { %v1435_v50 = vmul.f32 %v1433_v43, %v1417_v33  ;;  %v1434_v51 = vmul.f32 0.5, %v1432_v44 }
 0x7f5   : > { %v1437_v54 = vadd.f32 %v1435_v50, %v4765_v21  ;;  %v1436_v47 = vmul.f32 %v1434_v51, %v1418_v35 }
 0x7f7   : > { %v1441_v46 = vsel %vm493_vm2, %v1437_v54, 0.0  ;;  %v1438_v49 = vadd.f32 %v1436_v47, %v4767_v22  ;;  %v4207_v22 = vld [vmem:[%s5263_s3] sm:$0xff]  }
 0x7f8   : > { %1442 = vadd.xlane.f32.xlu0 %v1441_v46  ;;  %3927 = vmatpush3.bf16.msra.mxu1 %v4207_v22 }
 0x7f9   : > { %v1444_v48 = vsel %vm493_vm2, %v1438_v49, 0.0  ;;  %3928 = vmatprep.subr.bf16.mxu1 %v4419_v45 }
 0x7fa   : > { %1445 = vadd.xlane.f32.xlu1 %v1444_v48 }
 0x7fc   : > { %3929 = vmatpush3.bf16.msra.mxu1 %v4208_v62 }
 0x7fd   : > { %3940 = vmatprep.subr.bf16.mxu1 %v4419_v45 }
 0x885   : > { %v1443_v52 = vpop.xlane.xlu0 %1442 }
 0x886   : > { %v1447_v53 = vmul.f32 0.03125, %v1443_v52 }
 0x887   : > { %v1446_v55 = vpop.xlane.xlu1 %1445 }
 0x888   : > { %v1449_v56 = vsub.f32 %v1437_v54, %v1447_v53  ;;  %v1448_v57 = vmul.f32 0.03125, %v1446_v55 }
 0x88a   : > { %v1450_v58 = vsub.f32 %v1438_v49, %v1448_v57  ;;  %v1451_v59 = vmul.f32 %v1449_v56, %v1449_v56 }
 0x88c   : > { %v1453_v60 = vsel %vm493_vm2, %v1451_v59, 0.0  ;;  %v1452_v61 = vmul.f32 %v1450_v58, %v1450_v58 }
 0x88d   : > { %1454 = vadd.xlane.f32.xlu0 %v1453_v60 }
 0x88e   : > { %v1456_v21 = vsel %vm493_vm2, %v1452_v61, 0.0 }
 0x88f   : > { %1457 = vadd.xlane.f32.xlu1 %v1456_v21 }
 0x91a   : > { %v1455_v63 = vpop.xlane.xlu0 %1454 }
 0x91b   : > { %v1459_v0 = vmul.f32 0.03125, %v1455_v63 }
 0x91c   : > { %v1458_v1 = vpop.xlane.xlu1 %1457 }
 0x91d   : > { %v1461_v2 = vadd.f32 1e-05, %v1459_v0  ;;  %v1460_v3 = vmul.f32 0.03125, %v1458_v1 }
 0x91f   : > { %4263 = vrsqrt.f32 %v1461_v2  ;;  %v1462_v4 = vadd.f32 1e-05, %v1460_v3 }
 0x921   : > { %4265 = vrsqrt.f32 %v1462_v4 }
 0x929   : > { %v4264_v5 = vpop.eup %4263 }
 0x92a   : > { %v1465_v7 = vmul.f32 %v4264_v5, %v1449_v56 }
 0x92b   : > { %v4266_v8 = vpop.eup %4265 }
 0x92c   : > { %v1471_v9 = vmul.f32 %v3649_v6, %v1465_v7  ;;  %v1466_v10 = vmul.f32 %v4266_v8, %v1450_v58 }
 0x92e   : > { %v1472_v12 = vmul.f32 %v3649_v6, %v1466_v10  ;;  %v4830_v13 = vadd.f32 %v3650_v11, %v1471_v9 }
 0x930   : > { %v4832_v14 = vadd.f32 %v3650_v11, %v1472_v12 }
 0x932   : > { %v1483_v15 = vpack.c.bf16 %v4832_v14, %v4830_v13 }
 0x934   : > { %3931 = vmatmul.mubr.msk.bf16.vlgmr.msra.gmra.mrb[16].mxu1 %vm493_vm2, %v1483_v15 }
 0x935   : > { %3942 = vmatprep.mubr.msk.bf16.mxu1 %vm4420_vm3, %v4419_v45 }
 0xa07   : > { %v1538_v25 = vpop.f32.mrb[16].mxu1 }
 0xa08   : > { %v3932_v26 = vpop.f32.mrb[17].mxu1  ;;  %v1539_v28 = vadd.f32 %v3651_v24, %v1538_v25 }
 0xa09   : > { %v1541_v27 = vpop.f32.mrb[18].mxu1 }
 0xa0a   : > { %v1542_v29 = vadd.f32 %v3651_v24, %v1541_v27  ;;  %v3933_v30 = vpop.f32.mrb[19].mxu1 }
 0xa0c   : > { %v4842_v31 = vpack.c.bf16 %v1542_v29, %v1539_v28  ;;  %v1546_v28 = vld [vmem:[%s5264_s4] sm:$0xff] }
 0xa0d   : > { %v1675_v29 = vpack.c.bf16 %v1546_v28, %v1546_v28 }
 0xa0e   : > { %1678 = vrot.lane.b32.xlu1 %v4842_v31, %s4421_s22  ;;  %1551 = vrot.lane.b32.xlu0 %v4842_v31, %s4422_s23 }
 0xa0f   : > { %v1853_v30 = vsel %vm1804_vm12, %v1675_v29, 0 }
 0xa12   : > { %1676 = vrot.lane.b32.xlu1 %v4842_v31, %s4423_s29 }
 0xa80   : > { %v1552_v32 = vpop.permute.xlu0 %1551  ;;  %v1679_v34 = vpop.permute.xlu1 %1678 }
 0xa81   : > { %v1558_v33 = vsel %vm1553_vm10, %v1552_v32, 0  ;;  %v1684_v16 = vsel %vm1553_vm10, %v1679_v34, 0  ;;  %v1547_v32 = vld [vmem:[%s5264_s4 + $0x8] sm:$0xff] }
 0xa82   : > { %3935 = vmatpush3.bf16.xpose.msra.mxu0 %v1558_v33  ;;  %v1800_v33 = vpack.c.bf16 %v1547_v32, %v1547_v32 }
 0xa83   : > { %3946 = vmatprep.subr.bf16.mxu0 %v4419_v45 }
 0xa84   : > { %v1677_v35 = vpop.permute.xlu1 %1676  ;;  %v1806_v34 = vsel %vm1804_vm12, %v1800_v33, 0 }
 0xa89   : > { %3937 = vmatmul.mubr.msk.bf16.vlgmr.msra.gmra.mrb[24].mxu0 %vm1553_vm10, %v4842_v31 }
 0xa8a   : > { %3947 = vmatpush3.bf16.xpose.msra.mxu0 %v1684_v16  ;;  %3948 = vmatprep.mubr.msk.bf16.mxu0 %vm4420_vm3, %v4419_v45 }
 0xa8b   : > { %3958 = vmatprep.subr.bf16.mxu0 %v4419_v45 }
 0xa91   : > { %3949 = vmatmul.mubr.msk.bf16.vlgmr.msra.gmra.mrb[28].mxu0 %vm1553_vm10, %v1677_v35 }
 0xa92   : > { %3960 = vmatprep.mubr.msk.bf16.mxu0 %vm4420_vm3, %v4419_v45  ;;  %3959 = vmatpush3.bf16.msra.mxu0 %v1806_v34 }
 0xa93   : > { %3970 = vmatprep.subr.bf16.mxu0 %v4419_v45 }
 0xb5c   : > { %v1594_v17 = vpop.f32.mrb[24].mxu0 }
 0xb5d   : > { %v1601_v18 = vmul.f32 0.35355338, %v1594_v17  ;;  %v3938_v36 = vpop.f32.mrb[25].mxu0 }
 0xb5e   : > { %v1597_v19 = vpop.f32.mrb[26].mxu0 }
 0xb5f   : > { %v1602_v20 = vmul.f32 0.35355338, %v1597_v19  ;;  %v3939_v37 = vpop.f32.mrb[27].mxu0  ;;  %v1604_v38 = vsel %vm1603_vm11, %v1601_v18, -inf }
 0xb60   : > { %1605 = vmax.xlane.f32.xlu1 %v1604_v38 }
 0xb61   : > { %v1607_v39 = vsel %vm1603_vm11, %v1602_v20, -inf }
 0xb62   : > { %1608 = vmax.xlane.f32.xlu0 %v1607_v39 }
 0xb64   : > { %v1720_v40 = vpop.f32.mrb[28].mxu0 }
 0xb65   : > { %v1727_v41 = vmul.f32 0.35355338, %v1720_v40  ;;  %v3950_v23 = vpop.f32.mrb[29].mxu0 }
 0xb66   : > { %v1723_v42 = vpop.f32.mrb[30].mxu0 }
 0xb67   : > { %v1728_v43 = vmul.f32 0.35355338, %v1723_v42  ;;  %v3951_v44 = vpop.f32.mrb[31].mxu0  ;;  %v1729_v50 = vsel %vm1603_vm11, %v1727_v41, -inf }
 0xb68   : > { %1730 = vmax.xlane.f32.xlu0 %v1729_v50 }
 0xb69   : > { %v1732_v51 = vsel %vm1603_vm11, %v1728_v43, -inf }
 0xb6c   : > { %1733 = vmax.xlane.f32.xlu0 %v1732_v51 }
 0xbed   : > { %v1606_v54 = vpop.xlane.xlu1 %1605 }
 0xbee   : > { %v1610_v47 = vsub.f32 %v1601_v18, %v1606_v54 }
 0xbef   : > { %v1609_v46 = vpop.xlane.xlu0 %1608 }
 0xbf0   : > { %v1612_v49 = vmul.f32 1.442695, %v1610_v47  ;;  %v1611_v48 = vsub.f32 %v1602_v20, %v1609_v46 }
 0xbf2   : > { %4267 = vpow2.f32 %v1612_v49  ;;  %v1614_v52 = vmul.f32 1.442695, %v1611_v48 }
 0xbf4   : > { %4269 = vpow2.f32 %v1614_v52 }
 0xbf5   : > { %v1731_v53 = vpop.xlane.xlu0 %1730 }
 0xbf6   : > { %v1735_v55 = vsub.f32 %v1727_v41, %v1731_v53 }
 0xbf8   : > { %v1737_v56 = vmul.f32 1.442695, %v1735_v55 }
 0xbf9   : > { %v1734_v57 = vpop.xlane.xlu0 %1733 }
 0xbfa   : > { %4271 = vpow2.f32 %v1737_v56  ;;  %v1736_v58 = vsub.f32 %v1728_v43, %v1734_v57 }
 0xbfc   : > { %v4268_v59 = vpop.eup %4267  ;;  %v1739_v60 = vmul.f32 1.442695, %v1736_v58 }
 0xbfd   : > { %v1616_v61 = vsel %vm1603_vm11, %v4268_v59, 0.0 }
 0xbfe   : > { %v4270_v21 = vpop.eup %4269  ;;  %4273 = vpow2.f32 %v1739_v60  ;;  %1617 = vadd.xlane.f32.xlu1 %v1616_v61 }
 0xbff   : > { %v1619_v22 = vsel %vm1603_vm11, %v4270_v21, 0.0 }
 0xc00   : > { %1620 = vadd.xlane.f32.xlu0 %v1619_v22 }
 0xc04   : > { %v4272_v62 = vpop.eup %4271 }
 0xc05   : > { %v1741_v63 = vsel %vm1603_vm11, %v4272_v62, 0.0 }
 0xc06   : > { %1742 = vadd.xlane.f32.xlu1 %v1741_v63 }
 0xc08   : > { %v4274_v0 = vpop.eup %4273 }
 0xc09   : > { %v1744_v1 = vsel %vm1603_vm11, %v4274_v0, 0.0 }
 0xc0a   : > { %1745 = vadd.xlane.f32.xlu0 %v1744_v1 }
 0xc17   : > { %1627 = vrot.lane.b32.xlu1 %v4842_v31, %s4424_s8 }
 0xc1b   : > { %1898 = vrot.lane.b32.xlu1 %v4842_v31, %s4425_s9 }
 0xc1f   : > { %1896 = vrot.lane.b32.xlu1 %v4842_v31, %s4426_s13 }
 0xc20   : > { %1752 = vrot.lane.b32.xlu0 %v4842_v31, %s4427_s14 }
 0xc8b   : > { %v1618_v2 = vpop.xlane.xlu1 %1617 }
 0xc8c   : > { %4275 = vrcp.f32 %v1618_v2 }
 0xc8d   : > { %v1621_v3 = vpop.xlane.xlu0 %1620 }
 0xc8e   : > { %4277 = vrcp.f32 %v1621_v3 }
 0xc93   : > { %v1743_v4 = vpop.xlane.xlu1 %1742 }
 0xc94   : > { %4279 = vrcp.f32 %v1743_v4 }
 0xc96   : > { %v4276_v5 = vpop.eup %4275 }
 0xc97   : > { %v1628_v6 = vpop.permute.xlu1 %1627  ;;  %v1746_v7 = vpop.xlane.xlu0 %1745  ;;  %v1624_v9 = vmul.f32 %v4276_v5, %v4268_v59 }
 0xc98   : > { %v4278_v8 = vpop.eup %4277  ;;  %4281 = vrcp.f32 %v1746_v7  ;;  %3941 = vmatpush3.bf16.msra.mxu1 %v1628_v6 }
 0xc99   : > { %v1625_v10 = vmul.f32 %v4278_v8, %v4270_v21  ;;  %3952 = vmatprep.subr.bf16.mxu1 %v4419_v45 }
 0xc9b   : > { %v1753_v11 = vpop.permute.xlu0 %1752  ;;  %v1626_v12 = vpack.c.bf16 %v1625_v10, %v1624_v9  ;;  %v1899_v37 = vpop.permute.xlu1 %1898 }
 0xc9c   : > { %v1904_v41 = vsel %vm1553_vm10, %v1899_v37, 0 }
 0xc9d   : > { %3943 = vmatmul.mubr.msk.bf16.vlgmr.msra.gmra.mrb[20].mxu1 %vm1603_vm11, %v1626_v12 }
 0xc9e   : > { %3953 = vmatpush3.bf16.msra.mxu1 %v1753_v11  ;;  %3954 = vmatprep.mubr.msk.bf16.mxu1 %vm4420_vm3, %v4419_v45  ;;  %v4280_v15 = vpop.eup %4279 }
 0xc9f   : > { %3964 = vmatprep.subr.bf16.mxu1 %v4419_v45  ;;  %v1749_v25 = vmul.f32 %v4280_v15, %v4272_v62  ;;  %v1897_v23 = vpop.permute.xlu1 %1896 }
 0xca2   : > { %v4282_v24 = vpop.eup %4281 }
 0xca3   : > { %v1750_v26 = vmul.f32 %v4282_v24, %v4274_v0 }
 0xca5   : > { %v1751_v27 = vpack.c.bf16 %v1750_v26, %v1749_v25  ;;  %v1548_v26 = vld [vmem:[%s5264_s4 + $0x10] sm:$0xff] }
 0xca7   : > { %3955 = vmatmul.mubr.msk.bf16.vlgmr.msra.gmra.mrb[24].mxu1 %vm1603_vm11, %v1751_v27  ;;  %v2020_v27 = vpack.c.bf16 %v1548_v26, %v1548_v26 }
 0xca8   : > { %3966 = vmatprep.mubr.msk.bf16.mxu1 %vm4420_vm3, %v4419_v45  ;;  %3965 = vmatpush3.bf16.msra.mxu1 %v1853_v30 }
 0xca9   : > { %3976 = vmatprep.subr.bf16.mxu1 %v4419_v45  ;;  %v2025_v28 = vsel %vm1804_vm12, %v2020_v27, 0 }
 0xd70   : > { %v1667_v16 = vpop.f32.mrb[20].mxu1 }
 0xd71   : > { %v3944_v35 = vpop.f32.mrb[21].mxu1 }
 0xd72   : > { %v1670_v17 = vpop.f32.mrb[22].mxu1 }
 0xd73   : > { %v1674_v18 = vpack.c.bf16 %v1670_v17, %v1667_v16  ;;  %v3945_v36 = vpop.f32.mrb[23].mxu1 }
 0xd75   : > { %3967 = vmatmul.mubr.msk.bf16.vlgmr.msra.gmra.mrb[28].mxu1 %vm1553_vm10, %v1674_v18 }
 0xd76   : > { %3978 = vmatprep.mubr.msk.bf16.mxu1 %vm4420_vm3, %v4419_v45 }
 0xd7a   : > { %v1792_v19 = vpop.f32.mrb[24].mxu1 }
 0xd7b   : > { %v3956_v20 = vpop.f32.mrb[25].mxu1 }
 0xd7c   : > { %v1795_v38 = vpop.f32.mrb[26].mxu1 }
 0xd7d   : > { %v1799_v39 = vpack.c.bf16 %v1795_v38, %v1792_v19  ;;  %v3957_v40 = vpop.f32.mrb[27].mxu1 }
 0xd7f   : > { %3961 = vmatmul.mubr.msk.bf16.vlgmr.msra.gmra.mrb[32].mxu0 %vm1553_vm10, %v1799_v39 }
 0xd80   : > { %3971 = vmatpush3.bf16.xpose.msra.mxu0 %v1904_v41  ;;  %3972 = vmatprep.mubr.msk.bf16.mxu0 %vm4420_vm3, %v4419_v45 }
 0xd81   : > { %3982 = vmatprep.subr.bf16.mxu0 %v4419_v45 }
 0xd87   : > { %3973 = vmatmul.mubr.msk.bf16.vlgmr.msra.gmra.mrb[36].mxu0 %vm1553_vm10, %v1897_v23 }
 0xd88   : > { %3984 = vmatprep.mubr.msk.bf16.mxu0 %vm4420_vm3, %v4419_v45  ;;  %3983 = vmatpush3.bf16.msra.mxu0 %v2025_v28 }
 0xd89   : > { %3994 = vmatprep.subr.bf16.mxu0 %v4419_v45 }
 0xe48   : > { %v1889_v42 = vpop.f32.mrb[28].mxu1 }
 0xe49   : > { %v3968_v43 = vpop.f32.mrb[29].mxu1 }
 0xe4a   : > { %v1892_v44 = vpop.f32.mrb[30].mxu1 }
 0xe4b   : > { %v3969_v50 = vpop.f32.mrb[31].mxu1 }
 0xe52   : > { %v1842_v51 = vpop.f32.mrb[32].mxu0 }
 0xe53   : > { %v4906_v54 = vadd.f32 %v1889_v42, %v1842_v51  ;;  %v3962_v47 = vpop.f32.mrb[33].mxu0 }
 0xe54   : > { %v1845_v46 = vpop.f32.mrb[34].mxu0 }
 0xe55   : > { %v4908_v49 = vadd.f32 %v1892_v44, %v1845_v46  ;;  %v3963_v48 = vpop.f32.mrb[35].mxu0 }
 0xe5a   : > { %v1940_v52 = vpop.f32.mrb[36].mxu0 }
 0xe5b   : > { %v1947_v53 = vmul.f32 0.35355338, %v1940_v52  ;;  %v3974_v55 = vpop.f32.mrb[37].mxu0 }
 0xe5c   : > { %v1943_v56 = vpop.f32.mrb[38].mxu0 }
 0xe5d   : > { %v1948_v57 = vmul.f32 0.35355338, %v1943_v56  ;;  %v3975_v58 = vpop.f32.mrb[39].mxu0  ;;  %v1949_v59 = vsel %vm1603_vm11, %v1947_v53, -inf }
 0xe5e   : > { %1950 = vmax.xlane.f32.xlu1 %v1949_v59 }
 0xe5f   : > { %v1952_v60 = vsel %vm1603_vm11, %v1948_v57, -inf }
 0xe60   : > { %1953 = vmax.xlane.f32.xlu0 %v1952_v60 }
 0xe6f   : > { %1972 = vrot.lane.b32.xlu1 %v4842_v31, %s5269_s19 }
 0xe73   : > { %2070 = vrot.lane.b32.xlu1 %v4842_v31, %s5270_s20 }
 0xeeb   : > { %v1951_v61 = vpop.xlane.xlu1 %1950 }
 0xeec   : > { %v1955_v21 = vsub.f32 %v1947_v53, %v1951_v61 }
 0xeed   : > { %v1954_v22 = vpop.xlane.xlu0 %1953 }
 0xeee   : > { %v1957_v62 = vmul.f32 1.442695, %v1955_v21  ;;  %v1956_v63 = vsub.f32 %v1948_v57, %v1954_v22 }
 0xeef   : > { %v1973_v0 = vpop.permute.xlu1 %1972 }
 0xef0   : > { %4283 = vpow2.f32 %v1957_v62  ;;  %v1959_v1 = vmul.f32 1.442695, %v1956_v63  ;;  %3977 = vmatpush3.bf16.msra.mxu1 %v1973_v0 }
 0xef1   : > { %3988 = vmatprep.subr.bf16.mxu1 %v4419_v45 }
 0xef2   : > { %4285 = vpow2.f32 %v1959_v1 }
 0xef3   : > { %v2071_v25 = vpop.permute.xlu1 %2070 }
 0xefa   : > { %v4284_v2 = vpop.eup %4283 }
 0xefb   : > { %v1961_v3 = vsel %vm1603_vm11, %v4284_v2, 0.0 }
 0xefc   : > { %v4286_v4 = vpop.eup %4285  ;;  %1962 = vadd.xlane.f32.xlu0 %v1961_v3 }
 0xefd   : > { %v1964_v5 = vsel %vm1603_vm11, %v4286_v4, 0.0 }
 0xf00   : > { %1965 = vadd.xlane.f32.xlu0 %v1964_v5 }
 0xf16   : > { %2072 = vrot.lane.b32.xlu0 %v4842_v31, %s5271_s21  ;;  %s5277_s21 = smov 40  }
 0xf89   : > { %v1963_v6 = vpop.xlane.xlu0 %1962 }
 0xf8a   : > { %4287 = vrcp.f32 %v1963_v6 }
 0xf8d   : > { %v1966_v7 = vpop.xlane.xlu0 %1965 }
 0xf8e   : > { %4289 = vrcp.f32 %v1966_v7  ;;  %v3667_v7 = vld [vmem:[%s5262_s2 + $0x9] ss:$0 sm:$0xff] }
 0xf91   : > { %v2073_v12 = vpop.permute.xlu0 %2072 }
 0xf92   : > { %v2078_v24 = vsel %vm1553_vm10, %v2073_v12, 0 }
 0xf94   : > { %v4288_v8 = vpop.eup %4287 }
 0xf95   : > { %v1969_v10 = vmul.f32 %v4288_v8, %v4284_v2 }
 0xf98   : > { %v4290_v9 = vpop.eup %4289 }
 0xf99   : > { %v1970_v11 = vmul.f32 %v4290_v9, %v4286_v4 }
 0xf9b   : > { %v1971_v15 = vpack.c.bf16 %v1970_v11, %v1969_v10 }
 0xf9d   : > { %3979 = vmatmul.mubr.msk.bf16.vlgmr.msra.gmra.mrb[32].mxu1 %vm1603_vm11, %v1971_v15 }
 0xf9e   : > { %3989 = vmatpush3.bf16.xpose.msra.mxu1 %v2078_v24  ;;  %3990 = vmatprep.mubr.msk.bf16.mxu1 %vm4420_vm3, %v4419_v45 }
 0xf9f   : > { %4000 = vmatprep.subr.bf16.mxu1 %v4419_v45 }
 0xfa5   : > { %3991 = vmatmul.mubr.msk.bf16.vlgmr.msra.gmra.mrb[36].mxu1 %vm1553_vm10, %v2071_v25 }
 0xfa6   : > { %4002 = vmatprep.mubr.msk.bf16.mxu1 %vm4420_vm3, %v4419_v45 }
0x1070   : > { %v2012_v29 = vpop.f32.mrb[32].mxu1 }
0x1071   : > { %v3980_v30 = vpop.f32.mrb[33].mxu1 }
0x1072   : > { %v2015_v32 = vpop.f32.mrb[34].mxu1 }
0x1073   : > { %v2019_v33 = vpack.c.bf16 %v2015_v32, %v2012_v29  ;;  %v3981_v34 = vpop.f32.mrb[35].mxu1 }
0x1075   : > { %3985 = vmatmul.mubr.msk.bf16.vlgmr.msra.gmra.mrb[40].mxu0 %vm1553_vm10, %v2019_v33 }
0x1076   : > { %3996 = vmatprep.mubr.msk.bf16.mxu0 %vm4420_vm3, %v4419_v45 }
0x1078   : > { %v2114_v16 = vpop.f32.mrb[36].mxu1 }
0x1079   : > { %v2121_v35 = vmul.f32 0.35355338, %v2114_v16  ;;  %v3992_v17 = vpop.f32.mrb[37].mxu1  ;;  %v4209_v16 = vld [vmem:[%s5265_s5] sm:$0xff]  }
0x107a   : > { %v2117_v18 = vpop.f32.mrb[38].mxu1 }
0x107b   : > { %v2122_v36 = vmul.f32 0.35355338, %v2117_v18  ;;  %v3993_v19 = vpop.f32.mrb[39].mxu1  ;;  %v2123_v20 = vsel %vm1603_vm11, %v2121_v35, -inf }
0x107c   : > { %2124 = vmax.xlane.f32.xlu1 %v2123_v20 }
0x107d   : > { %v2126_v37 = vsel %vm1603_vm11, %v2122_v36, -inf }
0x107e   : > { %2127 = vmax.xlane.f32.xlu0 %v2126_v37 }
0x1109   : > { %v2125_v38 = vpop.xlane.xlu1 %2124 }
0x110a   : > { %v2129_v39 = vsub.f32 %v2121_v35, %v2125_v38  ;;  %v4210_v35 = vld [vmem:[%s5265_s5 + $0x8] sm:$0xff]  }
0x110b   : > { %v2128_v40 = vpop.xlane.xlu0 %2127 }
0x110c   : > { %v2131_v41 = vmul.f32 1.442695, %v2129_v39  ;;  %v2130_v23 = vsub.f32 %v2122_v36, %v2128_v40  ;;  %v3668_v40 = vld [vmem:[%s5262_s2 + $0xa] ss:$0 sm:$0xff] }
0x110e   : > { %4291 = vpow2.f32 %v2131_v41  ;;  %v2133_v42 = vmul.f32 1.442695, %v2130_v23 }
0x1110   : > { %4293 = vpow2.f32 %v2133_v42 }
0x1118   : > { %v4292_v43 = vpop.eup %4291 }
0x1119   : > { %v2135_v44 = vsel %vm1603_vm11, %v4292_v43, 0.0 }
0x111a   : > { %v4294_v50 = vpop.eup %4293  ;;  %2136 = vadd.xlane.f32.xlu0 %v2135_v44 }
0x111b   : > { %v2138_v51 = vsel %vm1603_vm11, %v4294_v50, 0.0 }
0x111c   : > { %2139 = vadd.xlane.f32.xlu1 %v2138_v51 }
0x1130   : > { %2146 = vrot.lane.b32.xlu0 %v4842_v31, %s5268_s17 }
0x1148   : > { %v2061_v47 = vpop.f32.mrb[40].mxu0 }
0x1149   : > { %v2068_v46 = vadd.f32 %v2061_v47, %v4906_v54  ;;  %v3986_v48 = vpop.f32.mrb[41].mxu0  ;;  %v1549_v54 = vld [vmem:[%s5264_s4 + $0x18] sm:$0xff] }
0x114a   : > { %v2064_v52 = vpop.f32.mrb[42].mxu0  ;;  %v4212_v48 = vld [vmem:[%s5266_s6 + $0x8] sm:$0xff]  }
0x114b   : > { %v2069_v53 = vadd.f32 %v2064_v52, %v4908_v49  ;;  %v3987_v55 = vpop.f32.mrb[43].mxu0  ;;  %v2194_v49 = vpack.c.bf16 %v1549_v54, %v1549_v54  ;;  %v4213_v52 = vld [vmem:[%s5266_s6 + $0x10] sm:$0xff]  }
0x114c   : > { %v3670_v55 = vld [vmem:[%s5262_s2 + $0xc] ss:$0 sm:$0xff] }
0x114d   : > { %v2199_v22 = vsel %vm1804_vm12, %v2194_v49, 0 }
0x114e   : > { %4001 = vmatpush3.bf16.msra.mxu1 %v2199_v22 }
0x114f   : > { %4014 = vmatprep.subr.bf16.mxu1 %v4419_v45 }
0x11a7   : > { %v2137_v56 = vpop.xlane.xlu0 %2136 }
0x11a8   : > { %4295 = vrcp.f32 %v2137_v56 }
0x11a9   : > { %v2140_v57 = vpop.xlane.xlu1 %2139 }
0x11aa   : > { %4297 = vrcp.f32 %v2140_v57 }
0x11ab   : > { %v2147_v58 = vpop.permute.xlu0 %2146 }
0x11ac   : > { %3995 = vmatpush3.bf16.msra.mxu0 %v2147_v58 }
0x11ad   : > { %4006 = vmatprep.subr.bf16.mxu0 %v4419_v45 }
0x11b2   : > { %v4296_v59 = vpop.eup %4295 }
0x11b3   : > { %v2143_v61 = vmul.f32 %v4296_v59, %v4292_v43  ;;  %v3669_v43 = vld [vmem:[%s5262_s2 + $0xb] ss:$0 sm:$0xff] }
0x11b4   : > { %v4298_v60 = vpop.eup %4297 }
0x11b5   : > { %v2144_v31 = vmul.f32 %v4298_v60, %v4294_v50 }
0x11b7   : > { %v2145_v21 = vpack.c.bf16 %v2144_v31, %v2143_v61 }
0x11b9   : > { %3997 = vmatmul.mubr.msk.bf16.vlgmr.msra.gmra.mrb[44].mxu0 %vm1603_vm11, %v2145_v21 }
0x11ba   : > { %4010 = vmatprep.mubr.msk.bf16.mxu0 %vm4420_vm3, %v4419_v45  ;;  %4007 = vmatpush3.bf16.msra.mxu0 %v4209_v16 }
0x11bb   : > { %4008 = vmatprep.subr.bf16.mxu0 %v4419_v45 }
0x11be   : > { %4009 = vmatpush3.bf16.msra.mxu0 %v4210_v35 }
0x11bf   : > { %4026 = vmatprep.subr.bf16.mxu0 %v4419_v45 }
0x128c   : > { %v2186_v62 = vpop.f32.mrb[44].mxu0 }
0x128d   : > { %v3998_v63 = vpop.f32.mrb[45].mxu0 }
0x128e   : > { %v2189_v0 = vpop.f32.mrb[46].mxu0 }
0x128f   : > { %v2193_v1 = vpack.c.bf16 %v2189_v0, %v2186_v62  ;;  %v3999_v2 = vpop.f32.mrb[47].mxu0 }
0x1291   : > { %4003 = vmatmul.mubr.msk.bf16.vlgmr.msra.gmra.mrb[40].mxu1 %vm1553_vm10, %v2193_v1 }
0x1292   : > { %4022 = vmatprep.mubr.msk.bf16.mxu1 %vm4420_vm3, %v4419_v45 }
0x1364   : > { %v2235_v3 = vpop.f32.mrb[40].mxu1 }
0x1365   : > { %v2242_v4 = vadd.f32 %v2235_v3, %v2068_v46  ;;  %v4004_v5 = vpop.f32.mrb[41].mxu1  ;;  %v4211_v46 = vld [vmem:[%s5266_s6] sm:$0xff]  }
0x1366   : > { %v2238_v6 = vpop.f32.mrb[42].mxu1  ;;  %4015 = vmatpush3.bf16.msra.mxu1 %v4211_v46 }
0x1367   : > { %v2244_v8 = vadd.f32 %v2242_v4, %v4830_v13  ;;  %v2243_v9 = vadd.f32 %v2238_v6, %v2069_v53  ;;  %v4005_v10 = vpop.f32.mrb[43].mxu1  ;;  %4016 = vmatprep.subr.bf16.mxu1 %v4419_v45  ;;  %v4214_v53 = vld [vmem:[%s5266_s6 + $0x18] sm:$0xff]  }
0x1369   : > { %v2245_v11 = vadd.f32 %v2243_v9, %v4832_v14  ;;  %v2251_v12 = vadd.f32 %v3667_v7, %v2244_v8 }
0x136a   : > { %4017 = vmatpush3.bf16.msra.mxu1 %v4212_v48 }
0x136b   : > { %v2255_v15 = vsel %vm493_vm2, %v2251_v12, 0.0  ;;  %v2252_v24 = vadd.f32 %v3667_v7, %v2245_v11  ;;  %4018 = vmatprep.subr.bf16.mxu1 %v4419_v45 }
0x136c   : > { %2256 = vadd.xlane.f32.xlu1 %v2255_v15 }
0x136d   : > { %v2258_v25 = vsel %vm493_vm2, %v2252_v24, 0.0 }
0x136e   : > { %4019 = vmatpush3.bf16.msra.mxu1 %v4213_v52  ;;  %v3681_v52 = vld [vmem:[%s5262_s2 + $0xf] ss:$0 sm:$0xff] }
0x136f   : > { %4020 = vmatprep.subr.bf16.mxu1 %v4419_v45 }
0x1370   : > { %2259 = vadd.xlane.f32.xlu1 %v2258_v25 }
0x1372   : > { %4021 = vmatpush3.bf16.msra.mxu1 %v4214_v53 }
0x1373   : > { %4040 = vmatprep.subr.bf16.mxu1 %v4419_v45 }
0x13f9   : > { %v2257_v26 = vpop.xlane.xlu1 %2256 }
0x13fa   : > { %v2261_v27 = vmul.f32 0.03125, %v2257_v26 }
0x13fc   : > { %v2263_v28 = vsub.f32 %v2251_v12, %v2261_v27  ;;  %v3674_v12 = vld [vmem:[%s5262_s2 + $0xd] ss:$0 sm:$0xff] }
0x13fd   : > { %v2260_v29 = vpop.xlane.xlu1 %2259 }
0x13fe   : > { %v2262_v30 = vmul.f32 0.03125, %v2260_v29  ;;  %v2265_v32 = vmul.f32 %v2263_v28, %v2263_v28 }
0x1400   : > { %v2264_v33 = vsub.f32 %v2252_v24, %v2262_v30  ;;  %v2267_v13 = vsel %vm493_vm2, %v2265_v32, 0.0 }
0x1401   : > { %2268 = vadd.xlane.f32.xlu1 %v2267_v13 }
0x1402   : > { %v2266_v34 = vmul.f32 %v2264_v33, %v2264_v33 }
0x1404   : > { %v2270_v14 = vsel %vm493_vm2, %v2266_v34, 0.0 }
0x1405   : > { %2271 = vadd.xlane.f32.xlu1 %v2270_v14 }
0x148e   : > { %v2269_v17 = vpop.xlane.xlu1 %2268 }
0x148f   : > { %v2273_v18 = vmul.f32 0.03125, %v2269_v17 }
0x1491   : > { %v2275_v36 = vadd.f32 1e-05, %v2273_v18 }
0x1492   : > { %v2272_v19 = vpop.xlane.xlu1 %2271 }
0x1493   : > { %4299 = vrsqrt.f32 %v2275_v36  ;;  %v2274_v20 = vmul.f32 0.03125, %v2272_v19 }
0x1495   : > { %v2276_v37 = vadd.f32 1e-05, %v2274_v20 }
0x1497   : > { %4301 = vrsqrt.f32 %v2276_v37  ;;  %v4215_v37 = vld [vmem:[%s5263_s3 + $0x10] sm:$0xff]  }
0x149d   : > { %v4300_v38 = vpop.eup %4299 }
0x149e   : > { %v2279_v39 = vmul.f32 %v4300_v38, %v2263_v28  ;;  %v4216_v38 = vld [vmem:[%s5263_s3 + $0x18] sm:$0xff]  }
0x14a0   : > { %v2285_v23 = vmul.f32 %v3668_v40, %v2279_v39 }
0x14a1   : > { %v4302_v41 = vpop.eup %4301 }
0x14a2   : > { %v2280_v42 = vmul.f32 %v4302_v41, %v2264_v33  ;;  %v2291_v50 = vadd.f32 %v3669_v43, %v2285_v23 }
0x14a4   : > { %v2286_v44 = vmul.f32 %v3668_v40, %v2280_v42 }
0x14a6   : > { %v2292_v51 = vadd.f32 %v3669_v43, %v2286_v44 }
0x14a8   : > { %v2297_v47 = vpack.c.bf16 %v2292_v51, %v2291_v50 }
0x14aa   : > { %4011 = vmatmul.mubr.msk.bf16.vlgmr.msra.gmra.mrb[48].mxu0 %vm493_vm2, %v2297_v47 }
0x14ab   : > { %4030 = vmatprep.mubr.msk.bf16.mxu0 %vm4420_vm3, %v4419_v45  ;;  %4027 = vmatpush3.bf16.msra.mxu0 %v4215_v37 }
0x14ac   : > { %4028 = vmatprep.subr.bf16.mxu0 %v4419_v45 }
0x14af   : > { %4029 = vmatpush3.bf16.msra.mxu0 %v4216_v38 }
0x14b0   : > { %4034 = vmatprep.subr.bf16.mxu0 %v4419_v45 }
0x157d   : > { %v2352_v56 = vpop.f32.mrb[48].mxu0 }
0x157e   : > { %v2353_v57 = vadd.f32 %v3670_v55, %v2352_v56  ;;  %v4012_v58 = vpop.f32.mrb[49].mxu0 }
0x157f   : > { %v2355_v59 = vpop.f32.mrb[50].mxu0  ;;  %v3686_v58 = vld [vmem:[%s5262_s2 + $0x10] ss:$0 sm:$0xff] }
0x1580   : > { %v2359_v60 = vmul.f32 %v2353_v57, %v2353_v57  ;;  %v2356_v61 = vadd.f32 %v3670_v55, %v2355_v59  ;;  %v4013_v31 = vpop.f32.mrb[51].mxu0 }
0x1582   : > { %v2361_v21 = vmul.f32 %v2359_v60, %v2353_v57  ;;  %v2360_v54 = vmul.f32 %v2356_v61, %v2356_v61 }
0x1584   : > { %v2363_v49 = vmul.f32 0.044715, %v2361_v21  ;;  %v2362_v22 = vmul.f32 %v2360_v54, %v2356_v61 }
0x1586   : > { %v2365_v62 = vadd.f32 %v2363_v49, %v2353_v57  ;;  %v2364_v63 = vmul.f32 0.044715, %v2362_v22 }
0x1588   : > { %v2367_v0 = vmul.f32 0.7978846, %v2365_v62  ;;  %v2366_v1 = vadd.f32 %v2364_v63, %v2356_v61 }
0x158a   : > { %4303 = vtanh.f32 %v2367_v0  ;;  %v2368_v2 = vmul.f32 0.7978846, %v2366_v1 }
0x158c   : > { %4305 = vtanh.f32 %v2368_v2 }
0x1594   : > { %v4304_v3 = vpop.eup %4303 }
0x1595   : > { %v2371_v4 = vadd.f32 1.0, %v4304_v3 }
0x1596   : > { %v4306_v5 = vpop.eup %4305 }
0x1597   : > { %v2373_v6 = vmul.f32 0.5, %v2371_v4  ;;  %v2372_v7 = vadd.f32 1.0, %v4306_v5 }
0x1599   : > { %v2374_v8 = vmul.f32 0.5, %v2372_v7  ;;  %v2375_v9 = vmul.f32 %v2373_v6, %v2353_v57 }
0x159b   : > { %v2376_v10 = vmul.f32 %v2374_v8, %v2356_v61 }
0x159d   : > { %v2385_v11 = vpack.c.bf16 %v2376_v10, %v2375_v9 }
0x159f   : > { %4023 = vmatmul.mubr.msk.bf16.vlgmr.msra.gmra.mrb[44].mxu1 %vm2415_vm13, %v2385_v11 }
0x15a0   : > { %4042 = vmatprep.mubr.msk.bf16.mxu1 %vm4420_vm3, %v4419_v45 }
0x1672   : > { %v2453_v15 = vpop.f32.mrb[44].mxu1 }
0x1673   : > { %v2454_v24 = vadd.f32 %v3674_v12, %v2453_v15  ;;  %v4024_v25 = vpop.f32.mrb[45].mxu1 }
0x1674   : > { %v2456_v26 = vpop.f32.mrb[46].mxu1 }
0x1675   : > { %v2457_v27 = vadd.f32 %v3674_v12, %v2456_v26  ;;  %v4025_v28 = vpop.f32.mrb[47].mxu1  ;;  %v2460_v29 = vadd.f32 %v2454_v24, %v2291_v50 }
0x1677   : > { %v2464_v30 = vsel %vm493_vm2, %v2460_v29, 0.0  ;;  %v2461_v32 = vadd.f32 %v2457_v27, %v2292_v51  ;;  %v3680_v51 = vld [vmem:[%s5262_s2 + $0xe] ss:$0 sm:$0xff] }
0x1678   : > { %2465 = vadd.xlane.f32.xlu1 %v2464_v30 }
0x1679   : > { %v2467_v33 = vsel %vm493_vm2, %v2461_v32, 0.0 }
0x167c   : > { %2468 = vadd.xlane.f32.xlu1 %v2467_v33 }
0x1705   : > { %v2466_v13 = vpop.xlane.xlu1 %2465 }
0x1706   : > { %v2470_v34 = vmul.f32 0.03125, %v2466_v13 }
0x1708   : > { %v2472_v14 = vsub.f32 %v2460_v29, %v2470_v34 }
0x1709   : > { %v2469_v16 = vpop.xlane.xlu1 %2468 }
0x170a   : > { %v2471_v35 = vmul.f32 0.03125, %v2469_v16  ;;  %v2474_v17 = vmul.f32 %v2472_v14, %v2472_v14 }
0x170c   : > { %v2473_v18 = vsub.f32 %v2461_v32, %v2471_v35  ;;  %v2476_v36 = vsel %vm493_vm2, %v2474_v17, 0.0 }
0x170d   : > { %2477 = vadd.xlane.f32.xlu0 %v2476_v36 }
0x170e   : > { %v2475_v19 = vmul.f32 %v2473_v18, %v2473_v18 }
0x1710   : > { %v2479_v20 = vsel %vm493_vm2, %v2475_v19, 0.0 }
0x1711   : > { %2480 = vadd.xlane.f32.xlu1 %v2479_v20 }
0x179a   : > { %v2478_v39 = vpop.xlane.xlu0 %2477 }
0x179b   : > { %v2482_v40 = vmul.f32 0.03125, %v2478_v39 }
0x179d   : > { %v2484_v41 = vadd.f32 1e-05, %v2482_v40 }
0x179e   : > { %v2481_v23 = vpop.xlane.xlu1 %2480 }
0x179f   : > { %4307 = vrsqrt.f32 %v2484_v41  ;;  %v2483_v42 = vmul.f32 0.03125, %v2481_v23 }
0x17a1   : > { %v2485_v43 = vadd.f32 1e-05, %v2483_v42 }
0x17a3   : > { %4309 = vrsqrt.f32 %v2485_v43 }
0x17a9   : > { %v4308_v44 = vpop.eup %4307 }
0x17aa   : > { %v2488_v50 = vmul.f32 %v4308_v44, %v2472_v14 }
0x17ac   : > { %v2494_v46 = vmul.f32 %v3680_v51, %v2488_v50 }
0x17ad   : > { %v4310_v47 = vpop.eup %4309 }
0x17ae   : > { %v2489_v48 = vmul.f32 %v4310_v47, %v2473_v18  ;;  %v5026_v55 = vadd.f32 %v3681_v52, %v2494_v46 }
0x17b0   : > { %v2495_v53 = vmul.f32 %v3680_v51, %v2489_v48 }
0x17b2   : > { %v5028_v56 = vadd.f32 %v3681_v52, %v2495_v53 }
0x17b4   : > { %v2507_v57 = vpack.c.bf16 %v5028_v56, %v5026_v55 }
0x17b6   : > { %4031 = vmatmul.mubr.msk.bf16.vlgmr.msra.gmra.mrb[52].mxu0 %vm493_vm2, %v2507_v57 }
0x17b7   : > { %4036 = vmatprep.mubr.msk.bf16.mxu0 %vm4420_vm3, %v4419_v45 }
0x1889   : > { %v2562_v59 = vpop.f32.mrb[52].mxu0 }
0x188a   : > { %v4032_v60 = vpop.f32.mrb[53].mxu0  ;;  %v2563_v31 = vadd.f32 %v3686_v58, %v2562_v59 }
0x188b   : > { %v2565_v61 = vpop.f32.mrb[54].mxu0 }
0x188c   : > { %v2566_v21 = vadd.f32 %v3686_v58, %v2565_v61  ;;  %v4033_v54 = vpop.f32.mrb[55].mxu0 }
0x188d   : > { %v3691_v54 = vld [vmem:[%s5264_s4 + $0x28] sm:$0xff] }
0x188e   : > { %v5038_v49 = vpack.c.bf16 %v2566_v21, %v2563_v31  ;;  %v3690_v31 = vld [vmem:[%s5264_s4 + $0x20] sm:$0xff] }
0x188f   : > { %v2698_v21 = vpack.c.bf16 %v3690_v31, %v3690_v31 }
0x1890   : > { %2576 = vrot.lane.b32.xlu1 %v5038_v49, %s4422_s23 }
0x1894   : > { %2701 = vrot.lane.b32.xlu1 %v5038_v49, %s4421_s22 }
0x1898   : > { %2699 = vrot.lane.b32.xlu1 %v5038_v49, %s4423_s29 }
0x1902   : > { %v2577_v22 = vpop.permute.xlu1 %2576 }
0x1903   : > { %v2582_v62 = vsel %vm1553_vm10, %v2577_v22, 0  ;;  %v2875_v22 = vsel %vm1804_vm12, %v2698_v21, 0 }
0x1904   : > { %4035 = vmatpush3.bf16.xpose.msra.mxu0 %v2582_v62  ;;  %v2823_v62 = vpack.c.bf16 %v3691_v54, %v3691_v54 }
0x1905   : > { %4046 = vmatprep.subr.bf16.mxu0 %v4419_v45 }
0x1906   : > { %v2702_v63 = vpop.permute.xlu1 %2701 }
0x1907   : > { %v2707_v0 = vsel %vm1553_vm10, %v2702_v63, 0  ;;  %v2828_v63 = vsel %vm1804_vm12, %v2823_v62, 0 }
0x190a   : > { %v2700_v1 = vpop.permute.xlu1 %2699 }
0x190b   : > { %4037 = vmatmul.mubr.msk.bf16.vlgmr.msra.gmra.mrb[56].mxu0 %vm1553_vm10, %v5038_v49 }
0x190c   : > { %4047 = vmatpush3.bf16.xpose.msra.mxu0 %v2707_v0  ;;  %4048 = vmatprep.mubr.msk.bf16.mxu0 %vm4420_vm3, %v4419_v45 }
0x190d   : > { %4058 = vmatprep.subr.bf16.mxu0 %v4419_v45 }
0x1913   : > { %4049 = vmatmul.mubr.msk.bf16.vlgmr.msra.gmra.mrb[60].mxu0 %vm1553_vm10, %v2700_v1 }
0x1914   : > { %4060 = vmatprep.mubr.msk.bf16.mxu0 %vm4420_vm3, %v4419_v45  ;;  %4059 = vmatpush3.bf16.msra.mxu0 %v2828_v63 }
0x1915   : > { %4070 = vmatprep.subr.bf16.mxu0 %v4419_v45 }
0x19de   : > { %v2618_v2 = vpop.f32.mrb[56].mxu0 }
0x19df   : > { %v2625_v3 = vmul.f32 0.35355338, %v2618_v2  ;;  %v4038_v4 = vpop.f32.mrb[57].mxu0 }
0x19e0   : > { %v2621_v5 = vpop.f32.mrb[58].mxu0 }
0x19e1   : > { %v2626_v6 = vmul.f32 0.35355338, %v2621_v5  ;;  %v4039_v7 = vpop.f32.mrb[59].mxu0  ;;  %v2627_v8 = vsel %vm1603_vm11, %v2625_v3, -inf }
0x19e2   : > { %2628 = vmax.xlane.f32.xlu0 %v2627_v8 }
0x19e3   : > { %v2630_v9 = vsel %vm1603_vm11, %v2626_v6, -inf }
0x19e4   : > { %2631 = vmax.xlane.f32.xlu1 %v2630_v9 }
0x19e6   : > { %v2743_v10 = vpop.f32.mrb[60].mxu0 }
0x19e7   : > { %v2750_v11 = vmul.f32 0.35355338, %v2743_v10  ;;  %v4050_v12 = vpop.f32.mrb[61].mxu0 }
0x19e8   : > { %v2746_v15 = vpop.f32.mrb[62].mxu0 }
0x19e9   : > { %v2751_v24 = vmul.f32 0.35355338, %v2746_v15  ;;  %v4051_v25 = vpop.f32.mrb[63].mxu0  ;;  %v2752_v26 = vsel %vm1603_vm11, %v2750_v11, -inf }
0x19ea   : > { %2753 = vmax.xlane.f32.xlu0 %v2752_v26 }
0x19eb   : > { %v2755_v27 = vsel %vm1603_vm11, %v2751_v24, -inf }
0x19ee   : > { %2756 = vmax.xlane.f32.xlu0 %v2755_v27 }
0x19f5   : > { %2775 = vrot.lane.b32.xlu1 %v5038_v49, %s4427_s14  ;;  %s5276_s14 = smov 48  }
0x19f9   : > { %2918 = vrot.lane.b32.xlu1 %v5038_v49, %s4426_s13  ;;  %s5275_s13 = smov 104  }
0x1a6f   : > { %v2629_v28 = vpop.xlane.xlu0 %2628 }
0x1a70   : > { %v2633_v29 = vsub.f32 %v2625_v3, %v2629_v28 }
0x1a71   : > { %v2632_v30 = vpop.xlane.xlu1 %2631 }
0x1a72   : > { %v2635_v32 = vmul.f32 1.442695, %v2633_v29  ;;  %v2634_v33 = vsub.f32 %v2626_v6, %v2632_v30 }
0x1a74   : > { %4311 = vpow2.f32 %v2635_v32  ;;  %v2637_v13 = vmul.f32 1.442695, %v2634_v33 }
0x1a75   : > { %v2776_v53 = vpop.permute.xlu1 %2775 }
0x1a76   : > { %4313 = vpow2.f32 %v2637_v13 }
0x1a77   : > { %v2754_v34 = vpop.xlane.xlu0 %2753 }
0x1a78   : > { %v2758_v14 = vsub.f32 %v2750_v11, %v2754_v34 }
0x1a79   : > { %v2919_v12 = vpop.permute.xlu1 %2918 }
0x1a7a   : > { %v2760_v16 = vmul.f32 1.442695, %v2758_v14 }
0x1a7b   : > { %v2757_v35 = vpop.xlane.xlu0 %2756 }
0x1a7c   : > { %4315 = vpow2.f32 %v2760_v16  ;;  %v2759_v17 = vsub.f32 %v2751_v24, %v2757_v35 }
0x1a7e   : > { %v4312_v18 = vpop.eup %4311  ;;  %v2762_v36 = vmul.f32 1.442695, %v2759_v17 }
0x1a7f   : > { %v2639_v19 = vsel %vm1603_vm11, %v4312_v18, 0.0 }
0x1a80   : > { %v4314_v20 = vpop.eup %4313  ;;  %4317 = vpow2.f32 %v2762_v36  ;;  %2640 = vadd.xlane.f32.xlu0 %v2639_v19 }
0x1a81   : > { %v2642_v37 = vsel %vm1603_vm11, %v4314_v20, 0.0 }
0x1a84   : > { %2643 = vadd.xlane.f32.xlu0 %v2642_v37 }
0x1a86   : > { %v4316_v38 = vpop.eup %4315 }
0x1a87   : > { %v2764_v39 = vsel %vm1603_vm11, %v4316_v38, 0.0 }
0x1a88   : > { %2765 = vadd.xlane.f32.xlu0 %v2764_v39 }
0x1a8a   : > { %v4318_v40 = vpop.eup %4317 }
0x1a8b   : > { %v2767_v41 = vsel %vm1603_vm11, %v4318_v40, 0.0 }
0x1a8c   : > { %2768 = vadd.xlane.f32.xlu0 %v2767_v41 }
0x1aa2   : > { %2650 = vrot.lane.b32.xlu0 %v5038_v49, %s4424_s8  ;;  %s5214_s8 = scalar_lea.hbm %s5267_s7, %s3739_s18 }
0x1aa6   : > { %2920 = vrot.lane.b32.xlu0 %v5038_v49, %s4425_s9  ;;  %s5274_s9 = smov 72  }
0x1b0d   : > { %v2641_v23 = vpop.xlane.xlu0 %2640 }
0x1b0e   : > { %4319 = vrcp.f32 %v2641_v23 }
0x1b11   : > { %v2644_v42 = vpop.xlane.xlu0 %2643 }
0x1b12   : > { %4321 = vrcp.f32 %v2644_v42 }
0x1b15   : > { %v2766_v43 = vpop.xlane.xlu0 %2765 }
0x1b16   : > { %4323 = vrcp.f32 %v2766_v43 }
0x1b18   : > { %v4320_v50 = vpop.eup %4319 }
0x1b19   : > { %v2769_v44 = vpop.xlane.xlu0 %2768  ;;  %v2647_v47 = vmul.f32 %v4320_v50, %v4312_v18 }
0x1b1a   : > { %4325 = vrcp.f32 %v2769_v44 }
0x1b1c   : > { %v4322_v51 = vpop.eup %4321 }
0x1b1d   : > { %v2648_v46 = vmul.f32 %v4322_v51, %v4314_v20  ;;  %v2651_v48 = vpop.permute.xlu0 %2650 }
0x1b1e   : > { %4041 = vmatpush3.bf16.msra.mxu1 %v2651_v48 }
0x1b1f   : > { %v2649_v52 = vpack.c.bf16 %v2648_v46, %v2647_v47  ;;  %4052 = vmatprep.subr.bf16.mxu1 %v4419_v45 }
0x1b20   : > { %v4324_v57 = vpop.eup %4323 }
0x1b21   : > { %4043 = vmatmul.mubr.msk.bf16.vlgmr.msra.gmra.mrb[48].mxu1 %vm1603_vm11, %v2649_v52  ;;  %v2772_v59 = vmul.f32 %v4324_v57, %v4316_v38  ;;  %v2921_v7 = vpop.permute.xlu0 %2920 }
0x1b22   : > { %4053 = vmatpush3.bf16.msra.mxu1 %v2776_v53  ;;  %4054 = vmatprep.mubr.msk.bf16.mxu1 %vm4420_vm3, %v4419_v45  ;;  %v2926_v11 = vsel %vm1553_vm10, %v2921_v7, 0 }
0x1b23   : > { %4064 = vmatprep.subr.bf16.mxu1 %v4419_v45 }
0x1b24   : > { %v4326_v58 = vpop.eup %4325 }
0x1b25   : > { %v2773_v60 = vmul.f32 %v4326_v58, %v4318_v40 }
0x1b27   : > { %v2774_v61 = vpack.c.bf16 %v2773_v60, %v2772_v59  ;;  %v3692_v60 = vld [vmem:[%s5264_s4 + $0x30] sm:$0xff] }
0x1b29   : > { %4055 = vmatmul.mubr.msk.bf16.vlgmr.msra.gmra.mrb[52].mxu1 %vm1603_vm11, %v2774_v61  ;;  %v3042_v61 = vpack.c.bf16 %v3692_v60, %v3692_v60 }
0x1b2a   : > { %4066 = vmatprep.mubr.msk.bf16.mxu1 %vm4420_vm3, %v4419_v45  ;;  %4065 = vmatpush3.bf16.msra.mxu1 %v2875_v22 }
0x1b2b   : > { %4076 = vmatprep.subr.bf16.mxu1 %v4419_v45  ;;  %v3047_v31 = vsel %vm1804_vm12, %v3042_v61, 0 }
0x1bf4   : > { %v2690_v0 = vpop.f32.mrb[48].mxu1 }
0x1bf5   : > { %v4044_v1 = vpop.f32.mrb[49].mxu1 }
0x1bf6   : > { %v2693_v2 = vpop.f32.mrb[50].mxu1 }
0x1bf7   : > { %v2697_v3 = vpack.c.bf16 %v2693_v2, %v2690_v0  ;;  %v4045_v4 = vpop.f32.mrb[51].mxu1 }
0x1bf9   : > { %4067 = vmatmul.mubr.msk.bf16.vlgmr.msra.gmra.mrb[56].mxu1 %vm1553_vm10, %v2697_v3 }
0x1bfa   : > { %4078 = vmatprep.mubr.msk.bf16.mxu1 %vm4420_vm3, %v4419_v45 }
0x1bfc   : > { %v2815_v5 = vpop.f32.mrb[52].mxu1 }
0x1bfd   : > { %v4056_v6 = vpop.f32.mrb[53].mxu1 }
0x1bfe   : > { %v2818_v8 = vpop.f32.mrb[54].mxu1 }
0x1bff   : > { %v2822_v9 = vpack.c.bf16 %v2818_v8, %v2815_v5  ;;  %v4057_v10 = vpop.f32.mrb[55].mxu1 }
0x1c01   : > { %4061 = vmatmul.mubr.msk.bf16.vlgmr.msra.gmra.mrb[64].mxu0 %vm1553_vm10, %v2822_v9 }
0x1c02   : > { %4071 = vmatpush3.bf16.xpose.msra.mxu0 %v2926_v11  ;;  %4072 = vmatprep.mubr.msk.bf16.mxu0 %vm4420_vm3, %v4419_v45 }
0x1c03   : > { %4082 = vmatprep.subr.bf16.mxu0 %v4419_v45 }
0x1c09   : > { %4073 = vmatmul.mubr.msk.bf16.vlgmr.msra.gmra.mrb[68].mxu0 %vm1553_vm10, %v2919_v12 }
0x1c0a   : > { %4084 = vmatprep.mubr.msk.bf16.mxu0 %vm4420_vm3, %v4419_v45  ;;  %4083 = vmatpush3.bf16.msra.mxu0 %v3047_v31 }
0x1c0b   : > { %4094 = vmatprep.subr.bf16.mxu0 %v4419_v45 }
0x1ccc   : > { %v2911_v15 = vpop.f32.mrb[56].mxu1 }
0x1ccd   : > { %v4068_v24 = vpop.f32.mrb[57].mxu1 }
0x1cce   : > { %v2914_v25 = vpop.f32.mrb[58].mxu1 }
0x1ccf   : > { %v4069_v26 = vpop.f32.mrb[59].mxu1 }
0x1cd4   : > { %v2864_v27 = vpop.f32.mrb[64].mxu0 }
0x1cd5   : > { %v5102_v28 = vadd.f32 %v2911_v15, %v2864_v27  ;;  %v4062_v29 = vpop.f32.mrb[65].mxu0 }
0x1cd6   : > { %v2867_v30 = vpop.f32.mrb[66].mxu0 }
0x1cd7   : > { %v5104_v32 = vadd.f32 %v2914_v25, %v2867_v30  ;;  %v4063_v33 = vpop.f32.mrb[67].mxu0 }
0x1cdc   : > { %v2962_v13 = vpop.f32.mrb[68].mxu0 }
0x1cdd   : > { %v2969_v34 = vmul.f32 0.35355338, %v2962_v13  ;;  %v4074_v14 = vpop.f32.mrb[69].mxu0 }
0x1cde   : > { %v2965_v16 = vpop.f32.mrb[70].mxu0 }
0x1cdf   : > { %v2970_v35 = vmul.f32 0.35355338, %v2965_v16  ;;  %v4075_v17 = vpop.f32.mrb[71].mxu0  ;;  %v2971_v18 = vsel %vm1603_vm11, %v2969_v34, -inf }
0x1ce0   : > { %2972 = vmax.xlane.f32.xlu0 %v2971_v18 }
0x1ce1   : > { %v2974_v36 = vsel %vm1603_vm11, %v2970_v35, -inf }
0x1ce2   : > { %2975 = vmax.xlane.f32.xlu1 %v2974_v36 }
0x1cf3   : > { %3094 = vrot.lane.b32.xlu1 %v5038_v49, %s5274_s9 }
0x1cf7   : > { %3092 = vrot.lane.b32.xlu1 %v5038_v49, %s5275_s13  ;;  %s4432_s13 = smov [#allocation3]  }
0x1cf8   : > { %s4359_s20 = sshll.u32 %s4432_s13, 4  ;;  %s4360_s20 = int_to_ptr.vmem [resolvable:$false] %s4359_s20 }
0x1cf9   : > { %s4361_s15 = scalar_lea.vmem %s4360_s20, 512 }
0x1d6d   : > { %v2973_v19 = vpop.xlane.xlu0 %2972 }
0x1d6e   : > { %v2977_v20 = vsub.f32 %v2969_v34, %v2973_v19 }
0x1d6f   : > { %v2976_v37 = vpop.xlane.xlu1 %2975 }
0x1d70   : > { %v2979_v38 = vmul.f32 1.442695, %v2977_v20  ;;  %v2978_v39 = vsub.f32 %v2970_v35, %v2976_v37 }
0x1d72   : > { %4327 = vpow2.f32 %v2979_v38  ;;  %v2981_v40 = vmul.f32 1.442695, %v2978_v39 }
0x1d73   : > { %v3095_v53 = vpop.permute.xlu1 %3094 }
0x1d74   : > { %4329 = vpow2.f32 %v2981_v40  ;;  %v3100_v58 = vsel %vm1553_vm10, %v3095_v53, 0 }
0x1d77   : > { %v3093_v59 = vpop.permute.xlu1 %3092 }
0x1d7c   : > { %v4328_v41 = vpop.eup %4327 }
0x1d7d   : > { %v2983_v23 = vsel %vm1603_vm11, %v4328_v41, 0.0 }
0x1d7e   : > { %v4330_v42 = vpop.eup %4329  ;;  %2984 = vadd.xlane.f32.xlu0 %v2983_v23 }
0x1d7f   : > { %v2986_v43 = vsel %vm1603_vm11, %v4330_v42, 0.0 }
0x1d82   : > { %2987 = vadd.xlane.f32.xlu0 %v2986_v43 }
0x1d98   : > { %2994 = vrot.lane.b32.xlu0 %v5038_v49, %s5276_s14  ;;  %s269_s14 = sand.u32 1, %s4409_s25  }
0x1d99   : > { %s5219_s9 = scalar_lea.sflag [#allocation4], %s269_s14 }
0x1e0b   : > { %v2985_v44 = vpop.xlane.xlu0 %2984 }
0x1e0c   : > { %4331 = vrcp.f32 %v2985_v44 }
0x1e0f   : > { %v2988_v50 = vpop.xlane.xlu0 %2987 }
0x1e10   : > { %4333 = vrcp.f32 %v2988_v50 }
0x1e13   : > { %v2995_v51 = vpop.permute.xlu0 %2994 }
0x1e14   : > { %4077 = vmatpush3.bf16.msra.mxu1 %v2995_v51  ;;  %v3706_v51 = vld [vmem:[%s5262_s2 + $0x11] ss:$0 sm:$0xff] }
0x1e15   : > { %4088 = vmatprep.subr.bf16.mxu1 %v4419_v45 }
0x1e16   : > { %v4332_v47 = vpop.eup %4331 }
0x1e17   : > { %v2991_v48 = vmul.f32 %v4332_v47, %v4328_v41 }
0x1e1a   : > { %v4334_v46 = vpop.eup %4333 }
0x1e1b   : > { %v2992_v52 = vmul.f32 %v4334_v46, %v4330_v42 }
0x1e1d   : > { %v2993_v57 = vpack.c.bf16 %v2992_v52, %v2991_v48 }
0x1e1f   : > { %4079 = vmatmul.mubr.msk.bf16.vlgmr.msra.gmra.mrb[60].mxu1 %vm1603_vm11, %v2993_v57 }
0x1e20   : > { %4089 = vmatpush3.bf16.xpose.msra.mxu1 %v3100_v58  ;;  %4090 = vmatprep.mubr.msk.bf16.mxu1 %vm4420_vm3, %v4419_v45 }
0x1e21   : > { %4100 = vmatprep.subr.bf16.mxu1 %v4419_v45 }
0x1e27   : > { %4091 = vmatmul.mubr.msk.bf16.vlgmr.msra.gmra.mrb[64].mxu1 %vm1553_vm10, %v3093_v59 }
0x1e28   : > { %4102 = vmatprep.mubr.msk.bf16.mxu1 %vm4420_vm3, %v4419_v45 }
0x1ef2   : > { %v3034_v21 = vpop.f32.mrb[60].mxu1 }
0x1ef3   : > { %v4080_v54 = vpop.f32.mrb[61].mxu1 }
0x1ef4   : > { %v3037_v22 = vpop.f32.mrb[62].mxu1 }
0x1ef5   : > { %v3041_v62 = vpack.c.bf16 %v3037_v22, %v3034_v21  ;;  %v4081_v63 = vpop.f32.mrb[63].mxu1 }
0x1ef7   : > { %4085 = vmatmul.mubr.msk.bf16.vlgmr.msra.gmra.mrb[72].mxu0 %vm1553_vm10, %v3041_v62 }
0x1ef8   : > { %4096 = vmatprep.mubr.msk.bf16.mxu0 %vm4420_vm3, %v4419_v45 }
0x1efa   : > { %v3136_v0 = vpop.f32.mrb[64].mxu1 }
0x1efb   : > { %v3143_v1 = vmul.f32 0.35355338, %v3136_v0  ;;  %v4092_v2 = vpop.f32.mrb[65].mxu1  ;;  %v4217_v0 = vld [vmem:[%s5265_s5 + $0x10] sm:$0xff]  }
0x1efc   : > { %v3139_v3 = vpop.f32.mrb[66].mxu1 }
0x1efd   : > { %v3144_v4 = vmul.f32 0.35355338, %v3139_v3  ;;  %v4093_v5 = vpop.f32.mrb[67].mxu1  ;;  %v3145_v6 = vsel %vm1603_vm11, %v3143_v1, -inf }
0x1efe   : > { %3146 = vmax.xlane.f32.xlu1 %v3145_v6 }
0x1eff   : > { %v3148_v7 = vsel %vm1603_vm11, %v3144_v4, -inf }
0x1f00   : > { %3149 = vmax.xlane.f32.xlu0 %v3148_v7 }
0x1f0f   : > { %3168 = vrot.lane.b32.xlu1 %v5038_v49, %s5277_s21  ;;  %s3607_s21 = sshll.u32 %s269_s14, 4 }
0x1f10   : > { %s271_s19 = scalar_lea.vmem [#allocation3], %s3607_s21 }
0x1f11   : > { %s3541_s22 = sshll.u32 %s271_s19, 4  ;;  %s5216_s22 = int_to_ptr.vmem [resolvable:$true] %s3541_s22 }
0x1f12   : > { %s4355_s28 = scalar_lea.vmem %s5216_s22, 256  ;;  %p4362_p0 = scmp.lt.s32.totalorder %s5216_s22, %s4360_s20 }
0x1f13   : > { %p4356_p11 = scmp.ne.s32.totalorder %s5216_s22, %s4355_s28  ;;  %p4363_p1 = scmp.lt.s32.totalorder %s4361_s15, %s4355_s28 }
0x1f15   : > { %p4357_p12 = pnand %p4356_p11, %p4513_p5  ;;  %p4364_p2 = por %p4363_p1, %p4362_p0 }
0x1f17   : > { %p4358_p13 = pneg %p4357_p12 }
0x1f19   : > { %p4365_p3 = pnand %p4364_p2, %p4358_p13 }
0x1f8b   : > { %v3147_v8 = vpop.xlane.xlu1 %3146 }
0x1f8c   : > { %v3151_v9 = vsub.f32 %v3143_v1, %v3147_v8  ;;  %v4218_v1 = vld [vmem:[%s5265_s5 + $0x18] sm:$0xff]  }
0x1f8d   : > { %v3150_v10 = vpop.xlane.xlu0 %3149 }
0x1f8e   : > { %v3153_v11 = vmul.f32 1.442695, %v3151_v9  ;;  %v3152_v12 = vsub.f32 %v3144_v4, %v3150_v10  ;;  %v3707_v10 = vld [vmem:[%s5262_s2 + $0x12] ss:$0 sm:$0xff] }
0x1f8f   : > { %v3169_v15 = vpop.permute.xlu1 %3168 }
0x1f90   : > { %4335 = vpow2.f32 %v3153_v11  ;;  %v3155_v24 = vmul.f32 1.442695, %v3152_v12  ;;  %4095 = vmatpush3.bf16.msra.mxu0 %v3169_v15 }
0x1f91   : > { %4106 = vmatprep.subr.bf16.mxu0 %v4419_v45 }
0x1f92   : > { %4337 = vpow2.f32 %v3155_v24  ;;  %v3708_v24 = vld [vmem:[%s5262_s2 + $0x13] ss:$0 sm:$0xff] }
0x1f9a   : > { %v4336_v25 = vpop.eup %4335 }
0x1f9b   : > { %v3157_v26 = vsel %vm1603_vm11, %v4336_v25, 0.0 }
0x1f9c   : > { %v4338_v27 = vpop.eup %4337  ;;  %3158 = vadd.xlane.f32.xlu0 %v3157_v26 }
0x1f9d   : > { %v3160_v29 = vsel %vm1603_vm11, %v4338_v27, 0.0 }
0x1fa0   : > { %3161 = vadd.xlane.f32.xlu0 %v3160_v29 }
0x1fca   : > { %v3083_v49 = vpop.f32.mrb[72].mxu0 }
0x1fcb   : > { %v3090_v30 = vadd.f32 %v3083_v49, %v5102_v28  ;;  %v4086_v33 = vpop.f32.mrb[73].mxu0  ;;  %v3693_v28 = vld [vmem:[%s5264_s4 + $0x38] sm:$0xff]  ;;  %v4219_v49 = vld [vmem:[%s5266_s6 + $0x20] sm:$0xff]  }
0x1fcc   : > { %v3086_v13 = vpop.f32.mrb[74].mxu0  ;;  %v4221_v33 = vld [vmem:[%s5266_s6 + $0x30] sm:$0xff]  }
0x1fcd   : > { %v3091_v34 = vadd.f32 %v3086_v13, %v5104_v32  ;;  %v4087_v14 = vpop.f32.mrb[75].mxu0  ;;  %v3216_v32 = vpack.c.bf16 %v3693_v28, %v3693_v28  ;;  %v4222_v13 = vld [vmem:[%s5266_s6 + $0x38] sm:$0xff]  }
0x1fcf   : > { %v3221_v37 = vsel %vm1804_vm12, %v3216_v32, 0 }
0x1fd0   : > { %4101 = vmatpush3.bf16.msra.mxu1 %v3221_v37 }
0x1fd1   : > { %4114 = vmatprep.subr.bf16.mxu1 %v4419_v45 }
0x2029   : > { %v3159_v16 = vpop.xlane.xlu0 %3158 }
0x202a   : > { %4339 = vrcp.f32 %v3159_v16 }
0x202d   : > { %v3162_v35 = vpop.xlane.xlu0 %3161 }
0x202e   : > { %4341 = vrcp.f32 %v3162_v35 }
0x2034   : > { %v4340_v17 = vpop.eup %4339 }
0x2035   : > { %v3165_v36 = vmul.f32 %v4340_v17, %v4336_v25 }
0x2038   : > { %v4342_v18 = vpop.eup %4341 }
0x2039   : > { %v3166_v19 = vmul.f32 %v4342_v18, %v4338_v27 }
0x203b   : > { %v3167_v20 = vpack.c.bf16 %v3166_v19, %v3165_v36 }
0x203d   : > { %4097 = vmatmul.mubr.msk.bf16.vlgmr.msra.gmra.mrb[76].mxu0 %vm1603_vm11, %v3167_v20 }
0x203e   : > { %4110 = vmatprep.mubr.msk.bf16.mxu0 %vm4420_vm3, %v4419_v45  ;;  %4107 = vmatpush3.bf16.msra.mxu0 %v4217_v0 }
0x203f   : > { %4108 = vmatprep.subr.bf16.mxu0 %v4419_v45 }
0x2042   : > { %4109 = vmatpush3.bf16.msra.mxu0 %v4218_v1 }
0x2110   : > { %v3208_v38 = vpop.f32.mrb[76].mxu0 }
0x2111   : > { %v4098_v39 = vpop.f32.mrb[77].mxu0 }
0x2112   : > { %v3211_v40 = vpop.f32.mrb[78].mxu0 }
0x2113   : > { %v3215_v41 = vpack.c.bf16 %v3211_v40, %v3208_v38  ;;  %v4099_v23 = vpop.f32.mrb[79].mxu0 }
0x2115   : > { %4103 = vmatmul.mubr.msk.bf16.vlgmr.msra.gmra.mrb[68].mxu1 %vm1553_vm10, %v3215_v41 }
0x2116   : > { %4122 = vmatprep.mubr.msk.bf16.mxu1 %vm4420_vm3, %v4419_v45  ;;  %4115 = vmatpush3.bf16.msra.mxu1 %v4219_v49 }
0x2117   : > { %4116 = vmatprep.subr.bf16.mxu1 %v4419_v45 }
0x21e8   : > { %v3257_v42 = vpop.f32.mrb[68].mxu1 }
0x21e9   : > { %v3264_v43 = vadd.f32 %v3257_v42, %v3090_v30  ;;  %v4104_v44 = vpop.f32.mrb[69].mxu1  ;;  %v4220_v30 = vld [vmem:[%s5266_s6 + $0x28] sm:$0xff]  }
0x21ea   : > { %v3260_v50 = vpop.f32.mrb[70].mxu1  ;;  %4117 = vmatpush3.bf16.msra.mxu1 %v4220_v30 }
0x21eb   : > { %v3266_v47 = vadd.f32 %v3264_v43, %v5026_v55  ;;  %v3265_v46 = vadd.f32 %v3260_v50, %v3091_v34  ;;  %v4105_v48 = vpop.f32.mrb[71].mxu1  ;;  %4118 = vmatprep.subr.bf16.mxu1 %v4419_v45  ;;  %v3713_v34 = vld [vmem:[%s5262_s2 + $0x14] ss:$0 sm:$0xff] }
0x21ed   : > { %v3267_v52 = vadd.f32 %v3265_v46, %v5028_v56  ;;  %v3273_v53 = vadd.f32 %v3706_v51, %v3266_v47 }
0x21ee   : > { %4119 = vmatpush3.bf16.msra.mxu1 %v4221_v33 }
0x21ef   : > { %v3277_v57 = vsel %vm493_vm2, %v3273_v53, 0.0  ;;  %v3274_v58 = vadd.f32 %v3706_v51, %v3267_v52  ;;  %4120 = vmatprep.subr.bf16.mxu1 %v4419_v45  ;;  %v3725_v52 = vld [vmem:[%s5262_s2 + $0x15] ss:$0 sm:$0xff] }
0x21f0   : > { %3278 = vadd.xlane.f32.xlu0 %v3277_v57 }
0x21f1   : > { %v3280_v59 = vsel %vm493_vm2, %v3274_v58, 0.0 }
0x21f2   : > { %4121 = vmatpush3.bf16.msra.mxu1 %v4222_v13 }
0x21f4   : > { %3281 = vadd.xlane.f32.xlu0 %v3280_v59 }
0x227d   : > { %v3279_v60 = vpop.xlane.xlu0 %3278 }
0x227e   : > { %v3283_v61 = vmul.f32 0.03125, %v3279_v60 }
0x2280   : > { %v3285_v31 = vsub.f32 %v3273_v53, %v3283_v61 }
0x2281   : > { %v3282_v21 = vpop.xlane.xlu0 %3281 }
0x2282   : > { %v3284_v54 = vmul.f32 0.03125, %v3282_v21  ;;  %v3287_v22 = vmul.f32 %v3285_v31, %v3285_v31 }
0x2284   : > { %v3286_v62 = vsub.f32 %v3274_v58, %v3284_v54  ;;  %v3289_v55 = vsel %vm493_vm2, %v3287_v22, 0.0 }
0x2285   : > { %3290 = vadd.xlane.f32.xlu0 %v3289_v55 }
0x2286   : > { %v3288_v63 = vmul.f32 %v3286_v62, %v3286_v62 }
0x2288   : > { %v3292_v56 = vsel %vm493_vm2, %v3288_v63, 0.0 }
0x2289   : > { %3293 = vadd.xlane.f32.xlu0 %v3292_v56 }
0x2312   : > { %v3291_v2 = vpop.xlane.xlu0 %3290 }
0x2313   : > { %v3295_v3 = vmul.f32 0.03125, %v3291_v2 }
0x2315   : > { %v3297_v4 = vadd.f32 1e-05, %v3295_v3 }
0x2316   : > { %v3294_v5 = vpop.xlane.xlu0 %3293 }
0x2317   : > { %4343 = vrsqrt.f32 %v3297_v4  ;;  %v3296_v6 = vmul.f32 0.03125, %v3294_v5 }
0x2319   : > { %v3298_v7 = vadd.f32 1e-05, %v3296_v6 }
0x231b   : > { %4345 = vrsqrt.f32 %v3298_v7 }
0x2321   : > { %v4344_v8 = vpop.eup %4343 }
0x2322   : > { %v3301_v9 = vmul.f32 %v4344_v8, %v3285_v31 }
0x2324   : > { %v3307_v12 = vmul.f32 %v3707_v10, %v3301_v9 }
0x2325   : > { %v4346_v11 = vpop.eup %4345 }
0x2326   : > { %v3302_v15 = vmul.f32 %v4346_v11, %v3286_v62  ;;  %v3313_v26 = vadd.f32 %v3708_v24, %v3307_v12 }
0x2328   : > { %v3308_v25 = vmul.f32 %v3707_v10, %v3302_v15  ;;  %v3731_v15 = vld [vmem:[%s5262_s2 + $0x16] ss:$0 sm:$0xff] }
0x232a   : > { %v3314_v27 = vadd.f32 %v3708_v24, %v3308_v25  ;;  %v3732_v25 = vld [vmem:[%s5262_s2 + $0x17] ss:$0 sm:$0xff] }
0x232c   : > { %v3320_v29 = vpack.c.bf16 %v3314_v27, %v3313_v26 }
0x232e   : > { %4111 = vmatmul.mubr.msk.bf16.vlgmr.msra.gmra.mrb[80].mxu0 %vm493_vm2, %v3320_v29 }
0x2401   : > { %v3375_v14 = vpop.f32.mrb[80].mxu0 }
0x2402   : > { %v3376_v16 = vadd.f32 %v3713_v34, %v3375_v14  ;;  %v4112_v35 = vpop.f32.mrb[81].mxu0 }
0x2403   : > { %v3378_v17 = vpop.f32.mrb[82].mxu0 }
0x2404   : > { %v3382_v18 = vmul.f32 %v3376_v16, %v3376_v16  ;;  %v3379_v36 = vadd.f32 %v3713_v34, %v3378_v17  ;;  %v4113_v19 = vpop.f32.mrb[83].mxu0 }
0x2406   : > { %v3384_v20 = vmul.f32 %v3382_v18, %v3376_v16  ;;  %v3383_v28 = vmul.f32 %v3379_v36, %v3379_v36 }
0x2408   : > { %v3386_v32 = vmul.f32 0.044715, %v3384_v20  ;;  %v3385_v45 = vmul.f32 %v3383_v28, %v3379_v36 }
0x240a   : > { %v3388_v37 = vadd.f32 %v3386_v32, %v3376_v16  ;;  %v3387_v38 = vmul.f32 0.044715, %v3385_v45 }
0x240c   : > { %v3390_v39 = vmul.f32 0.7978846, %v3388_v37  ;;  %v3389_v40 = vadd.f32 %v3387_v38, %v3379_v36 }
0x240e   : > { %4347 = vtanh.f32 %v3390_v39  ;;  %v3391_v41 = vmul.f32 0.7978846, %v3389_v40 }
0x2410   : > { %4349 = vtanh.f32 %v3391_v41 }
0x2418   : > { %v4348_v23 = vpop.eup %4347 }
0x2419   : > { %v3394_v42 = vadd.f32 1.0, %v4348_v23 }
0x241a   : > { %v4350_v43 = vpop.eup %4349 }
0x241b   : > { %v3396_v44 = vmul.f32 0.5, %v3394_v42  ;;  %v3395_v50 = vadd.f32 1.0, %v4350_v43 }
0x241d   : > { %v3397_v51 = vmul.f32 0.5, %v3395_v50  ;;  %v3398_v47 = vmul.f32 %v3396_v44, %v3376_v16 }
0x241f   : > { %v3399_v46 = vmul.f32 %v3397_v51, %v3379_v36 }
0x2421   : > { %v3409_v48 = vpack.c.bf16 %v3399_v46, %v3398_v47 }
0x2423   : > { %4123 = vmatmul.mubr.msk.bf16.vlgmr.msra.gmra.mrb[72].mxu1 %vm2415_vm13, %v3409_v48 }
0x24f6   : > { %v3476_v53 = vpop.f32.mrb[72].mxu1 }
0x24f7   : > { %v3477_v57 = vadd.f32 %v3725_v52, %v3476_v53  ;;  %v4124_v58 = vpop.f32.mrb[73].mxu1 }
0x24f8   : > { %v3479_v59 = vpop.f32.mrb[74].mxu1 }
0x24f9   : > { %v3480_v60 = vadd.f32 %v3725_v52, %v3479_v59  ;;  %v4125_v61 = vpop.f32.mrb[75].mxu1  ;;  %v3483_v31 = vadd.f32 %v3477_v57, %v3313_v26 }
0x24fb   : > { %v3487_v21 = vsel %vm493_vm2, %v3483_v31, 0.0  ;;  %v3484_v54 = vadd.f32 %v3480_v60, %v3314_v27 }
0x24fc   : > { %3488 = vadd.xlane.f32.xlu1 %v3487_v21 }
0x24fd   : > { %v3490_v22 = vsel %vm493_vm2, %v3484_v54, 0.0 }
0x24fe   : > { %3491 = vadd.xlane.f32.xlu0 %v3490_v22 }
0x2589   : > { %v3489_v62 = vpop.xlane.xlu1 %3488 }
0x258a   : > { %v3493_v55 = vmul.f32 0.03125, %v3489_v62 }
0x258b   : > { %v3492_v63 = vpop.xlane.xlu0 %3491 }
0x258c   : > { %v3495_v56 = vsub.f32 %v3483_v31, %v3493_v55  ;;  %v3494_v0 = vmul.f32 0.03125, %v3492_v63 }
0x258e   : > { %v3496_v1 = vsub.f32 %v3484_v54, %v3494_v0  ;;  %v3497_v2 = vmul.f32 %v3495_v56, %v3495_v56 }
0x2590   : > { %v3499_v3 = vsel %vm493_vm2, %v3497_v2, 0.0  ;;  %v3498_v4 = vmul.f32 %v3496_v1, %v3496_v1 }
0x2591   : > { %3500 = vadd.xlane.f32.xlu0 %v3499_v3 }
0x2592   : > { %v3502_v5 = vsel %vm493_vm2, %v3498_v4, 0.0 }
0x2595   : > { %3503 = vadd.xlane.f32.xlu0 %v3502_v5 }
0x261e   : > { %v3501_v6 = vpop.xlane.xlu0 %3500 }
0x261f   : > { %v3505_v7 = vmul.f32 0.03125, %v3501_v6 }
0x2621   : > { %v3507_v8 = vadd.f32 1e-05, %v3505_v7 }
0x2622   : > { %v3504_v9 = vpop.xlane.xlu0 %3503 }
0x2623   : > { %4351 = vrsqrt.f32 %v3507_v8  ;;  %v3506_v10 = vmul.f32 0.03125, %v3504_v9 }
0x2625   : > { %v3508_v11 = vadd.f32 1e-05, %v3506_v10 }
0x2627   : > { %4353 = vrsqrt.f32 %v3508_v11 }
0x262d   : > { %v4352_v12 = vpop.eup %4351 }
0x262e   : > { %v3511_v24 = vmul.f32 %v4352_v12, %v3495_v56 }
0x2630   : > { %v3517_v26 = vmul.f32 %v3731_v15, %v3511_v24 }
0x2631   : > { %v4354_v27 = vpop.eup %4353 }
0x2632   : > { %v3512_v29 = vmul.f32 %v4354_v27, %v3496_v1  ;;  %v3523_v49 = vadd.f32 %v3732_v25, %v3517_v26 }
0x2634   : > { %v3518_v30 = vmul.f32 %v3731_v15, %v3512_v29  ;;  %3525 = vst.msk [vmem:[%s271_s19] sm:$0xff] %vm493_vm2, %v3523_v49 }
0x2636   : > { %v3524_v33 = vadd.f32 %v3732_v25, %v3518_v30 }
0x2638   : > { %3526 = vst.msk [vmem:[%s271_s19 + $0x8] sm:$0xff] %vm493_vm2, %v3524_v33 }
0x2639   : > { %4368 = shalt.err (!%p4365_p3)
}
0x263a   : > { %s4369_s14 = scalar_lea.hbm %s5214_s8, 256  ;;  %s4373_s17 = scalar_lea.hbm %s5267_s7, 512 }
0x263b   : > { %p4370_p4 = scmp.ne.s32.totalorder %s5214_s8, %s4369_s14  ;;  %p4374_p9 = scmp.lt.u32.totalorder %s5214_s8, %s5267_s7 }
0x263c   : > { %p4375_p10 = scmp.lt.u32.totalorder %s4373_s17, %s4369_s14  ;;  %p4377_p12 = scmp.lt.u32.totalorder %s4369_s14, %s5214_s8 }
0x263d   : > { %p4371_p7 = pnand %p4370_p4, %p4513_p5 }
0x263e   : > { %p4376_p11 = por %p4375_p10, %p4374_p9 }
0x263f   : > { %p4372_p8 = pneg %p4371_p7 }
0x2640   : > { %p4378_p13 = por %p4377_p12, %p4376_p11 }
0x2642   : > { %p4379_p0 = pnand %p4378_p13, %p4372_p8 }
0x2644   : > { %4382 = shalt.err (!%p4379_p0)
}
0x2645   : > { %s4433_s23 = smov 128   ;;  %s4434_s29 = smov 8  }
0x2646   : > { %4135 = dma.vmem_to_hbm [thread:$0]  (%p4513_p5), %s5216_s22, 256, %s5214_s8, %s5219_s9, %s4433_s23, %s4433_s23, %s4434_s29  }
0x2647 PF: > { %p4141_p1 = scmp.ge.s32.totalorder %s4417_s27, 2  ;;  %s3556_s28 = sand.u32 1, %s4405_s24  }
0x2648   : > { %s3557_s13 = scalar_lea.sflag [#allocation4], %s3556_s28 }
0x2649   : > { %p4138_p2 = pnand %p4141_p1, %p4517_p6 }
0x264b   : > { %4400 = dma.done.wait (!%p4138_p2), %s3557_s13, 256  }
0x264c   : > { %4402 = vsyncadd (!%p4138_p2), %s3557_s13, 4294967040  ;;  %p17_p3 = scmp.ge.s32.totalorder %s4500_s30, 4   ;;  %s5278_s24 = smov %s4409_s25 }
0x264d   : > { %s5279_s25 = smov %s4413_s26  ;;  %s5280_s26 = smov %s4511_s10 }
0x264e   : > { %s5281_s27 = smov %s4500_s30  ;;  %19 = sbr.rel (!%p17_p3) target bundleno = 3 (0x3), region = 94 }
0x2655   :  { %3562 = vsyncpa [#allocation4], 1 }
0x2656   :  { %3564 = vsyncpa [#allocation4 + $0x1], 1 }

</bundles_post_ra>
